<compile_context>
chip_gen: v5e
topology: v5e:2x2
jax: 0.10.0
libtpu: 0.0.40
codegen_flags: <defaults>
</compile_context>

<pallas_src>
import math
import functools

import jax
import jax.numpy as jnp
from jax import lax
from jax.experimental import pallas as pl
from jax.experimental.pallas import tpu as pltpu

NEG = jnp.float32(-1e30)   # finite "-inf" for additive masks (avoids NaN in softmax)
EPS = 1e-5                 # nn.LayerNorm default eps
_VMEM_LIMIT = 32 * 1024 * 1024   # explicit budget, safe on v5e/v6e/v7x


# --------------------------------------------------------------------------
# In-kernel helpers (operate on VMEM-resident values)
# --------------------------------------------------------------------------
def _bf(x):
    return x.astype(jnp.bfloat16)


def _layernorm(y, g, b):
    mu = jnp.mean(y, axis=-1, keepdims=True)
    yc = y - mu
    var = jnp.mean(yc * yc, axis=-1, keepdims=True)
    return yc * lax.rsqrt(var + EPS) * g + b


def _mha_ctx(q_bf, k_bf, v_bf, add_mask, ctx_ref, *, H, Dh):
    """Per-head attention; writes the lane-dense context into `ctx_ref`.

    q_bf [Bs, Lq, D], k_bf/v_bf [Bs, Lk, D] (bf16); add_mask f32 broadcastable
    to [Bs, Lq, Lk] or None.  Each head's context is stored into its 32-lane
    slice of the f32 VMEM scratch so the caller can run the output projection
    as a single K=D matmul on the lane-dense [Bs*Lq, D] context.
    """
    scale = jnp.float32(1.0 / math.sqrt(Dh))
    for h in range(H):
        sl = slice(h * Dh, (h + 1) * Dh)
        s = jnp.einsum('bqd,bkd->bqk', q_bf[:, :, sl], k_bf[:, :, sl],
                       preferred_element_type=jnp.float32) * scale
        if add_mask is not None:
            s = s + add_mask
        m = jnp.max(s, axis=-1, keepdims=True)
        p = jnp.exp(s - m)                                 # max elem -> 1, denom >= 1
        denom = jnp.sum(p, axis=-1, keepdims=True)
        p = p * pl.reciprocal(denom, approx=True)          # EUP slot, ~free
        ctx_ref[:, :, sl] = jnp.einsum('bqk,bkd->bqd', _bf(p), v_bf[:, :, sl],
                                       preferred_element_type=jnp.float32)


# --------------------------------------------------------------------------
# Fused stack kernels (grid = (batch_split, layer); activation carried in VMEM)
# --------------------------------------------------------------------------
def _encoder_stack_kernel(x_ref, kpm_ref,
                          wqkv_ref, bqkv_ref, wo_ref, bo_ref,
                          ln1g_ref, ln1b_ref,
                          w1_ref, b1_ref, w2_ref, b2_ref,
                          ln2g_ref, ln2b_ref,
                          fng_ref, fnb_ref,
                          o_ref,
                          x_sc, ctx_sc, *, H, Dh):
    l = pl.program_id(1)
    Bs, S, D = x_sc.shape

    @pl.when(l == 0)
    def _():
        x_sc[...] = x_ref[...]

    x = x_sc[...].reshape(Bs * S, D)                         # f32 residual stream
    xb = _bf(x)                                              # hoisted bf16 cast
    kpm = kpm_ref[...]                                       # [Bs, 1, S] additive

    # ---- self-attention ----
    qkv = jnp.dot(xb, wqkv_ref[0], preferred_element_type=jnp.float32) + bqkv_ref[0]
    qkv_bf = _bf(qkv).reshape(Bs, S, 3 * D)
    _mha_ctx(qkv_bf[:, :, :D], qkv_bf[:, :, D:2 * D], qkv_bf[:, :, 2 * D:],
             kpm, ctx_sc, H=H, Dh=Dh)
    sa = jnp.dot(_bf(ctx_sc[...].reshape(Bs * S, D)), wo_ref[0],
                 preferred_element_type=jnp.float32) + bo_ref[0]
    x1 = _layernorm(x + sa, ln1g_ref[0], ln1b_ref[0])

    # ---- feed-forward ----
    x1b = _bf(x1)
    h1 = jnp.maximum(
        jnp.dot(x1b, w1_ref[0], preferred_element_type=jnp.float32) + b1_ref[0], 0.0)
    ff = jnp.dot(_bf(h1), w2_ref[0], preferred_element_type=jnp.float32) + b2_ref[0]
    y = _layernorm(x1 + ff, ln2g_ref[0], ln2b_ref[0])

    x_sc[...] = y.reshape(Bs, S, D)

    @pl.when(l == pl.num_programs(1) - 1)
    def _():
        # final encoder norm fused; emit bf16 memory for the decoder stack
        o_ref[...] = _bf(_layernorm(y, fng_ref[...], fnb_ref[...])).reshape(Bs, S, D)


def _decoder_stack_kernel(x_ref, mem_ref, causal_ref, kpm_ref,
                          wqkv_ref, bqkv_ref, wo_ref, bo_ref,
                          ln1g_ref, ln1b_ref,
                          cwq_ref, cbq_ref, cwkv_ref, cbkv_ref, cwo_ref, cbo_ref,
                          ln2g_ref, ln2b_ref,
                          w1_ref, b1_ref, w2_ref, b2_ref,
                          ln3g_ref, ln3b_ref,
                          fng_ref, fnb_ref,
                          o_ref,
                          x_sc, ctx_sc, *, H, Dh):
    l = pl.program_id(1)
    Bs, T, D = x_sc.shape
    S = mem_ref.shape[1]

    @pl.when(l == 0)
    def _():
        x_sc[...] = x_ref[...]

    x = x_sc[...].reshape(Bs * T, D)
    xb = _bf(x)
    self_mask = causal_ref[...][None, :, :] + kpm_ref[...]   # [Bs, T, T]

    # ---- masked self-attention ----
    qkv = jnp.dot(xb, wqkv_ref[0], preferred_element_type=jnp.float32) + bqkv_ref[0]
    qkv_bf = _bf(qkv).reshape(Bs, T, 3 * D)
    _mha_ctx(qkv_bf[:, :, :D], qkv_bf[:, :, D:2 * D], qkv_bf[:, :, 2 * D:],
             self_mask, ctx_sc, H=H, Dh=Dh)
    sa = jnp.dot(_bf(ctx_sc[...].reshape(Bs * T, D)), wo_ref[0],
                 preferred_element_type=jnp.float32) + bo_ref[0]
    x1 = _layernorm(x + sa, ln1g_ref[0], ln1b_ref[0])

    # ---- cross-attention (memory_key_padding_mask not used in reference) ----
    x1b = _bf(x1)
    qc = jnp.dot(x1b, cwq_ref[0], preferred_element_type=jnp.float32) + cbq_ref[0]
    memb = mem_ref[...].reshape(Bs * S, D)                   # bf16 already
    kvc = jnp.dot(memb, cwkv_ref[0], preferred_element_type=jnp.float32) + cbkv_ref[0]
    kv_bf = _bf(kvc).reshape(Bs, S, 2 * D)
    _mha_ctx(_bf(qc).reshape(Bs, T, D), kv_bf[:, :, :D], kv_bf[:, :, D:],
             None, ctx_sc, H=H, Dh=Dh)
    ca = jnp.dot(_bf(ctx_sc[...].reshape(Bs * T, D)), cwo_ref[0],
                 preferred_element_type=jnp.float32) + cbo_ref[0]
    x2 = _layernorm(x1 + ca, ln2g_ref[0], ln2b_ref[0])

    # ---- feed-forward ----
    x2b = _bf(x2)
    h1 = jnp.maximum(
        jnp.dot(x2b, w1_ref[0], preferred_element_type=jnp.float32) + b1_ref[0], 0.0)
    ff = jnp.dot(_bf(h1), w2_ref[0], preferred_element_type=jnp.float32) + b2_ref[0]
    y = _layernorm(x2 + ff, ln3g_ref[0], ln3b_ref[0])

    x_sc[...] = y.reshape(Bs, T, D)

    @pl.when(l == pl.num_programs(1) - 1)
    def _():
        # final decoder norm fused; emit bf16 for the vocab projection
        o_ref[...] = _bf(_layernorm(y, fng_ref[...], fnb_ref[...])).reshape(Bs, T, D)


def _vocab_proj_kernel(y_ref, w_ref, b_ref, o_ref):
    B, T, D = y_ref.shape
    yb = y_ref[...].reshape(B * T, D)                        # bf16, rows folded
    logits = jnp.dot(yb, w_ref[...], preferred_element_type=jnp.float32) + b_ref[...]
    o_ref[...] = logits.reshape(B, T, -1)


# --------------------------------------------------------------------------
# Pallas wrappers
# --------------------------------------------------------------------------
_ENC_W = ["wqkv", "bqkv", "wo", "bo", "ln1_g", "ln1_b",
          "w1", "b1", "w2", "b2", "ln2_g", "ln2_b"]
_DEC_W = ["wqkv", "bqkv", "wo", "bo", "ln1_g", "ln1_b",
          "cwq", "cbq", "cwkv", "cbkv", "cwo", "cbo", "ln2_g", "ln2_b",
          "w1", "b1", "w2", "b2", "ln3_g", "ln3_b"]


def _num_parallel_splits(B):
    # keep a >=2 "parallel" axis when possible so v7x's 2 TensorCores split work
    return 2 if (B >= 2 and B % 2 == 0) else 1


def _stacked_specs(p, names):
    return [pl.BlockSpec((1,) + tuple(p[k].shape[1:]), lambda nb, l: (l, 0, 0))
            for k in names]


def encoder_stack(x, kpm, p, fng, fnb, *, H):
    B, S, D = x.shape
    L = p["wqkv"].shape[0]
    NB = _num_parallel_splits(B)
    Bs = B // NB
    return pl.pallas_call(
        functools.partial(_encoder_stack_kernel, H=H, Dh=D // H),
        out_shape=jax.ShapeDtypeStruct((B, S, D), jnp.bfloat16),
        grid=(NB, L),
        in_specs=[pl.BlockSpec((Bs, S, D), lambda nb, l: (nb, 0, 0)),
                  pl.BlockSpec((Bs, 1, S), lambda nb, l: (nb, 0, 0))]
                 + _stacked_specs(p, _ENC_W)
                 + [pl.BlockSpec((1, D), lambda nb, l: (0, 0)),
                    pl.BlockSpec((1, D), lambda nb, l: (0, 0))],
        out_specs=pl.BlockSpec((Bs, S, D), lambda nb, l: (nb, 0, 0)),
        scratch_shapes=[pltpu.VMEM((Bs, S, D), jnp.float32),   # carried activation
                        pltpu.VMEM((Bs, S, D), jnp.float32)],  # attention context
        compiler_params=pltpu.CompilerParams(
            dimension_semantics=("parallel", "arbitrary"),
            vmem_limit_bytes=_VMEM_LIMIT),
    )(x, kpm, *[p[k] for k in _ENC_W], fng, fnb)


def decoder_stack(x, mem, causal, kpm, p, fng, fnb, *, H):
    B, T, D = x.shape
    _, S, _ = mem.shape
    L = p["wqkv"].shape[0]
    NB = _num_parallel_splits(B)
    Bs = B // NB
    return pl.pallas_call(
        functools.partial(_decoder_stack_kernel, H=H, Dh=D // H),
        out_shape=jax.ShapeDtypeStruct((B, T, D), jnp.bfloat16),
        grid=(NB, L),
        in_specs=[pl.BlockSpec((Bs, T, D), lambda nb, l: (nb, 0, 0)),
                  pl.BlockSpec((Bs, S, D), lambda nb, l: (nb, 0, 0)),
                  pl.BlockSpec((T, T), lambda nb, l: (0, 0)),
                  pl.BlockSpec((Bs, 1, T), lambda nb, l: (nb, 0, 0))]
                 + _stacked_specs(p, _DEC_W)
                 + [pl.BlockSpec((1, D), lambda nb, l: (0, 0)),
                    pl.BlockSpec((1, D), lambda nb, l: (0, 0))],
        out_specs=pl.BlockSpec((Bs, T, D), lambda nb, l: (nb, 0, 0)),
        scratch_shapes=[pltpu.VMEM((Bs, T, D), jnp.float32),
                        pltpu.VMEM((Bs, T, D), jnp.float32)],
        compiler_params=pltpu.CompilerParams(
            dimension_semantics=("parallel", "arbitrary"),
            vmem_limit_bytes=_VMEM_LIMIT),
    )(x, mem, causal, kpm, *[p[k] for k in _DEC_W], fng, fnb)


def vocab_project(y, w, b, *, tv=256):
    B, T, D = y.shape
    V = w.shape[1]
    TV = tv if (V % tv == 0) else V
    return pl.pallas_call(
        _vocab_proj_kernel,
        out_shape=jax.ShapeDtypeStruct((B, T, V), jnp.float32),
        grid=(V // TV,),
        in_specs=[pl.BlockSpec((B, T, D), lambda v: (0, 0, 0)),
                  pl.BlockSpec((D, TV), lambda v: (0, v)),
                  pl.BlockSpec((1, TV), lambda v: (0, v))],
        out_specs=pl.BlockSpec((B, T, TV), lambda v: (0, 0, v)),
        compiler_params=pltpu.CompilerParams(
            dimension_semantics=("parallel",),
            vmem_limit_bytes=_VMEM_LIMIT),
    )(y, w, b)


# --------------------------------------------------------------------------
# Forward pass (glue in plain JAX, compute inside fused kernels)
# --------------------------------------------------------------------------
def embed(tokens, table, pe, scale):
    # NOTE: faithfully reproduces the reference quirk: PositionalEncoding is
    # applied BEFORE the permute to seq-first, so pos_encoding[:x.size(0)]
    # indexes the *batch* dimension and broadcasts each row over the sequence.
    B = tokens.shape[0]
    return jnp.take(table, tokens, axis=0) * scale + pe[:B][:, None, :]


def forward(params, src_tokens, tgt_tokens, tgt_mask, src_pad, tgt_pad, *, H):
    D = params["emb_src"].shape[1]
    scale = math.sqrt(D)

    src = embed(src_tokens, params["emb_src"], params["pe"], scale)
    tgt = embed(tgt_tokens, params["emb_tgt"], params["pe"], scale)

    # Tiny additive masks built once; broadcast over heads happens in-kernel,
    # so no [B*H, Lq, Lk] tensor ever touches HBM.
    src_kpm = jnp.where(src_pad, NEG, jnp.float32(0.0))[:, None, :]   # [B, 1, S]
    tgt_kpm = jnp.where(tgt_pad, NEG, jnp.float32(0.0))[:, None, :]   # [B, 1, T]
    causal = jnp.maximum(tgt_mask.astype(jnp.float32), NEG)           # clamp -inf

    memory = encoder_stack(src, src_kpm, params["enc"],
                           params["enc_norm_g"], params["enc_norm_b"], H=H)
    y = decoder_stack(tgt, memory, causal, tgt_kpm, params["dec"],
                      params["dec_norm_g"], params["dec_norm_b"], H=H)
    logits = vocab_project(y, params["out_w"], params["out_b"])        # [B, T, V]
    return jnp.transpose(logits, (1, 0, 2))    # (T, B, tgt_vocab), batch_first=False


# --------------------------------------------------------------------------
# Deterministic parameter initialization (per-layer weights stacked on axis 0)
# --------------------------------------------------------------------------
def init_params(key, D, F, H, V_src, V_tgt, n_enc, n_dec, max_len):
    keys = iter(jax.random.split(key, 64))

    def wf32(shape):
        return jax.random.normal(next(keys), shape, jnp.float32) * 0.02

    def w(shape):                                     # bf16 MXU weights
        return wf32(shape).astype(jnp.bfloat16)

    zeros = lambda s: jnp.zeros(s, jnp.float32)
    ones = lambda s: jnp.ones(s, jnp.float32)

    Le, Ld = n_enc, n_dec
    enc = dict(
        wqkv=w((Le, D, 3 * D)), bqkv=zeros((Le, 1, 3 * D)),
        wo=w((Le, D, D)), bo=zeros((Le, 1, D)),
        ln1_g=ones((Le, 1, D)), ln1_b=zeros((Le, 1, D)),
        w1=w((Le, D, F)), b1=zeros((Le, 1, F)),
        w2=w((Le, F, D)), b2=zeros((Le, 1, D)),
        ln2_g=ones((Le, 1, D)), ln2_b=zeros((Le, 1, D)),
    )
    dec = dict(
        wqkv=w((Ld, D, 3 * D)), bqkv=zeros((Ld, 1, 3 * D)),
        wo=w((Ld, D, D)), bo=zeros((Ld, 1, D)),
        ln1_g=ones((Ld, 1, D)), ln1_b=zeros((Ld, 1, D)),
        cwq=w((Ld, D, D)), cbq=zeros((Ld, 1, D)),
        cwkv=w((Ld, D, 2 * D)), cbkv=zeros((Ld, 1, 2 * D)),
        cwo=w((Ld, D, D)), cbo=zeros((Ld, 1, D)),
        ln2_g=ones((Ld, 1, D)), ln2_b=zeros((Ld, 1, D)),
        w1=w((Ld, D, F)), b1=zeros((Ld, 1, F)),
        w2=w((Ld, F, D)), b2=zeros((Ld, 1, D)),
        ln3_g=ones((Ld, 1, D)), ln3_b=zeros((Ld, 1, D)),
    )

    # sinusoidal positional-encoding table (max_len, D), as in PositionalEncoding
    pos = jnp.arange(max_len, dtype=jnp.float32)[:, None]
    div = jnp.exp(jnp.arange(0, D, 2, dtype=jnp.float32) * (-math.log(10000.0) / D))
    pe = jnp.zeros((max_len, D), jnp.float32)
    pe = pe.at[:, 0::2].set(jnp.sin(pos * div))
    pe = pe.at[:, 1::2].set(jnp.cos(pos * div))

    return dict(
        emb_src=wf32((V_src, D)),
        emb_tgt=wf32((V_tgt, D)),
        pe=pe,
        enc=enc, dec=dec,
        enc_norm_g=ones((1, D)), enc_norm_b=zeros((1, D)),
        dec_norm_g=ones((1, D)), dec_norm_b=zeros((1, D)),
        out_w=w((D, V_tgt)), out_b=zeros((1, V_tgt)),
    )


# --------------------------------------------------------------------------
if __name__ == "__main__":
    # Small-scale config consistent with the module (dim_model, n_head, ffn, layers).
    D, F, H = 128, 256, 4
    n_enc, n_dec = 2, 2
    V_src, V_tgt = 512, 512
    max_len = 50
    B, S, T = 2, 8, 8

    key = jax.random.PRNGKey(0)
    kp, ks, kt = jax.random.split(key, 3)
    params = init_params(kp, D, F, H, V_src, V_tgt, n_enc, n_dec, max_len)

    src_tokens = jax.random.randint(ks, (B, S), 0, V_src, dtype=jnp.int32)
    tgt_tokens = jax.random.randint(kt, (B, T), 0, V_tgt, dtype=jnp.int32)

    # same construction as TranslationModel.get_tgt_mask
    tril = jnp.tril(jnp.ones((T, T), jnp.float32)) > 0
    tgt_mask = jnp.where(tril, jnp.float32(0.0), -jnp.inf).astype(jnp.float32)

    # key-padding masks (True = padded), as produced by create_pad_mask
    src_lens = jnp.array([S, S - 2])
    tgt_lens = jnp.array([T, T - 3])
    src_pad = jnp.arange(S)[None, :] >= src_lens[:, None]
    tgt_pad = jnp.arange(T)[None, :] >= tgt_lens[:, None]

    fwd = jax.jit(functools.partial(forward, H=H))
    out = fwd(params, src_tokens, tgt_tokens, tgt_mask, src_pad, tgt_pad)
    jax.block_until_ready(out)

    assert out.shape == (T, B, V_tgt), out.shape
    assert bool(jnp.all(jnp.isfinite(out)))
    print("KERNEL_OK")
</pallas_src>

<mosaic_0001>
module attributes {stable_mosaic.version = 11 : i64} {
  func.func @_vocab_proj_kernel(%arg0: i32, %arg1: memref<2x8x128xbf16, #tpu.memory_space<vmem>>, %arg2: memref<128x256xbf16, #tpu.memory_space<vmem>>, %arg3: memref<1x256xf32, #tpu.memory_space<vmem>>, %arg4: memref<2x8x256xf32, #tpu.memory_space<vmem>>) attributes {dimension_semantics = [#tpu.dimension_semantics<parallel>], iteration_bounds = array<i64: 2>, scalar_prefetch = 0 : i64, scratch_operands = 0 : i64, tpu.core_type = #tpu.core_type<tc>, window_params = [{pipeline_mode = #tpu.pipeline_mode<synchronous>, transform_indices = @transform_0, window_bounds = array<i64: 2, 8, 128>}, {transform_indices = @transform_1, window_bounds = array<i64: 128, 256>}, {transform_indices = @transform_2, window_bounds = array<i64: 1, 256>}, {transform_indices = @transform_3, window_bounds = array<i64: 2, 8, 256>}]} {
    %c0 = arith.constant 0 : index
    %c0_0 = arith.constant 0 : index
    %c0_1 = arith.constant 0 : index
    %0 = vector.load %arg1[%c0, %c0_0, %c0_1] : memref<2x8x128xbf16, #tpu.memory_space<vmem>>, vector<2x8x128xbf16>
    %1 = vector.shape_cast %0 : vector<2x8x128xbf16> to vector<16x128xbf16>
    %c0_2 = arith.constant 0 : index
    %c0_3 = arith.constant 0 : index
    %2 = vector.load %arg2[%c0_2, %c0_3] : memref<128x256xbf16, #tpu.memory_space<vmem>>, vector<128x256xbf16>
    %cst = arith.constant dense<0.000000e+00> : vector<16x256xf32>
    %3 = tpu.matmul %1, %2, %cst {dimension_numbers = #tpu.dot_dimension_numbers<[1], [0], [0], [1], [0, 0, 1, 1], [], []>} : vector<16x128xbf16>, vector<128x256xbf16>, vector<16x256xf32> -> vector<16x256xf32>
    %c0_4 = arith.constant 0 : index
    %c0_5 = arith.constant 0 : index
    %4 = vector.load %arg3[%c0_4, %c0_5] : memref<1x256xf32, #tpu.memory_space<vmem>>, vector<1x256xf32>
    %5 = vector.broadcast %4 : vector<1x256xf32> to vector<16x256xf32>
    %6 = arith.addf %3, %5 : vector<16x256xf32>
    %7 = vector.shape_cast %6 : vector<16x256xf32> to vector<2x8x256xf32>
    %c0_6 = arith.constant 0 : index
    %c0_7 = arith.constant 0 : index
    %c0_8 = arith.constant 0 : index
    %8 = vector.load %arg4[%c0_6, %c0_7, %c0_8] : memref<2x8x256xf32, #tpu.memory_space<vmem>>, vector<2x8x256xf32>
    tpu.vector_store %arg4[%c0_6, %c0_7, %c0_8], %7 {strides = array<i32>} : memref<2x8x256xf32, #tpu.memory_space<vmem>>, vector<2x8x256xf32>,
    return
  }
  func.func @transform_0(%arg0: i32) -> (i32, i32, i32) {
    %c0_i32 = arith.constant 0 : i32
    %c0_i32_0 = arith.constant 0 : i32
    %c0_i32_1 = arith.constant 0 : i32
    %c0_i32_2 = arith.constant 0 : i32
    return %c0_i32, %c0_i32_0, %c0_i32_1 : i32, i32, i32
  }
  func.func @transform_1(%arg0: i32) -> (i32, i32) {
    %c0_i32 = arith.constant 0 : i32
    %c0_i32_0 = arith.constant 0 : i32
    return %c0_i32, %arg0 : i32, i32
  }
  func.func @transform_2(%arg0: i32) -> (i32, i32) {
    %c0_i32 = arith.constant 0 : i32
    %c0_i32_0 = arith.constant 0 : i32
    return %c0_i32, %arg0 : i32, i32
  }
  func.func @transform_3(%arg0: i32) -> (i32, i32, i32) {
    %c0_i32 = arith.constant 0 : i32
    %c0_i32_0 = arith.constant 0 : i32
    %c0_i32_1 = arith.constant 0 : i32
    return %c0_i32, %c0_i32_0, %arg0 : i32, i32, i32
  }
}

module attributes {stable_mosaic.version = 11 : i64} {
  func.func @_encoder_stack_kernel(%arg0: i32, %arg1: i32, %arg2: memref<1x8x128xf32, #tpu.memory_space<vmem>>, %arg3: memref<1x1x8xf32, #tpu.memory_space<vmem>>, %arg4: memref<1x128x384xbf16, #tpu.memory_space<vmem>>, %arg5: memref<1x1x384xf32, #tpu.memory_space<vmem>>, %arg6: memref<1x128x128xbf16, #tpu.memory_space<vmem>>, %arg7: memref<1x1x128xf32, #tpu.memory_space<vmem>>, %arg8: memref<1x1x128xf32, #tpu.memory_space<vmem>>, %arg9: memref<1x1x128xf32, #tpu.memory_space<vmem>>, %arg10: memref<1x128x256xbf16, #tpu.memory_space<vmem>>, %arg11: memref<1x1x256xf32, #tpu.memory_space<vmem>>, %arg12: memref<1x256x128xbf16, #tpu.memory_space<vmem>>, %arg13: memref<1x1x128xf32, #tpu.memory_space<vmem>>, %arg14: memref<1x1x128xf32, #tpu.memory_space<vmem>>, %arg15: memref<1x1x128xf32, #tpu.memory_space<vmem>>, %arg16: memref<1x128xf32, #tpu.memory_space<vmem>>, %arg17: memref<1x128xf32, #tpu.memory_space<vmem>>, %arg18: memref<1x8x128xbf16, #tpu.memory_space<vmem>>, %arg19: memref<1x8x128xf32, #tpu.memory_space<vmem>>, %arg20: memref<1x8x128xf32, #tpu.memory_space<vmem>>) attributes {dimension_semantics = [#tpu.dimension_semantics<parallel>, #tpu.dimension_semantics<arbitrary>], iteration_bounds = array<i64: 2, 2>, scalar_prefetch = 0 : i64, scratch_operands = 2 : i64, tpu.core_type = #tpu.core_type<tc>, window_params = [{transform_indices = @transform_0, window_bounds = array<i64: 1, 8, 128>}, {transform_indices = @transform_1, window_bounds = array<i64: 1, 1, 8>}, {transform_indices = @transform_2, window_bounds = array<i64: 1, 128, 384>}, {transform_indices = @transform_3, window_bounds = array<i64: 1, 1, 384>}, {transform_indices = @transform_4, window_bounds = array<i64: 1, 128, 128>}, {transform_indices = @transform_5, window_bounds = array<i64: 1, 1, 128>}, {transform_indices = @transform_6, window_bounds = array<i64: 1, 1, 128>}, {transform_indices = @transform_7, window_bounds = array<i64: 1, 1, 128>}, {transform_indices = @transform_8, window_bounds = array<i64: 1, 128, 256>}, {transform_indices = @transform_9, window_bounds = array<i64: 1, 1, 256>}, {transform_indices = @transform_10, window_bounds = array<i64: 1, 256, 128>}, {transform_indices = @transform_11, window_bounds = array<i64: 1, 1, 128>}, {transform_indices = @transform_12, window_bounds = array<i64: 1, 1, 128>}, {transform_indices = @transform_13, window_bounds = array<i64: 1, 1, 128>}, {pipeline_mode = #tpu.pipeline_mode<synchronous>, transform_indices = @transform_14, window_bounds = array<i64: 1, 128>}, {pipeline_mode = #tpu.pipeline_mode<synchronous>, transform_indices = @transform_15, window_bounds = array<i64: 1, 128>}, {transform_indices = @transform_16, window_bounds = array<i64: 1, 8, 128>}]} {
    %c0_i32 = arith.constant 0 : i32
    %0 = arith.cmpi eq, %arg1, %c0_i32 : i32
    %1 = arith.extui %0 : i1 to i32
    %c0_i32_0 = arith.constant 0 : i32
    %2 = arith.cmpi ne, %1, %c0_i32_0 : i32
    scf.if %2 {
      %c0_92 = arith.constant 0 : index
      %c0_93 = arith.constant 0 : index
      %c0_94 = arith.constant 0 : index
      %186 = vector.load %arg2[%c0_92, %c0_93, %c0_94] : memref<1x8x128xf32, #tpu.memory_space<vmem>>, vector<1x8x128xf32>
      %c0_95 = arith.constant 0 : index
      %c0_96 = arith.constant 0 : index
      %c0_97 = arith.constant 0 : index
      %187 = vector.load %arg19[%c0_95, %c0_96, %c0_97] : memref<1x8x128xf32, #tpu.memory_space<vmem>>, vector<1x8x128xf32>
      tpu.vector_store %arg19[%c0_95, %c0_96, %c0_97], %186 {strides = array<i32>} : memref<1x8x128xf32, #tpu.memory_space<vmem>>, vector<1x8x128xf32>,
    } else {
    }
    %c0 = arith.constant 0 : index
    %c0_1 = arith.constant 0 : index
    %c0_2 = arith.constant 0 : index
    %3 = vector.load %arg19[%c0, %c0_1, %c0_2] : memref<1x8x128xf32, #tpu.memory_space<vmem>>, vector<1x8x128xf32>
    %4 = vector.shape_cast %3 : vector<1x8x128xf32> to vector<8x128xf32>
    %5 = arith.truncf %4 : vector<8x128xf32> to vector<8x128xbf16>
    %c0_3 = arith.constant 0 : index
    %c0_4 = arith.constant 0 : index
    %c0_5 = arith.constant 0 : index
    %6 = vector.load %arg3[%c0_3, %c0_4, %c0_5] : memref<1x1x8xf32, #tpu.memory_space<vmem>>, vector<1x1x8xf32>
    %c0_6 = arith.constant 0 : index
    %c0_7 = arith.constant 0 : index
    %c0_8 = arith.constant 0 : index
    %7 = vector.load %arg4[%c0_6, %c0_7, %c0_8] : memref<1x128x384xbf16, #tpu.memory_space<vmem>>, vector<1x128x384xbf16>
    %8 = vector.shape_cast %7 : vector<1x128x384xbf16> to vector<128x384xbf16>
    %cst = arith.constant dense<0.000000e+00> : vector<8x384xf32>
    %9 = tpu.matmul %5, %8, %cst {dimension_numbers = #tpu.dot_dimension_numbers<[1], [0], [0], [1], [0, 0, 1, 1], [], []>} : vector<8x128xbf16>, vector<128x384xbf16>, vector<8x384xf32> -> vector<8x384xf32>
    %c0_9 = arith.constant 0 : index
    %c0_10 = arith.constant 0 : index
    %c0_11 = arith.constant 0 : index
    %10 = vector.load %arg5[%c0_9, %c0_10, %c0_11] : memref<1x1x384xf32, #tpu.memory_space<vmem>>, vector<1x1x384xf32>
    %11 = vector.shape_cast %10 : vector<1x1x384xf32> to vector<1x384xf32>
    %12 = vector.broadcast %11 : vector<1x384xf32> to vector<8x384xf32>
    %13 = arith.addf %9, %12 : vector<8x384xf32>
    %14 = arith.truncf %13 : vector<8x384xf32> to vector<8x384xbf16>
    %15 = vector.shape_cast %14 : vector<8x384xbf16> to vector<1x8x384xbf16>
    %16 = vector.extract_strided_slice %15 {offsets = [0, 0, 0], sizes = [1, 8, 128], strides = [1, 1, 1]} : vector<1x8x384xbf16> to vector<1x8x128xbf16>
    %17 = vector.extract_strided_slice %15 {offsets = [0, 0, 128], sizes = [1, 8, 128], strides = [1, 1, 1]} : vector<1x8x384xbf16> to vector<1x8x128xbf16>
    %18 = vector.extract_strided_slice %15 {offsets = [0, 0, 256], sizes = [1, 8, 128], strides = [1, 1, 1]} : vector<1x8x384xbf16> to vector<1x8x128xbf16>
    %19 = vector.extract_strided_slice %16 {offsets = [0, 0, 0], sizes = [1, 8, 32], strides = [1, 1, 1]} : vector<1x8x128xbf16> to vector<1x8x32xbf16>
    %20 = vector.extract_strided_slice %17 {offsets = [0, 0, 0], sizes = [1, 8, 32], strides = [1, 1, 1]} : vector<1x8x128xbf16> to vector<1x8x32xbf16>
    "tpu.trace_start"() <{level = 10 : i32, message = "bqd,bkd->bqk"}> : () -> ()
    %cst_12 = arith.constant dense<0.000000e+00> : vector<1x8x8xf32>
    %21 = tpu.matmul %19, %20, %cst_12 {dimension_numbers = #tpu.dot_dimension_numbers<[2], [2], [1], [1], [0, 0, 0, 1, 1, 1], [0], [0]>} : vector<1x8x32xbf16>, vector<1x8x32xbf16>, vector<1x8x8xf32> -> vector<1x8x8xf32>
    "tpu.trace_stop"() : () -> ()
    %cst_13 = arith.constant 0.176776692 : f32
    %22 = vector.broadcast %cst_13 : f32 to vector<1x8x8xf32>
    %23 = arith.mulf %21, %22 : vector<1x8x8xf32>
    %24 = vector.broadcast %6 : vector<1x1x8xf32> to vector<1x8x8xf32>
    %25 = arith.addf %23, %24 : vector<1x8x8xf32>
    %cst_14 = arith.constant dense<0xFF800000> : vector<1x8xf32>
    %26 = vector.multi_reduction <maximumf>, %25, %cst_14 [2] : vector<1x8x8xf32> to vector<1x8xf32>
    %27 = vector.shape_cast %26 : vector<1x8xf32> to vector<1x8x1xf32>
    %28 = vector.broadcast %27 : vector<1x8x1xf32> to vector<1x8x8xf32>
    %29 = arith.subf %25, %28 : vector<1x8x8xf32>
    %30 = math.exp %29 : vector<1x8x8xf32>
    %cst_15 = arith.constant dense<0.000000e+00> : vector<1x8xf32>
    %31 = vector.multi_reduction <add>, %30, %cst_15 [2] : vector<1x8x8xf32> to vector<1x8xf32>
    %32 = vector.shape_cast %31 : vector<1x8xf32> to vector<1x8x1xf32>
    %33 = tpu.reciprocal %32 {approx = true} : vector<1x8x1xf32> -> vector<1x8x1xf32>
    %34 = vector.broadcast %33 : vector<1x8x1xf32> to vector<1x8x8xf32>
    %35 = arith.mulf %30, %34 : vector<1x8x8xf32>
    %36 = arith.truncf %35 : vector<1x8x8xf32> to vector<1x8x8xbf16>
    %37 = vector.extract_strided_slice %18 {offsets = [0, 0, 0], sizes = [1, 8, 32], strides = [1, 1, 1]} : vector<1x8x128xbf16> to vector<1x8x32xbf16>
    "tpu.trace_start"() <{level = 10 : i32, message = "bqk,bkd->bqd"}> : () -> ()
    %cst_16 = arith.constant dense<0.000000e+00> : vector<1x8x32xf32>
    %38 = tpu.matmul %36, %37, %cst_16 {dimension_numbers = #tpu.dot_dimension_numbers<[2], [1], [1], [2], [0, 0, 0, 1, 1, 2], [0], [0]>} : vector<1x8x8xbf16>, vector<1x8x32xbf16>, vector<1x8x32xf32> -> vector<1x8x32xf32>
    "tpu.trace_stop"() : () -> ()
    %c0_17 = arith.constant 0 : index
    %c0_18 = arith.constant 0 : index
    %c0_19 = arith.constant 0 : index
    %39 = vector.load %arg20[%c0_17, %c0_18, %c0_19] : memref<1x8x128xf32, #tpu.memory_space<vmem>>, vector<1x8x32xf32>
    tpu.vector_store %arg20[%c0_17, %c0_18, %c0_19], %38 {strides = array<i32>} : memref<1x8x128xf32, #tpu.memory_space<vmem>>, vector<1x8x32xf32>,
    %40 = vector.extract_strided_slice %16 {offsets = [0, 0, 32], sizes = [1, 8, 32], strides = [1, 1, 1]} : vector<1x8x128xbf16> to vector<1x8x32xbf16>
    %41 = vector.extract_strided_slice %17 {offsets = [0, 0, 32], sizes = [1, 8, 32], strides = [1, 1, 1]} : vector<1x8x128xbf16> to vector<1x8x32xbf16>
    "tpu.trace_start"() <{level = 10 : i32, message = "bqd,bkd->bqk"}> : () -> ()
    %cst_20 = arith.constant dense<0.000000e+00> : vector<1x8x8xf32>
    %42 = tpu.matmul %40, %41, %cst_20 {dimension_numbers = #tpu.dot_dimension_numbers<[2], [2], [1], [1], [0, 0, 0, 1, 1, 1], [0], [0]>} : vector<1x8x32xbf16>, vector<1x8x32xbf16>, vector<1x8x8xf32> -> vector<1x8x8xf32>
    "tpu.trace_stop"() : () -> ()
    %cst_21 = arith.constant 0.176776692 : f32
    %43 = vector.broadcast %cst_21 : f32 to vector<1x8x8xf32>
    %44 = arith.mulf %42, %43 : vector<1x8x8xf32>
    %45 = vector.broadcast %6 : vector<1x1x8xf32> to vector<1x8x8xf32>
    %46 = arith.addf %44, %45 : vector<1x8x8xf32>
    %cst_22 = arith.constant dense<0xFF800000> : vector<1x8xf32>
    %47 = vector.multi_reduction <maximumf>, %46, %cst_22 [2] : vector<1x8x8xf32> to vector<1x8xf32>
    %48 = vector.shape_cast %47 : vector<1x8xf32> to vector<1x8x1xf32>
    %49 = vector.broadcast %48 : vector<1x8x1xf32> to vector<1x8x8xf32>
    %50 = arith.subf %46, %49 : vector<1x8x8xf32>
    %51 = math.exp %50 : vector<1x8x8xf32>
    %cst_23 = arith.constant dense<0.000000e+00> : vector<1x8xf32>
    %52 = vector.multi_reduction <add>, %51, %cst_23 [2] : vector<1x8x8xf32> to vector<1x8xf32>
    %53 = vector.shape_cast %52 : vector<1x8xf32> to vector<1x8x1xf32>
    %54 = tpu.reciprocal %53 {approx = true} : vector<1x8x1xf32> -> vector<1x8x1xf32>
    %55 = vector.broadcast %54 : vector<1x8x1xf32> to vector<1x8x8xf32>
    %56 = arith.mulf %51, %55 : vector<1x8x8xf32>
    %57 = arith.truncf %56 : vector<1x8x8xf32> to vector<1x8x8xbf16>
    %58 = vector.extract_strided_slice %18 {offsets = [0, 0, 32], sizes = [1, 8, 32], strides = [1, 1, 1]} : vector<1x8x128xbf16> to vector<1x8x32xbf16>
    "tpu.trace_start"() <{level = 10 : i32, message = "bqk,bkd->bqd"}> : () -> ()
    %cst_24 = arith.constant dense<0.000000e+00> : vector<1x8x32xf32>
    %59 = tpu.matmul %57, %58, %cst_24 {dimension_numbers = #tpu.dot_dimension_numbers<[2], [1], [1], [2], [0, 0, 0, 1, 1, 2], [0], [0]>} : vector<1x8x8xbf16>, vector<1x8x32xbf16>, vector<1x8x32xf32> -> vector<1x8x32xf32>
    "tpu.trace_stop"() : () -> ()
    %c0_25 = arith.constant 0 : index
    %c0_26 = arith.constant 0 : index
    %c32 = arith.constant 32 : index
    %60 = vector.load %arg20[%c0_25, %c0_26, %c32] : memref<1x8x128xf32, #tpu.memory_space<vmem>>, vector<1x8x32xf32>
    tpu.vector_store %arg20[%c0_25, %c0_26, %c32], %59 {strides = array<i32>} : memref<1x8x128xf32, #tpu.memory_space<vmem>>, vector<1x8x32xf32>,
    %61 = vector.extract_strided_slice %16 {offsets = [0, 0, 64], sizes = [1, 8, 32], strides = [1, 1, 1]} : vector<1x8x128xbf16> to vector<1x8x32xbf16>
    %62 = vector.extract_strided_slice %17 {offsets = [0, 0, 64], sizes = [1, 8, 32], strides = [1, 1, 1]} : vector<1x8x128xbf16> to vector<1x8x32xbf16>
    "tpu.trace_start"() <{level = 10 : i32, message = "bqd,bkd->bqk"}> : () -> ()
    %cst_27 = arith.constant dense<0.000000e+00> : vector<1x8x8xf32>
    %63 = tpu.matmul %61, %62, %cst_27 {dimension_numbers = #tpu.dot_dimension_numbers<[2], [2], [1], [1], [0, 0, 0, 1, 1, 1], [0], [0]>} : vector<1x8x32xbf16>, vector<1x8x32xbf16>, vector<1x8x8xf32> -> vector<1x8x8xf32>
    "tpu.trace_stop"() : () -> ()
    %cst_28 = arith.constant 0.176776692 : f32
    %64 = vector.broadcast %cst_28 : f32 to vector<1x8x8xf32>
    %65 = arith.mulf %63, %64 : vector<1x8x8xf32>
    %66 = vector.broadcast %6 : vector<1x1x8xf32> to vector<1x8x8xf32>
    %67 = arith.addf %65, %66 : vector<1x8x8xf32>
    %cst_29 = arith.constant dense<0xFF800000> : vector<1x8xf32>
    %68 = vector.multi_reduction <maximumf>, %67, %cst_29 [2] : vector<1x8x8xf32> to vector<1x8xf32>
    %69 = vector.shape_cast %68 : vector<1x8xf32> to vector<1x8x1xf32>
    %70 = vector.broadcast %69 : vector<1x8x1xf32> to vector<1x8x8xf32>
    %71 = arith.subf %67, %70 : vector<1x8x8xf32>
    %72 = math.exp %71 : vector<1x8x8xf32>
    %cst_30 = arith.constant dense<0.000000e+00> : vector<1x8xf32>
    %73 = vector.multi_reduction <add>, %72, %cst_30 [2] : vector<1x8x8xf32> to vector<1x8xf32>
    %74 = vector.shape_cast %73 : vector<1x8xf32> to vector<1x8x1xf32>
    %75 = tpu.reciprocal %74 {approx = true} : vector<1x8x1xf32> -> vector<1x8x1xf32>
    %76 = vector.broadcast %75 : vector<1x8x1xf32> to vector<1x8x8xf32>
    %77 = arith.mulf %72, %76 : vector<1x8x8xf32>
    %78 = arith.truncf %77 : vector<1x8x8xf32> to vector<1x8x8xbf16>
    %79 = vector.extract_strided_slice %18 {offsets = [0, 0, 64], sizes = [1, 8, 32], strides = [1, 1, 1]} : vector<1x8x128xbf16> to vector<1x8x32xbf16>
    "tpu.trace_start"() <{level = 10 : i32, message = "bqk,bkd->bqd"}> : () -> ()
    %cst_31 = arith.constant dense<0.000000e+00> : vector<1x8x32xf32>
    %80 = tpu.matmul %78, %79, %cst_31 {dimension_numbers = #tpu.dot_dimension_numbers<[2], [1], [1], [2], [0, 0, 0, 1, 1, 2], [0], [0]>} : vector<1x8x8xbf16>, vector<1x8x32xbf16>, vector<1x8x32xf32> -> vector<1x8x32xf32>
    "tpu.trace_stop"() : () -> ()
    %c0_32 = arith.constant 0 : index
    %c0_33 = arith.constant 0 : index
    %c64 = arith.constant 64 : index
    %81 = vector.load %arg20[%c0_32, %c0_33, %c64] : memref<1x8x128xf32, #tpu.memory_space<vmem>>, vector<1x8x32xf32>
    tpu.vector_store %arg20[%c0_32, %c0_33, %c64], %80 {strides = array<i32>} : memref<1x8x128xf32, #tpu.memory_space<vmem>>, vector<1x8x32xf32>,
    %82 = vector.extract_strided_slice %16 {offsets = [0, 0, 96], sizes = [1, 8, 32], strides = [1, 1, 1]} : vector<1x8x128xbf16> to vector<1x8x32xbf16>
    %83 = vector.extract_strided_slice %17 {offsets = [0, 0, 96], sizes = [1, 8, 32], strides = [1, 1, 1]} : vector<1x8x128xbf16> to vector<1x8x32xbf16>
    "tpu.trace_start"() <{level = 10 : i32, message = "bqd,bkd->bqk"}> : () -> ()
    %cst_34 = arith.constant dense<0.000000e+00> : vector<1x8x8xf32>
    %84 = tpu.matmul %82, %83, %cst_34 {dimension_numbers = #tpu.dot_dimension_numbers<[2], [2], [1], [1], [0, 0, 0, 1, 1, 1], [0], [0]>} : vector<1x8x32xbf16>, vector<1x8x32xbf16>, vector<1x8x8xf32> -> vector<1x8x8xf32>
    "tpu.trace_stop"() : () -> ()
    %cst_35 = arith.constant 0.176776692 : f32
    %85 = vector.broadcast %cst_35 : f32 to vector<1x8x8xf32>
    %86 = arith.mulf %84, %85 : vector<1x8x8xf32>
    %87 = vector.broadcast %6 : vector<1x1x8xf32> to vector<1x8x8xf32>
    %88 = arith.addf %86, %87 : vector<1x8x8xf32>
    %cst_36 = arith.constant dense<0xFF800000> : vector<1x8xf32>
    %89 = vector.multi_reduction <maximumf>, %88, %cst_36 [2] : vector<1x8x8xf32> to vector<1x8xf32>
    %90 = vector.shape_cast %89 : vector<1x8xf32> to vector<1x8x1xf32>
    %91 = vector.broadcast %90 : vector<1x8x1xf32> to vector<1x8x8xf32>
    %92 = arith.subf %88, %91 : vector<1x8x8xf32>
    %93 = math.exp %92 : vector<1x8x8xf32>
    %cst_37 = arith.constant dense<0.000000e+00> : vector<1x8xf32>
    %94 = vector.multi_reduction <add>, %93, %cst_37 [2] : vector<1x8x8xf32> to vector<1x8xf32>
    %95 = vector.shape_cast %94 : vector<1x8xf32> to vector<1x8x1xf32>
    %96 = tpu.reciprocal %95 {approx = true} : vector<1x8x1xf32> -> vector<1x8x1xf32>
    %97 = vector.broadcast %96 : vector<1x8x1xf32> to vector<1x8x8xf32>
    %98 = arith.mulf %93, %97 : vector<1x8x8xf32>
    %99 = arith.truncf %98 : vector<1x8x8xf32> to vector<1x8x8xbf16>
    %100 = vector.extract_strided_slice %18 {offsets = [0, 0, 96], sizes = [1, 8, 32], strides = [1, 1, 1]} : vector<1x8x128xbf16> to vector<1x8x32xbf16>
    "tpu.trace_start"() <{level = 10 : i32, message = "bqk,bkd->bqd"}> : () -> ()
    %cst_38 = arith.constant dense<0.000000e+00> : vector<1x8x32xf32>
    %101 = tpu.matmul %99, %100, %cst_38 {dimension_numbers = #tpu.dot_dimension_numbers<[2], [1], [1], [2], [0, 0, 0, 1, 1, 2], [0], [0]>} : vector<1x8x8xbf16>, vector<1x8x32xbf16>, vector<1x8x32xf32> -> vector<1x8x32xf32>
    "tpu.trace_stop"() : () -> ()
    %c0_39 = arith.constant 0 : index
    %c0_40 = arith.constant 0 : index
    %c96 = arith.constant 96 : index
    %102 = vector.load %arg20[%c0_39, %c0_40, %c96] : memref<1x8x128xf32, #tpu.memory_space<vmem>>, vector<1x8x32xf32>
    tpu.vector_store %arg20[%c0_39, %c0_40, %c96], %101 {strides = array<i32>} : memref<1x8x128xf32, #tpu.memory_space<vmem>>, vector<1x8x32xf32>,
    %c0_41 = arith.constant 0 : index
    %c0_42 = arith.constant 0 : index
    %c0_43 = arith.constant 0 : index
    %103 = vector.load %arg20[%c0_41, %c0_42, %c0_43] : memref<1x8x128xf32, #tpu.memory_space<vmem>>, vector<1x8x128xf32>
    %104 = vector.shape_cast %103 : vector<1x8x128xf32> to vector<8x128xf32>
    %105 = arith.truncf %104 : vector<8x128xf32> to vector<8x128xbf16>
    %c0_44 = arith.constant 0 : index
    %c0_45 = arith.constant 0 : index
    %c0_46 = arith.constant 0 : index
    %106 = vector.load %arg6[%c0_44, %c0_45, %c0_46] : memref<1x128x128xbf16, #tpu.memory_space<vmem>>, vector<1x128x128xbf16>
    %107 = vector.shape_cast %106 : vector<1x128x128xbf16> to vector<128x128xbf16>
    %cst_47 = arith.constant dense<0.000000e+00> : vector<8x128xf32>
    %108 = tpu.matmul %105, %107, %cst_47 {dimension_numbers = #tpu.dot_dimension_numbers<[1], [0], [0], [1], [0, 0, 1, 1], [], []>} : vector<8x128xbf16>, vector<128x128xbf16>, vector<8x128xf32> -> vector<8x128xf32>
    %c0_48 = arith.constant 0 : index
    %c0_49 = arith.constant 0 : index
    %c0_50 = arith.constant 0 : index
    %109 = vector.load %arg7[%c0_48, %c0_49, %c0_50] : memref<1x1x128xf32, #tpu.memory_space<vmem>>, vector<1x1x128xf32>
    %110 = vector.shape_cast %109 : vector<1x1x128xf32> to vector<1x128xf32>
    %111 = vector.broadcast %110 : vector<1x128xf32> to vector<8x128xf32>
    %112 = arith.addf %108, %111 : vector<8x128xf32>
    %113 = arith.addf %4, %112 : vector<8x128xf32>
    %c0_51 = arith.constant 0 : index
    %c0_52 = arith.constant 0 : index
    %c0_53 = arith.constant 0 : index
    %114 = vector.load %arg8[%c0_51, %c0_52, %c0_53] : memref<1x1x128xf32, #tpu.memory_space<vmem>>, vector<1x1x128xf32>
    %115 = vector.shape_cast %114 : vector<1x1x128xf32> to vector<1x128xf32>
    %c0_54 = arith.constant 0 : index
    %c0_55 = arith.constant 0 : index
    %c0_56 = arith.constant 0 : index
    %116 = vector.load %arg9[%c0_54, %c0_55, %c0_56] : memref<1x1x128xf32, #tpu.memory_space<vmem>>, vector<1x1x128xf32>
    %117 = vector.shape_cast %116 : vector<1x1x128xf32> to vector<1x128xf32>
    %cst_57 = arith.constant dense<0.000000e+00> : vector<8xf32>
    %118 = vector.multi_reduction <add>, %113, %cst_57 [1] : vector<8x128xf32> to vector<8xf32>
    %119 = vector.shape_cast %118 : vector<8xf32> to vector<8x1xf32>
    %cst_58 = arith.constant 1.280000e+02 : f32
    %120 = vector.broadcast %cst_58 : f32 to vector<8x1xf32>
    %121 = arith.divf %119, %120 : vector<8x1xf32>
    %122 = vector.broadcast %121 : vector<8x1xf32> to vector<8x128xf32>
    %123 = arith.subf %113, %122 : vector<8x128xf32>
    %124 = arith.mulf %123, %123 : vector<8x128xf32>
    %cst_59 = arith.constant dense<0.000000e+00> : vector<8xf32>
    %125 = vector.multi_reduction <add>, %124, %cst_59 [1] : vector<8x128xf32> to vector<8xf32>
    %126 = vector.shape_cast %125 : vector<8xf32> to vector<8x1xf32>
    %cst_60 = arith.constant 1.280000e+02 : f32
    %127 = vector.broadcast %cst_60 : f32 to vector<8x1xf32>
    %128 = arith.divf %126, %127 : vector<8x1xf32>
    %cst_61 = arith.constant 9.99999974E-6 : f32
    %129 = vector.broadcast %cst_61 : f32 to vector<8x1xf32>
    %130 = arith.addf %128, %129 : vector<8x1xf32>
    %131 = math.rsqrt %130 : vector<8x1xf32>
    %132 = vector.broadcast %131 : vector<8x1xf32> to vector<8x128xf32>
    %133 = arith.mulf %123, %132 : vector<8x128xf32>
    %134 = vector.broadcast %115 : vector<1x128xf32> to vector<8x128xf32>
    %135 = arith.mulf %133, %134 : vector<8x128xf32>
    %136 = vector.broadcast %117 : vector<1x128xf32> to vector<8x128xf32>
    %137 = arith.addf %135, %136 : vector<8x128xf32>
    %138 = arith.truncf %137 : vector<8x128xf32> to vector<8x128xbf16>
    %c0_62 = arith.constant 0 : index
    %c0_63 = arith.constant 0 : index
    %c0_64 = arith.constant 0 : index
    %139 = vector.load %arg10[%c0_62, %c0_63, %c0_64] : memref<1x128x256xbf16, #tpu.memory_space<vmem>>, vector<1x128x256xbf16>
    %140 = vector.shape_cast %139 : vector<1x128x256xbf16> to vector<128x256xbf16>
    %cst_65 = arith.constant dense<0.000000e+00> : vector<8x256xf32>
    %141 = tpu.matmul %138, %140, %cst_65 {dimension_numbers = #tpu.dot_dimension_numbers<[1], [0], [0], [1], [0, 0, 1, 1], [], []>} : vector<8x128xbf16>, vector<128x256xbf16>, vector<8x256xf32> -> vector<8x256xf32>
    %c0_66 = arith.constant 0 : index
    %c0_67 = arith.constant 0 : index
    %c0_68 = arith.constant 0 : index
    %142 = vector.load %arg11[%c0_66, %c0_67, %c0_68] : memref<1x1x256xf32, #tpu.memory_space<vmem>>, vector<1x1x256xf32>
    %143 = vector.shape_cast %142 : vector<1x1x256xf32> to vector<1x256xf32>
    %144 = vector.broadcast %143 : vector<1x256xf32> to vector<8x256xf32>
    %145 = arith.addf %141, %144 : vector<8x256xf32>
    %cst_69 = arith.constant 0.000000e+00 : f32
    %146 = vector.broadcast %cst_69 : f32 to vector<8x256xf32>
    %147 = arith.maximumf %145, %146 : vector<8x256xf32>
    %148 = arith.truncf %147 : vector<8x256xf32> to vector<8x256xbf16>
    %c0_70 = arith.constant 0 : index
    %c0_71 = arith.constant 0 : index
    %c0_72 = arith.constant 0 : index
    %149 = vector.load %arg12[%c0_70, %c0_71, %c0_72] : memref<1x256x128xbf16, #tpu.memory_space<vmem>>, vector<1x256x128xbf16>
    %150 = vector.shape_cast %149 : vector<1x256x128xbf16> to vector<256x128xbf16>
    %cst_73 = arith.constant dense<0.000000e+00> : vector<8x128xf32>
    %151 = tpu.matmul %148, %150, %cst_73 {dimension_numbers = #tpu.dot_dimension_numbers<[1], [0], [0], [1], [0, 0, 1, 1], [], []>} : vector<8x256xbf16>, vector<256x128xbf16>, vector<8x128xf32> -> vector<8x128xf32>
    %c0_74 = arith.constant 0 : index
    %c0_75 = arith.constant 0 : index
    %c0_76 = arith.constant 0 : index
    %152 = vector.load %arg13[%c0_74, %c0_75, %c0_76] : memref<1x1x128xf32, #tpu.memory_space<vmem>>, vector<1x1x128xf32>
    %153 = vector.shape_cast %152 : vector<1x1x128xf32> to vector<1x128xf32>
    %154 = vector.broadcast %153 : vector<1x128xf32> to vector<8x128xf32>
    %155 = arith.addf %151, %154 : vector<8x128xf32>
    %156 = arith.addf %137, %155 : vector<8x128xf32>
    %c0_77 = arith.constant 0 : index
    %c0_78 = arith.constant 0 : index
    %c0_79 = arith.constant 0 : index
    %157 = vector.load %arg14[%c0_77, %c0_78, %c0_79] : memref<1x1x128xf32, #tpu.memory_space<vmem>>, vector<1x1x128xf32>
    %158 = vector.shape_cast %157 : vector<1x1x128xf32> to vector<1x128xf32>
    %c0_80 = arith.constant 0 : index
    %c0_81 = arith.constant 0 : index
    %c0_82 = arith.constant 0 : index
    %159 = vector.load %arg15[%c0_80, %c0_81, %c0_82] : memref<1x1x128xf32, #tpu.memory_space<vmem>>, vector<1x1x128xf32>
    %160 = vector.shape_cast %159 : vector<1x1x128xf32> to vector<1x128xf32>
    %cst_83 = arith.constant dense<0.000000e+00> : vector<8xf32>
    %161 = vector.multi_reduction <add>, %156, %cst_83 [1] : vector<8x128xf32> to vector<8xf32>
    %162 = vector.shape_cast %161 : vector<8xf32> to vector<8x1xf32>
    %cst_84 = arith.constant 1.280000e+02 : f32
    %163 = vector.broadcast %cst_84 : f32 to vector<8x1xf32>
    %164 = arith.divf %162, %163 : vector<8x1xf32>
    %165 = vector.broadcast %164 : vector<8x1xf32> to vector<8x128xf32>
    %166 = arith.subf %156, %165 : vector<8x128xf32>
    %167 = arith.mulf %166, %166 : vector<8x128xf32>
    %cst_85 = arith.constant dense<0.000000e+00> : vector<8xf32>
    %168 = vector.multi_reduction <add>, %167, %cst_85 [1] : vector<8x128xf32> to vector<8xf32>
    %169 = vector.shape_cast %168 : vector<8xf32> to vector<8x1xf32>
    %cst_86 = arith.constant 1.280000e+02 : f32
    %170 = vector.broadcast %cst_86 : f32 to vector<8x1xf32>
    %171 = arith.divf %169, %170 : vector<8x1xf32>
    %cst_87 = arith.constant 9.99999974E-6 : f32
    %172 = vector.broadcast %cst_87 : f32 to vector<8x1xf32>
    %173 = arith.addf %171, %172 : vector<8x1xf32>
    %174 = math.rsqrt %173 : vector<8x1xf32>
    %175 = vector.broadcast %174 : vector<8x1xf32> to vector<8x128xf32>
    %176 = arith.mulf %166, %175 : vector<8x128xf32>
    %177 = vector.broadcast %158 : vector<1x128xf32> to vector<8x128xf32>
    %178 = arith.mulf %176, %177 : vector<8x128xf32>
    %179 = vector.broadcast %160 : vector<1x128xf32> to vector<8x128xf32>
    %180 = arith.addf %178, %179 : vector<8x128xf32>
    %181 = vector.shape_cast %180 : vector<8x128xf32> to vector<1x8x128xf32>
    %c0_88 = arith.constant 0 : index
    %c0_89 = arith.constant 0 : index
    %c0_90 = arith.constant 0 : index
    %182 = vector.load %arg19[%c0_88, %c0_89, %c0_90] : memref<1x8x128xf32, #tpu.memory_space<vmem>>, vector<1x8x128xf32>
    tpu.vector_store %arg19[%c0_88, %c0_89, %c0_90], %181 {strides = array<i32>} : memref<1x8x128xf32, #tpu.memory_space<vmem>>, vector<1x8x128xf32>,
    %c1_i32 = arith.constant 1 : i32
    %183 = arith.cmpi eq, %arg1, %c1_i32 : i32
    %184 = arith.extui %183 : i1 to i32
    %c0_i32_91 = arith.constant 0 : i32
    %185 = arith.cmpi ne, %184, %c0_i32_91 : i32
    scf.if %185 {
      %c0_92 = arith.constant 0 : index
      %c0_93 = arith.constant 0 : index
      %186 = vector.load %arg16[%c0_92, %c0_93] : memref<1x128xf32, #tpu.memory_space<vmem>>, vector<1x128xf32>
      %c0_94 = arith.constant 0 : index
      %c0_95 = arith.constant 0 : index
      %187 = vector.load %arg17[%c0_94, %c0_95] : memref<1x128xf32, #tpu.memory_space<vmem>>, vector<1x128xf32>
      %cst_96 = arith.constant dense<0.000000e+00> : vector<8xf32>
      %188 = vector.multi_reduction <add>, %180, %cst_96 [1] : vector<8x128xf32> to vector<8xf32>
      %189 = vector.shape_cast %188 : vector<8xf32> to vector<8x1xf32>
      %cst_97 = arith.constant 1.280000e+02 : f32
      %190 = vector.broadcast %cst_97 : f32 to vector<8x1xf32>
      %191 = arith.divf %189, %190 : vector<8x1xf32>
      %192 = vector.broadcast %191 : vector<8x1xf32> to vector<8x128xf32>
      %193 = arith.subf %180, %192 : vector<8x128xf32>
      %194 = arith.mulf %193, %193 : vector<8x128xf32>
      %cst_98 = arith.constant dense<0.000000e+00> : vector<8xf32>
      %195 = vector.multi_reduction <add>, %194, %cst_98 [1] : vector<8x128xf32> to vector<8xf32>
      %196 = vector.shape_cast %195 : vector<8xf32> to vector<8x1xf32>
      %cst_99 = arith.constant 1.280000e+02 : f32
      %197 = vector.broadcast %cst_99 : f32 to vector<8x1xf32>
      %198 = arith.divf %196, %197 : vector<8x1xf32>
      %cst_100 = arith.constant 9.99999974E-6 : f32
      %199 = vector.broadcast %cst_100 : f32 to vector<8x1xf32>
      %200 = arith.addf %198, %199 : vector<8x1xf32>
      %201 = math.rsqrt %200 : vector<8x1xf32>
      %202 = vector.broadcast %201 : vector<8x1xf32> to vector<8x128xf32>
      %203 = arith.mulf %193, %202 : vector<8x128xf32>
      %204 = vector.broadcast %186 : vector<1x128xf32> to vector<8x128xf32>
      %205 = arith.mulf %203, %204 : vector<8x128xf32>
      %206 = vector.broadcast %187 : vector<1x128xf32> to vector<8x128xf32>
      %207 = arith.addf %205, %206 : vector<8x128xf32>
      %208 = arith.truncf %207 : vector<8x128xf32> to vector<8x128xbf16>
      %209 = vector.shape_cast %208 : vector<8x128xbf16> to vector<1x8x128xbf16>
      %c0_101 = arith.constant 0 : index
      %c0_102 = arith.constant 0 : index
      %c0_103 = arith.constant 0 : index
      %210 = vector.load %arg18[%c0_101, %c0_102, %c0_103] : memref<1x8x128xbf16, #tpu.memory_space<vmem>>, vector<1x8x128xbf16>
      tpu.vector_store %arg18[%c0_101, %c0_102, %c0_103], %209 {strides = array<i32>} : memref<1x8x128xbf16, #tpu.memory_space<vmem>>, vector<1x8x128xbf16>,
    } else {
    }
    return
  }
  func.func @transform_0(%arg0: i32, %arg1: i32) -> (i32, i32, i32) {
    %c0_i32 = arith.constant 0 : i32
    %c0_i32_0 = arith.constant 0 : i32
    %c0_i32_1 = arith.constant 0 : i32
    return %arg0, %c0_i32, %c0_i32_0 : i32, i32, i32
  }
  func.func @transform_1(%arg0: i32, %arg1: i32) -> (i32, i32, i32) {
    %c0_i32 = arith.constant 0 : i32
    %c0_i32_0 = arith.constant 0 : i32
    %c0_i32_1 = arith.constant 0 : i32
    return %arg0, %c0_i32, %c0_i32_0 : i32, i32, i32
  }
  func.func @transform_2(%arg0: i32, %arg1: i32) -> (i32, i32, i32) {
    %c0_i32 = arith.constant 0 : i32
    %c0_i32_0 = arith.constant 0 : i32
    %c0_i32_1 = arith.constant 0 : i32
    return %arg1, %c0_i32, %c0_i32_0 : i32, i32, i32
  }
  func.func @transform_3(%arg0: i32, %arg1: i32) -> (i32, i32, i32) {
    %c0_i32 = arith.constant 0 : i32
    %c0_i32_0 = arith.constant 0 : i32
    %c0_i32_1 = arith.constant 0 : i32
    return %arg1, %c0_i32, %c0_i32_0 : i32, i32, i32
  }
  func.func @transform_4(%arg0: i32, %arg1: i32) -> (i32, i32, i32) {
    %c0_i32 = arith.constant 0 : i32
    %c0_i32_0 = arith.constant 0 : i32
    %c0_i32_1 = arith.constant 0 : i32
    return %arg1, %c0_i32, %c0_i32_0 : i32, i32, i32
  }
  func.func @transform_5(%arg0: i32, %arg1: i32) -> (i32, i32, i32) {
    %c0_i32 = arith.constant 0 : i32
    %c0_i32_0 = arith.constant 0 : i32
    %c0_i32_1 = arith.constant 0 : i32
    return %arg1, %c0_i32, %c0_i32_0 : i32, i32, i32
  }
  func.func @transform_6(%arg0: i32, %arg1: i32) -> (i32, i32, i32) {
    %c0_i32 = arith.constant 0 : i32
    %c0_i32_0 = arith.constant 0 : i32
    %c0_i32_1 = arith.constant 0 : i32
    return %arg1, %c0_i32, %c0_i32_0 : i32, i32, i32
  }
  func.func @transform_7(%arg0: i32, %arg1: i32) -> (i32, i32, i32) {
    %c0_i32 = arith.constant 0 : i32
    %c0_i32_0 = arith.constant 0 : i32
    %c0_i32_1 = arith.constant 0 : i32
    return %arg1, %c0_i32, %c0_i32_0 : i32, i32, i32
  }
  func.func @transform_8(%arg0: i32, %arg1: i32) -> (i32, i32, i32) {
    %c0_i32 = arith.constant 0 : i32
    %c0_i32_0 = arith.constant 0 : i32
    %c0_i32_1 = arith.constant 0 : i32
    return %arg1, %c0_i32, %c0_i32_0 : i32, i32, i32
  }
  func.func @transform_9(%arg0: i32, %arg1: i32) -> (i32, i32, i32) {
    %c0_i32 = arith.constant 0 : i32
    %c0_i32_0 = arith.constant 0 : i32
    %c0_i32_1 = arith.constant 0 : i32
    return %arg1, %c0_i32, %c0_i32_0 : i32, i32, i32
  }
  func.func @transform_10(%arg0: i32, %arg1: i32) -> (i32, i32, i32) {
    %c0_i32 = arith.constant 0 : i32
    %c0_i32_0 = arith.constant 0 : i32
    %c0_i32_1 = arith.constant 0 : i32
    return %arg1, %c0_i32, %c0_i32_0 : i32, i32, i32
  }
  func.func @transform_11(%arg0: i32, %arg1: i32) -> (i32, i32, i32) {
    %c0_i32 = arith.constant 0 : i32
    %c0_i32_0 = arith.constant 0 : i32
    %c0_i32_1 = arith.constant 0 : i32
    return %arg1, %c0_i32, %c0_i32_0 : i32, i32, i32
  }
  func.func @transform_12(%arg0: i32, %arg1: i32) -> (i32, i32, i32) {
    %c0_i32 = arith.constant 0 : i32
    %c0_i32_0 = arith.constant 0 : i32
    %c0_i32_1 = arith.constant 0 : i32
    return %arg1, %c0_i32, %c0_i32_0 : i32, i32, i32
  }
  func.func @transform_13(%arg0: i32, %arg1: i32) -> (i32, i32, i32) {
    %c0_i32 = arith.constant 0 : i32
    %c0_i32_0 = arith.constant 0 : i32
    %c0_i32_1 = arith.constant 0 : i32
    return %arg1, %c0_i32, %c0_i32_0 : i32, i32, i32
  }
  func.func @transform_14(%arg0: i32, %arg1: i32) -> (i32, i32) {
    %c0_i32 = arith.constant 0 : i32
    %c0_i32_0 = arith.constant 0 : i32
    %c0_i32_1 = arith.constant 0 : i32
    return %c0_i32, %c0_i32_0 : i32, i32
  }
  func.func @transform_15(%arg0: i32, %arg1: i32) -> (i32, i32) {
    %c0_i32 = arith.constant 0 : i32
    %c0_i32_0 = arith.constant 0 : i32
    %c0_i32_1 = arith.constant 0 : i32
    return %c0_i32, %c0_i32_0 : i32, i32
  }
  func.func @transform_16(%arg0: i32, %arg1: i32) -> (i32, i32, i32) {
    %c0_i32 = arith.constant 0 : i32
    %c0_i32_0 = arith.constant 0 : i32
    %c0_i32_1 = arith.constant 0 : i32
    return %arg0, %c0_i32, %c0_i32_0 : i32, i32, i32
  }
}

module attributes {stable_mosaic.version = 11 : i64} {
  func.func @_decoder_stack_kernel(%arg0: i32, %arg1: i32, %arg2: memref<1x8x128xf32, #tpu.memory_space<vmem>>, %arg3: memref<1x8x128xbf16, #tpu.memory_space<vmem>>, %arg4: memref<8x8xf32, #tpu.memory_space<vmem>>, %arg5: memref<1x1x8xf32, #tpu.memory_space<vmem>>, %arg6: memref<1x128x384xbf16, #tpu.memory_space<vmem>>, %arg7: memref<1x1x384xf32, #tpu.memory_space<vmem>>, %arg8: memref<1x128x128xbf16, #tpu.memory_space<vmem>>, %arg9: memref<1x1x128xf32, #tpu.memory_space<vmem>>, %arg10: memref<1x1x128xf32, #tpu.memory_space<vmem>>, %arg11: memref<1x1x128xf32, #tpu.memory_space<vmem>>, %arg12: memref<1x128x128xbf16, #tpu.memory_space<vmem>>, %arg13: memref<1x1x128xf32, #tpu.memory_space<vmem>>, %arg14: memref<1x128x256xbf16, #tpu.memory_space<vmem>>, %arg15: memref<1x1x256xf32, #tpu.memory_space<vmem>>, %arg16: memref<1x128x128xbf16, #tpu.memory_space<vmem>>, %arg17: memref<1x1x128xf32, #tpu.memory_space<vmem>>, %arg18: memref<1x1x128xf32, #tpu.memory_space<vmem>>, %arg19: memref<1x1x128xf32, #tpu.memory_space<vmem>>, %arg20: memref<1x128x256xbf16, #tpu.memory_space<vmem>>, %arg21: memref<1x1x256xf32, #tpu.memory_space<vmem>>, %arg22: memref<1x256x128xbf16, #tpu.memory_space<vmem>>, %arg23: memref<1x1x128xf32, #tpu.memory_space<vmem>>, %arg24: memref<1x1x128xf32, #tpu.memory_space<vmem>>, %arg25: memref<1x1x128xf32, #tpu.memory_space<vmem>>, %arg26: memref<1x128xf32, #tpu.memory_space<vmem>>, %arg27: memref<1x128xf32, #tpu.memory_space<vmem>>, %arg28: memref<1x8x128xbf16, #tpu.memory_space<vmem>>, %arg29: memref<1x8x128xf32, #tpu.memory_space<vmem>>, %arg30: memref<1x8x128xf32, #tpu.memory_space<vmem>>) attributes {dimension_semantics = [#tpu.dimension_semantics<parallel>, #tpu.dimension_semantics<arbitrary>], iteration_bounds = array<i64: 2, 2>, scalar_prefetch = 0 : i64, scratch_operands = 2 : i64, tpu.core_type = #tpu.core_type<tc>, window_params = [{transform_indices = @transform_0, window_bounds = array<i64: 1, 8, 128>}, {transform_indices = @transform_1, window_bounds = array<i64: 1, 8, 128>}, {pipeline_mode = #tpu.pipeline_mode<synchronous>, transform_indices = @transform_2, window_bounds = array<i64: 8, 8>}, {transform_indices = @transform_3, window_bounds = array<i64: 1, 1, 8>}, {transform_indices = @transform_4, window_bounds = array<i64: 1, 128, 384>}, {transform_indices = @transform_5, window_bounds = array<i64: 1, 1, 384>}, {transform_indices = @transform_6, window_bounds = array<i64: 1, 128, 128>}, {transform_indices = @transform_7, window_bounds = array<i64: 1, 1, 128>}, {transform_indices = @transform_8, window_bounds = array<i64: 1, 1, 128>}, {transform_indices = @transform_9, window_bounds = array<i64: 1, 1, 128>}, {transform_indices = @transform_10, window_bounds = array<i64: 1, 128, 128>}, {transform_indices = @transform_11, window_bounds = array<i64: 1, 1, 128>}, {transform_indices = @transform_12, window_bounds = array<i64: 1, 128, 256>}, {transform_indices = @transform_13, window_bounds = array<i64: 1, 1, 256>}, {transform_indices = @transform_14, window_bounds = array<i64: 1, 128, 128>}, {transform_indices = @transform_15, window_bounds = array<i64: 1, 1, 128>}, {transform_indices = @transform_16, window_bounds = array<i64: 1, 1, 128>}, {transform_indices = @transform_17, window_bounds = array<i64: 1, 1, 128>}, {transform_indices = @transform_18, window_bounds = array<i64: 1, 128, 256>}, {transform_indices = @transform_19, window_bounds = array<i64: 1, 1, 256>}, {transform_indices = @transform_20, window_bounds = array<i64: 1, 256, 128>}, {transform_indices = @transform_21, window_bounds = array<i64: 1, 1, 128>}, {transform_indices = @transform_22, window_bounds = array<i64: 1, 1, 128>}, {transform_indices = @transform_23, window_bounds = array<i64: 1, 1, 128>}, {pipeline_mode = #tpu.pipeline_mode<synchronous>, transform_indices = @transform_24, window_bounds = array<i64: 1, 128>}, {pipeline_mode = #tpu.pipeline_mode<synchronous>, transform_indices = @transform_25, window_bounds = array<i64: 1, 128>}, {transform_indices = @transform_26, window_bounds = array<i64: 1, 8, 128>}]} {
    %c0_i32 = arith.constant 0 : i32
    %0 = arith.cmpi eq, %arg1, %c0_i32 : i32
    %1 = arith.extui %0 : i1 to i32
    %c0_i32_0 = arith.constant 0 : i32
    %2 = arith.cmpi ne, %1, %c0_i32_0 : i32
    scf.if %2 {
      %c0_164 = arith.constant 0 : index
      %c0_165 = arith.constant 0 : index
      %c0_166 = arith.constant 0 : index
      %320 = vector.load %arg2[%c0_164, %c0_165, %c0_166] : memref<1x8x128xf32, #tpu.memory_space<vmem>>, vector<1x8x128xf32>
      %c0_167 = arith.constant 0 : index
      %c0_168 = arith.constant 0 : index
      %c0_169 = arith.constant 0 : index
      %321 = vector.load %arg29[%c0_167, %c0_168, %c0_169] : memref<1x8x128xf32, #tpu.memory_space<vmem>>, vector<1x8x128xf32>
      tpu.vector_store %arg29[%c0_167, %c0_168, %c0_169], %320 {strides = array<i32>} : memref<1x8x128xf32, #tpu.memory_space<vmem>>, vector<1x8x128xf32>,
    } else {
    }
    %c0 = arith.constant 0 : index
    %c0_1 = arith.constant 0 : index
    %c0_2 = arith.constant 0 : index
    %3 = vector.load %arg29[%c0, %c0_1, %c0_2] : memref<1x8x128xf32, #tpu.memory_space<vmem>>, vector<1x8x128xf32>
    %4 = vector.shape_cast %3 : vector<1x8x128xf32> to vector<8x128xf32>
    %5 = arith.truncf %4 : vector<8x128xf32> to vector<8x128xbf16>
    %c0_3 = arith.constant 0 : index
    %c0_4 = arith.constant 0 : index
    %6 = vector.load %arg4[%c0_3, %c0_4] : memref<8x8xf32, #tpu.memory_space<vmem>>, vector<8x8xf32>
    %7 = vector.shape_cast %6 : vector<8x8xf32> to vector<1x8x8xf32>
    %c0_5 = arith.constant 0 : index
    %c0_6 = arith.constant 0 : index
    %c0_7 = arith.constant 0 : index
    %8 = vector.load %arg5[%c0_5, %c0_6, %c0_7] : memref<1x1x8xf32, #tpu.memory_space<vmem>>, vector<1x1x8xf32>
    %9 = vector.broadcast %8 : vector<1x1x8xf32> to vector<1x8x8xf32>
    %10 = arith.addf %7, %9 : vector<1x8x8xf32>
    %c0_8 = arith.constant 0 : index
    %c0_9 = arith.constant 0 : index
    %c0_10 = arith.constant 0 : index
    %11 = vector.load %arg6[%c0_8, %c0_9, %c0_10] : memref<1x128x384xbf16, #tpu.memory_space<vmem>>, vector<1x128x384xbf16>
    %12 = vector.shape_cast %11 : vector<1x128x384xbf16> to vector<128x384xbf16>
    %cst = arith.constant dense<0.000000e+00> : vector<8x384xf32>
    %13 = tpu.matmul %5, %12, %cst {dimension_numbers = #tpu.dot_dimension_numbers<[1], [0], [0], [1], [0, 0, 1, 1], [], []>} : vector<8x128xbf16>, vector<128x384xbf16>, vector<8x384xf32> -> vector<8x384xf32>
    %c0_11 = arith.constant 0 : index
    %c0_12 = arith.constant 0 : index
    %c0_13 = arith.constant 0 : index
    %14 = vector.load %arg7[%c0_11, %c0_12, %c0_13] : memref<1x1x384xf32, #tpu.memory_space<vmem>>, vector<1x1x384xf32>
    %15 = vector.shape_cast %14 : vector<1x1x384xf32> to vector<1x384xf32>
    %16 = vector.broadcast %15 : vector<1x384xf32> to vector<8x384xf32>
    %17 = arith.addf %13, %16 : vector<8x384xf32>
    %18 = arith.truncf %17 : vector<8x384xf32> to vector<8x384xbf16>
    %19 = vector.shape_cast %18 : vector<8x384xbf16> to vector<1x8x384xbf16>
    %20 = vector.extract_strided_slice %19 {offsets = [0, 0, 0], sizes = [1, 8, 128], strides = [1, 1, 1]} : vector<1x8x384xbf16> to vector<1x8x128xbf16>
    %21 = vector.extract_strided_slice %19 {offsets = [0, 0, 128], sizes = [1, 8, 128], strides = [1, 1, 1]} : vector<1x8x384xbf16> to vector<1x8x128xbf16>
    %22 = vector.extract_strided_slice %19 {offsets = [0, 0, 256], sizes = [1, 8, 128], strides = [1, 1, 1]} : vector<1x8x384xbf16> to vector<1x8x128xbf16>
    %23 = vector.extract_strided_slice %20 {offsets = [0, 0, 0], sizes = [1, 8, 32], strides = [1, 1, 1]} : vector<1x8x128xbf16> to vector<1x8x32xbf16>
    %24 = vector.extract_strided_slice %21 {offsets = [0, 0, 0], sizes = [1, 8, 32], strides = [1, 1, 1]} : vector<1x8x128xbf16> to vector<1x8x32xbf16>
    "tpu.trace_start"() <{level = 10 : i32, message = "bqd,bkd->bqk"}> : () -> ()
    %cst_14 = arith.constant dense<0.000000e+00> : vector<1x8x8xf32>
    %25 = tpu.matmul %23, %24, %cst_14 {dimension_numbers = #tpu.dot_dimension_numbers<[2], [2], [1], [1], [0, 0, 0, 1, 1, 1], [0], [0]>} : vector<1x8x32xbf16>, vector<1x8x32xbf16>, vector<1x8x8xf32> -> vector<1x8x8xf32>
    "tpu.trace_stop"() : () -> ()
    %cst_15 = arith.constant 0.176776692 : f32
    %26 = vector.broadcast %cst_15 : f32 to vector<1x8x8xf32>
    %27 = arith.mulf %25, %26 : vector<1x8x8xf32>
    %28 = arith.addf %27, %10 : vector<1x8x8xf32>
    %cst_16 = arith.constant dense<0xFF800000> : vector<1x8xf32>
    %29 = vector.multi_reduction <maximumf>, %28, %cst_16 [2] : vector<1x8x8xf32> to vector<1x8xf32>
    %30 = vector.shape_cast %29 : vector<1x8xf32> to vector<1x8x1xf32>
    %31 = vector.broadcast %30 : vector<1x8x1xf32> to vector<1x8x8xf32>
    %32 = arith.subf %28, %31 : vector<1x8x8xf32>
    %33 = math.exp %32 : vector<1x8x8xf32>
    %cst_17 = arith.constant dense<0.000000e+00> : vector<1x8xf32>
    %34 = vector.multi_reduction <add>, %33, %cst_17 [2] : vector<1x8x8xf32> to vector<1x8xf32>
    %35 = vector.shape_cast %34 : vector<1x8xf32> to vector<1x8x1xf32>
    %36 = tpu.reciprocal %35 {approx = true} : vector<1x8x1xf32> -> vector<1x8x1xf32>
    %37 = vector.broadcast %36 : vector<1x8x1xf32> to vector<1x8x8xf32>
    %38 = arith.mulf %33, %37 : vector<1x8x8xf32>
    %39 = arith.truncf %38 : vector<1x8x8xf32> to vector<1x8x8xbf16>
    %40 = vector.extract_strided_slice %22 {offsets = [0, 0, 0], sizes = [1, 8, 32], strides = [1, 1, 1]} : vector<1x8x128xbf16> to vector<1x8x32xbf16>
    "tpu.trace_start"() <{level = 10 : i32, message = "bqk,bkd->bqd"}> : () -> ()
    %cst_18 = arith.constant dense<0.000000e+00> : vector<1x8x32xf32>
    %41 = tpu.matmul %39, %40, %cst_18 {dimension_numbers = #tpu.dot_dimension_numbers<[2], [1], [1], [2], [0, 0, 0, 1, 1, 2], [0], [0]>} : vector<1x8x8xbf16>, vector<1x8x32xbf16>, vector<1x8x32xf32> -> vector<1x8x32xf32>
    "tpu.trace_stop"() : () -> ()
    %c0_19 = arith.constant 0 : index
    %c0_20 = arith.constant 0 : index
    %c0_21 = arith.constant 0 : index
    %42 = vector.load %arg30[%c0_19, %c0_20, %c0_21] : memref<1x8x128xf32, #tpu.memory_space<vmem>>, vector<1x8x32xf32>
    tpu.vector_store %arg30[%c0_19, %c0_20, %c0_21], %41 {strides = array<i32>} : memref<1x8x128xf32, #tpu.memory_space<vmem>>, vector<1x8x32xf32>,
    %43 = vector.extract_strided_slice %20 {offsets = [0, 0, 32], sizes = [1, 8, 32], strides = [1, 1, 1]} : vector<1x8x128xbf16> to vector<1x8x32xbf16>
    %44 = vector.extract_strided_slice %21 {offsets = [0, 0, 32], sizes = [1, 8, 32], strides = [1, 1, 1]} : vector<1x8x128xbf16> to vector<1x8x32xbf16>
    "tpu.trace_start"() <{level = 10 : i32, message = "bqd,bkd->bqk"}> : () -> ()
    %cst_22 = arith.constant dense<0.000000e+00> : vector<1x8x8xf32>
    %45 = tpu.matmul %43, %44, %cst_22 {dimension_numbers = #tpu.dot_dimension_numbers<[2], [2], [1], [1], [0, 0, 0, 1, 1, 1], [0], [0]>} : vector<1x8x32xbf16>, vector<1x8x32xbf16>, vector<1x8x8xf32> -> vector<1x8x8xf32>
    "tpu.trace_stop"() : () -> ()
    %cst_23 = arith.constant 0.176776692 : f32
    %46 = vector.broadcast %cst_23 : f32 to vector<1x8x8xf32>
    %47 = arith.mulf %45, %46 : vector<1x8x8xf32>
    %48 = arith.addf %47, %10 : vector<1x8x8xf32>
    %cst_24 = arith.constant dense<0xFF800000> : vector<1x8xf32>
    %49 = vector.multi_reduction <maximumf>, %48, %cst_24 [2] : vector<1x8x8xf32> to vector<1x8xf32>
    %50 = vector.shape_cast %49 : vector<1x8xf32> to vector<1x8x1xf32>
    %51 = vector.broadcast %50 : vector<1x8x1xf32> to vector<1x8x8xf32>
    %52 = arith.subf %48, %51 : vector<1x8x8xf32>
    %53 = math.exp %52 : vector<1x8x8xf32>
    %cst_25 = arith.constant dense<0.000000e+00> : vector<1x8xf32>
    %54 = vector.multi_reduction <add>, %53, %cst_25 [2] : vector<1x8x8xf32> to vector<1x8xf32>
    %55 = vector.shape_cast %54 : vector<1x8xf32> to vector<1x8x1xf32>
    %56 = tpu.reciprocal %55 {approx = true} : vector<1x8x1xf32> -> vector<1x8x1xf32>
    %57 = vector.broadcast %56 : vector<1x8x1xf32> to vector<1x8x8xf32>
    %58 = arith.mulf %53, %57 : vector<1x8x8xf32>
    %59 = arith.truncf %58 : vector<1x8x8xf32> to vector<1x8x8xbf16>
    %60 = vector.extract_strided_slice %22 {offsets = [0, 0, 32], sizes = [1, 8, 32], strides = [1, 1, 1]} : vector<1x8x128xbf16> to vector<1x8x32xbf16>
    "tpu.trace_start"() <{level = 10 : i32, message = "bqk,bkd->bqd"}> : () -> ()
    %cst_26 = arith.constant dense<0.000000e+00> : vector<1x8x32xf32>
    %61 = tpu.matmul %59, %60, %cst_26 {dimension_numbers = #tpu.dot_dimension_numbers<[2], [1], [1], [2], [0, 0, 0, 1, 1, 2], [0], [0]>} : vector<1x8x8xbf16>, vector<1x8x32xbf16>, vector<1x8x32xf32> -> vector<1x8x32xf32>
    "tpu.trace_stop"() : () -> ()
    %c0_27 = arith.constant 0 : index
    %c0_28 = arith.constant 0 : index
    %c32 = arith.constant 32 : index
    %62 = vector.load %arg30[%c0_27, %c0_28, %c32] : memref<1x8x128xf32, #tpu.memory_space<vmem>>, vector<1x8x32xf32>
    tpu.vector_store %arg30[%c0_27, %c0_28, %c32], %61 {strides = array<i32>} : memref<1x8x128xf32, #tpu.memory_space<vmem>>, vector<1x8x32xf32>,
    %63 = vector.extract_strided_slice %20 {offsets = [0, 0, 64], sizes = [1, 8, 32], strides = [1, 1, 1]} : vector<1x8x128xbf16> to vector<1x8x32xbf16>
    %64 = vector.extract_strided_slice %21 {offsets = [0, 0, 64], sizes = [1, 8, 32], strides = [1, 1, 1]} : vector<1x8x128xbf16> to vector<1x8x32xbf16>
    "tpu.trace_start"() <{level = 10 : i32, message = "bqd,bkd->bqk"}> : () -> ()
    %cst_29 = arith.constant dense<0.000000e+00> : vector<1x8x8xf32>
    %65 = tpu.matmul %63, %64, %cst_29 {dimension_numbers = #tpu.dot_dimension_numbers<[2], [2], [1], [1], [0, 0, 0, 1, 1, 1], [0], [0]>} : vector<1x8x32xbf16>, vector<1x8x32xbf16>, vector<1x8x8xf32> -> vector<1x8x8xf32>
    "tpu.trace_stop"() : () -> ()
    %cst_30 = arith.constant 0.176776692 : f32
    %66 = vector.broadcast %cst_30 : f32 to vector<1x8x8xf32>
    %67 = arith.mulf %65, %66 : vector<1x8x8xf32>
    %68 = arith.addf %67, %10 : vector<1x8x8xf32>
    %cst_31 = arith.constant dense<0xFF800000> : vector<1x8xf32>
    %69 = vector.multi_reduction <maximumf>, %68, %cst_31 [2] : vector<1x8x8xf32> to vector<1x8xf32>
    %70 = vector.shape_cast %69 : vector<1x8xf32> to vector<1x8x1xf32>
    %71 = vector.broadcast %70 : vector<1x8x1xf32> to vector<1x8x8xf32>
    %72 = arith.subf %68, %71 : vector<1x8x8xf32>
    %73 = math.exp %72 : vector<1x8x8xf32>
    %cst_32 = arith.constant dense<0.000000e+00> : vector<1x8xf32>
    %74 = vector.multi_reduction <add>, %73, %cst_32 [2] : vector<1x8x8xf32> to vector<1x8xf32>
    %75 = vector.shape_cast %74 : vector<1x8xf32> to vector<1x8x1xf32>
    %76 = tpu.reciprocal %75 {approx = true} : vector<1x8x1xf32> -> vector<1x8x1xf32>
    %77 = vector.broadcast %76 : vector<1x8x1xf32> to vector<1x8x8xf32>
    %78 = arith.mulf %73, %77 : vector<1x8x8xf32>
    %79 = arith.truncf %78 : vector<1x8x8xf32> to vector<1x8x8xbf16>
    %80 = vector.extract_strided_slice %22 {offsets = [0, 0, 64], sizes = [1, 8, 32], strides = [1, 1, 1]} : vector<1x8x128xbf16> to vector<1x8x32xbf16>
    "tpu.trace_start"() <{level = 10 : i32, message = "bqk,bkd->bqd"}> : () -> ()
    %cst_33 = arith.constant dense<0.000000e+00> : vector<1x8x32xf32>
    %81 = tpu.matmul %79, %80, %cst_33 {dimension_numbers = #tpu.dot_dimension_numbers<[2], [1], [1], [2], [0, 0, 0, 1, 1, 2], [0], [0]>} : vector<1x8x8xbf16>, vector<1x8x32xbf16>, vector<1x8x32xf32> -> vector<1x8x32xf32>
    "tpu.trace_stop"() : () -> ()
    %c0_34 = arith.constant 0 : index
    %c0_35 = arith.constant 0 : index
    %c64 = arith.constant 64 : index
    %82 = vector.load %arg30[%c0_34, %c0_35, %c64] : memref<1x8x128xf32, #tpu.memory_space<vmem>>, vector<1x8x32xf32>
    tpu.vector_store %arg30[%c0_34, %c0_35, %c64], %81 {strides = array<i32>} : memref<1x8x128xf32, #tpu.memory_space<vmem>>, vector<1x8x32xf32>,
    %83 = vector.extract_strided_slice %20 {offsets = [0, 0, 96], sizes = [1, 8, 32], strides = [1, 1, 1]} : vector<1x8x128xbf16> to vector<1x8x32xbf16>
    %84 = vector.extract_strided_slice %21 {offsets = [0, 0, 96], sizes = [1, 8, 32], strides = [1, 1, 1]} : vector<1x8x128xbf16> to vector<1x8x32xbf16>
    "tpu.trace_start"() <{level = 10 : i32, message = "bqd,bkd->bqk"}> : () -> ()
    %cst_36 = arith.constant dense<0.000000e+00> : vector<1x8x8xf32>
    %85 = tpu.matmul %83, %84, %cst_36 {dimension_numbers = #tpu.dot_dimension_numbers<[2], [2], [1], [1], [0, 0, 0, 1, 1, 1], [0], [0]>} : vector<1x8x32xbf16>, vector<1x8x32xbf16>, vector<1x8x8xf32> -> vector<1x8x8xf32>
    "tpu.trace_stop"() : () -> ()
    %cst_37 = arith.constant 0.176776692 : f32
    %86 = vector.broadcast %cst_37 : f32 to vector<1x8x8xf32>
    %87 = arith.mulf %85, %86 : vector<1x8x8xf32>
    %88 = arith.addf %87, %10 : vector<1x8x8xf32>
    %cst_38 = arith.constant dense<0xFF800000> : vector<1x8xf32>
    %89 = vector.multi_reduction <maximumf>, %88, %cst_38 [2] : vector<1x8x8xf32> to vector<1x8xf32>
    %90 = vector.shape_cast %89 : vector<1x8xf32> to vector<1x8x1xf32>
    %91 = vector.broadcast %90 : vector<1x8x1xf32> to vector<1x8x8xf32>
    %92 = arith.subf %88, %91 : vector<1x8x8xf32>
    %93 = math.exp %92 : vector<1x8x8xf32>
    %cst_39 = arith.constant dense<0.000000e+00> : vector<1x8xf32>
    %94 = vector.multi_reduction <add>, %93, %cst_39 [2] : vector<1x8x8xf32> to vector<1x8xf32>
    %95 = vector.shape_cast %94 : vector<1x8xf32> to vector<1x8x1xf32>
    %96 = tpu.reciprocal %95 {approx = true} : vector<1x8x1xf32> -> vector<1x8x1xf32>
    %97 = vector.broadcast %96 : vector<1x8x1xf32> to vector<1x8x8xf32>
    %98 = arith.mulf %93, %97 : vector<1x8x8xf32>
    %99 = arith.truncf %98 : vector<1x8x8xf32> to vector<1x8x8xbf16>
    %100 = vector.extract_strided_slice %22 {offsets = [0, 0, 96], sizes = [1, 8, 32], strides = [1, 1, 1]} : vector<1x8x128xbf16> to vector<1x8x32xbf16>
    "tpu.trace_start"() <{level = 10 : i32, message = "bqk,bkd->bqd"}> : () -> ()
    %cst_40 = arith.constant dense<0.000000e+00> : vector<1x8x32xf32>
    %101 = tpu.matmul %99, %100, %cst_40 {dimension_numbers = #tpu.dot_dimension_numbers<[2], [1], [1], [2], [0, 0, 0, 1, 1, 2], [0], [0]>} : vector<1x8x8xbf16>, vector<1x8x32xbf16>, vector<1x8x32xf32> -> vector<1x8x32xf32>
    "tpu.trace_stop"() : () -> ()
    %c0_41 = arith.constant 0 : index
    %c0_42 = arith.constant 0 : index
    %c96 = arith.constant 96 : index
    %102 = vector.load %arg30[%c0_41, %c0_42, %c96] : memref<1x8x128xf32, #tpu.memory_space<vmem>>, vector<1x8x32xf32>
    tpu.vector_store %arg30[%c0_41, %c0_42, %c96], %101 {strides = array<i32>} : memref<1x8x128xf32, #tpu.memory_space<vmem>>, vector<1x8x32xf32>,
    %c0_43 = arith.constant 0 : index
    %c0_44 = arith.constant 0 : index
    %c0_45 = arith.constant 0 : index
    %103 = vector.load %arg30[%c0_43, %c0_44, %c0_45] : memref<1x8x128xf32, #tpu.memory_space<vmem>>, vector<1x8x128xf32>
    %104 = vector.shape_cast %103 : vector<1x8x128xf32> to vector<8x128xf32>
    %105 = arith.truncf %104 : vector<8x128xf32> to vector<8x128xbf16>
    %c0_46 = arith.constant 0 : index
    %c0_47 = arith.constant 0 : index
    %c0_48 = arith.constant 0 : index
    %106 = vector.load %arg8[%c0_46, %c0_47, %c0_48] : memref<1x128x128xbf16, #tpu.memory_space<vmem>>, vector<1x128x128xbf16>
    %107 = vector.shape_cast %106 : vector<1x128x128xbf16> to vector<128x128xbf16>
    %cst_49 = arith.constant dense<0.000000e+00> : vector<8x128xf32>
    %108 = tpu.matmul %105, %107, %cst_49 {dimension_numbers = #tpu.dot_dimension_numbers<[1], [0], [0], [1], [0, 0, 1, 1], [], []>} : vector<8x128xbf16>, vector<128x128xbf16>, vector<8x128xf32> -> vector<8x128xf32>
    %c0_50 = arith.constant 0 : index
    %c0_51 = arith.constant 0 : index
    %c0_52 = arith.constant 0 : index
    %109 = vector.load %arg9[%c0_50, %c0_51, %c0_52] : memref<1x1x128xf32, #tpu.memory_space<vmem>>, vector<1x1x128xf32>
    %110 = vector.shape_cast %109 : vector<1x1x128xf32> to vector<1x128xf32>
    %111 = vector.broadcast %110 : vector<1x128xf32> to vector<8x128xf32>
    %112 = arith.addf %108, %111 : vector<8x128xf32>
    %113 = arith.addf %4, %112 : vector<8x128xf32>
    %c0_53 = arith.constant 0 : index
    %c0_54 = arith.constant 0 : index
    %c0_55 = arith.constant 0 : index
    %114 = vector.load %arg10[%c0_53, %c0_54, %c0_55] : memref<1x1x128xf32, #tpu.memory_space<vmem>>, vector<1x1x128xf32>
    %115 = vector.shape_cast %114 : vector<1x1x128xf32> to vector<1x128xf32>
    %c0_56 = arith.constant 0 : index
    %c0_57 = arith.constant 0 : index
    %c0_58 = arith.constant 0 : index
    %116 = vector.load %arg11[%c0_56, %c0_57, %c0_58] : memref<1x1x128xf32, #tpu.memory_space<vmem>>, vector<1x1x128xf32>
    %117 = vector.shape_cast %116 : vector<1x1x128xf32> to vector<1x128xf32>
    %cst_59 = arith.constant dense<0.000000e+00> : vector<8xf32>
    %118 = vector.multi_reduction <add>, %113, %cst_59 [1] : vector<8x128xf32> to vector<8xf32>
    %119 = vector.shape_cast %118 : vector<8xf32> to vector<8x1xf32>
    %cst_60 = arith.constant 1.280000e+02 : f32
    %120 = vector.broadcast %cst_60 : f32 to vector<8x1xf32>
    %121 = arith.divf %119, %120 : vector<8x1xf32>
    %122 = vector.broadcast %121 : vector<8x1xf32> to vector<8x128xf32>
    %123 = arith.subf %113, %122 : vector<8x128xf32>
    %124 = arith.mulf %123, %123 : vector<8x128xf32>
    %cst_61 = arith.constant dense<0.000000e+00> : vector<8xf32>
    %125 = vector.multi_reduction <add>, %124, %cst_61 [1] : vector<8x128xf32> to vector<8xf32>
    %126 = vector.shape_cast %125 : vector<8xf32> to vector<8x1xf32>
    %cst_62 = arith.constant 1.280000e+02 : f32
    %127 = vector.broadcast %cst_62 : f32 to vector<8x1xf32>
    %128 = arith.divf %126, %127 : vector<8x1xf32>
    %cst_63 = arith.constant 9.99999974E-6 : f32
    %129 = vector.broadcast %cst_63 : f32 to vector<8x1xf32>
    %130 = arith.addf %128, %129 : vector<8x1xf32>
    %131 = math.rsqrt %130 : vector<8x1xf32>
    %132 = vector.broadcast %131 : vector<8x1xf32> to vector<8x128xf32>
    %133 = arith.mulf %123, %132 : vector<8x128xf32>
    %134 = vector.broadcast %115 : vector<1x128xf32> to vector<8x128xf32>
    %135 = arith.mulf %133, %134 : vector<8x128xf32>
    %136 = vector.broadcast %117 : vector<1x128xf32> to vector<8x128xf32>
    %137 = arith.addf %135, %136 : vector<8x128xf32>
    %138 = arith.truncf %137 : vector<8x128xf32> to vector<8x128xbf16>
    %c0_64 = arith.constant 0 : index
    %c0_65 = arith.constant 0 : index
    %c0_66 = arith.constant 0 : index
    %139 = vector.load %arg12[%c0_64, %c0_65, %c0_66] : memref<1x128x128xbf16, #tpu.memory_space<vmem>>, vector<1x128x128xbf16>
    %140 = vector.shape_cast %139 : vector<1x128x128xbf16> to vector<128x128xbf16>
    %cst_67 = arith.constant dense<0.000000e+00> : vector<8x128xf32>
    %141 = tpu.matmul %138, %140, %cst_67 {dimension_numbers = #tpu.dot_dimension_numbers<[1], [0], [0], [1], [0, 0, 1, 1], [], []>} : vector<8x128xbf16>, vector<128x128xbf16>, vector<8x128xf32> -> vector<8x128xf32>
    %c0_68 = arith.constant 0 : index
    %c0_69 = arith.constant 0 : index
    %c0_70 = arith.constant 0 : index
    %142 = vector.load %arg13[%c0_68, %c0_69, %c0_70] : memref<1x1x128xf32, #tpu.memory_space<vmem>>, vector<1x1x128xf32>
    %143 = vector.shape_cast %142 : vector<1x1x128xf32> to vector<1x128xf32>
    %144 = vector.broadcast %143 : vector<1x128xf32> to vector<8x128xf32>
    %145 = arith.addf %141, %144 : vector<8x128xf32>
    %c0_71 = arith.constant 0 : index
    %c0_72 = arith.constant 0 : index
    %c0_73 = arith.constant 0 : index
    %146 = vector.load %arg3[%c0_71, %c0_72, %c0_73] : memref<1x8x128xbf16, #tpu.memory_space<vmem>>, vector<1x8x128xbf16>
    %147 = vector.shape_cast %146 : vector<1x8x128xbf16> to vector<8x128xbf16>
    %c0_74 = arith.constant 0 : index
    %c0_75 = arith.constant 0 : index
    %c0_76 = arith.constant 0 : index
    %148 = vector.load %arg14[%c0_74, %c0_75, %c0_76] : memref<1x128x256xbf16, #tpu.memory_space<vmem>>, vector<1x128x256xbf16>
    %149 = vector.shape_cast %148 : vector<1x128x256xbf16> to vector<128x256xbf16>
    %cst_77 = arith.constant dense<0.000000e+00> : vector<8x256xf32>
    %150 = tpu.matmul %147, %149, %cst_77 {dimension_numbers = #tpu.dot_dimension_numbers<[1], [0], [0], [1], [0, 0, 1, 1], [], []>} : vector<8x128xbf16>, vector<128x256xbf16>, vector<8x256xf32> -> vector<8x256xf32>
    %c0_78 = arith.constant 0 : index
    %c0_79 = arith.constant 0 : index
    %c0_80 = arith.constant 0 : index
    %151 = vector.load %arg15[%c0_78, %c0_79, %c0_80] : memref<1x1x256xf32, #tpu.memory_space<vmem>>, vector<1x1x256xf32>
    %152 = vector.shape_cast %151 : vector<1x1x256xf32> to vector<1x256xf32>
    %153 = vector.broadcast %152 : vector<1x256xf32> to vector<8x256xf32>
    %154 = arith.addf %150, %153 : vector<8x256xf32>
    %155 = arith.truncf %154 : vector<8x256xf32> to vector<8x256xbf16>
    %156 = vector.shape_cast %155 : vector<8x256xbf16> to vector<1x8x256xbf16>
    %157 = arith.truncf %145 : vector<8x128xf32> to vector<8x128xbf16>
    %158 = vector.shape_cast %157 : vector<8x128xbf16> to vector<1x8x128xbf16>
    %159 = vector.extract_strided_slice %156 {offsets = [0, 0, 0], sizes = [1, 8, 128], strides = [1, 1, 1]} : vector<1x8x256xbf16> to vector<1x8x128xbf16>
    %160 = vector.extract_strided_slice %156 {offsets = [0, 0, 128], sizes = [1, 8, 128], strides = [1, 1, 1]} : vector<1x8x256xbf16> to vector<1x8x128xbf16>
    %161 = vector.extract_strided_slice %158 {offsets = [0, 0, 0], sizes = [1, 8, 32], strides = [1, 1, 1]} : vector<1x8x128xbf16> to vector<1x8x32xbf16>
    %162 = vector.extract_strided_slice %159 {offsets = [0, 0, 0], sizes = [1, 8, 32], strides = [1, 1, 1]} : vector<1x8x128xbf16> to vector<1x8x32xbf16>
    "tpu.trace_start"() <{level = 10 : i32, message = "bqd,bkd->bqk"}> : () -> ()
    %cst_81 = arith.constant dense<0.000000e+00> : vector<1x8x8xf32>
    %163 = tpu.matmul %161, %162, %cst_81 {dimension_numbers = #tpu.dot_dimension_numbers<[2], [2], [1], [1], [0, 0, 0, 1, 1, 1], [0], [0]>} : vector<1x8x32xbf16>, vector<1x8x32xbf16>, vector<1x8x8xf32> -> vector<1x8x8xf32>
    "tpu.trace_stop"() : () -> ()
    %cst_82 = arith.constant 0.176776692 : f32
    %164 = vector.broadcast %cst_82 : f32 to vector<1x8x8xf32>
    %165 = arith.mulf %163, %164 : vector<1x8x8xf32>
    %cst_83 = arith.constant dense<0xFF800000> : vector<1x8xf32>
    %166 = vector.multi_reduction <maximumf>, %165, %cst_83 [2] : vector<1x8x8xf32> to vector<1x8xf32>
    %167 = vector.shape_cast %166 : vector<1x8xf32> to vector<1x8x1xf32>
    %168 = vector.broadcast %167 : vector<1x8x1xf32> to vector<1x8x8xf32>
    %169 = arith.subf %165, %168 : vector<1x8x8xf32>
    %170 = math.exp %169 : vector<1x8x8xf32>
    %cst_84 = arith.constant dense<0.000000e+00> : vector<1x8xf32>
    %171 = vector.multi_reduction <add>, %170, %cst_84 [2] : vector<1x8x8xf32> to vector<1x8xf32>
    %172 = vector.shape_cast %171 : vector<1x8xf32> to vector<1x8x1xf32>
    %173 = tpu.reciprocal %172 {approx = true} : vector<1x8x1xf32> -> vector<1x8x1xf32>
    %174 = vector.broadcast %173 : vector<1x8x1xf32> to vector<1x8x8xf32>
    %175 = arith.mulf %170, %174 : vector<1x8x8xf32>
    %176 = arith.truncf %175 : vector<1x8x8xf32> to vector<1x8x8xbf16>
    %177 = vector.extract_strided_slice %160 {offsets = [0, 0, 0], sizes = [1, 8, 32], strides = [1, 1, 1]} : vector<1x8x128xbf16> to vector<1x8x32xbf16>
    "tpu.trace_start"() <{level = 10 : i32, message = "bqk,bkd->bqd"}> : () -> ()
    %cst_85 = arith.constant dense<0.000000e+00> : vector<1x8x32xf32>
    %178 = tpu.matmul %176, %177, %cst_85 {dimension_numbers = #tpu.dot_dimension_numbers<[2], [1], [1], [2], [0, 0, 0, 1, 1, 2], [0], [0]>} : vector<1x8x8xbf16>, vector<1x8x32xbf16>, vector<1x8x32xf32> -> vector<1x8x32xf32>
    "tpu.trace_stop"() : () -> ()
    %c0_86 = arith.constant 0 : index
    %c0_87 = arith.constant 0 : index
    %c0_88 = arith.constant 0 : index
    %179 = vector.load %arg30[%c0_86, %c0_87, %c0_88] : memref<1x8x128xf32, #tpu.memory_space<vmem>>, vector<1x8x32xf32>
    tpu.vector_store %arg30[%c0_86, %c0_87, %c0_88], %178 {strides = array<i32>} : memref<1x8x128xf32, #tpu.memory_space<vmem>>, vector<1x8x32xf32>,
    %180 = vector.extract_strided_slice %158 {offsets = [0, 0, 32], sizes = [1, 8, 32], strides = [1, 1, 1]} : vector<1x8x128xbf16> to vector<1x8x32xbf16>
    %181 = vector.extract_strided_slice %159 {offsets = [0, 0, 32], sizes = [1, 8, 32], strides = [1, 1, 1]} : vector<1x8x128xbf16> to vector<1x8x32xbf16>
    "tpu.trace_start"() <{level = 10 : i32, message = "bqd,bkd->bqk"}> : () -> ()
    %cst_89 = arith.constant dense<0.000000e+00> : vector<1x8x8xf32>
    %182 = tpu.matmul %180, %181, %cst_89 {dimension_numbers = #tpu.dot_dimension_numbers<[2], [2], [1], [1], [0, 0, 0, 1, 1, 1], [0], [0]>} : vector<1x8x32xbf16>, vector<1x8x32xbf16>, vector<1x8x8xf32> -> vector<1x8x8xf32>
    "tpu.trace_stop"() : () -> ()
    %cst_90 = arith.constant 0.176776692 : f32
    %183 = vector.broadcast %cst_90 : f32 to vector<1x8x8xf32>
    %184 = arith.mulf %182, %183 : vector<1x8x8xf32>
    %cst_91 = arith.constant dense<0xFF800000> : vector<1x8xf32>
    %185 = vector.multi_reduction <maximumf>, %184, %cst_91 [2] : vector<1x8x8xf32> to vector<1x8xf32>
    %186 = vector.shape_cast %185 : vector<1x8xf32> to vector<1x8x1xf32>
    %187 = vector.broadcast %186 : vector<1x8x1xf32> to vector<1x8x8xf32>
    %188 = arith.subf %184, %187 : vector<1x8x8xf32>
    %189 = math.exp %188 : vector<1x8x8xf32>
    %cst_92 = arith.constant dense<0.000000e+00> : vector<1x8xf32>
    %190 = vector.multi_reduction <add>, %189, %cst_92 [2] : vector<1x8x8xf32> to vector<1x8xf32>
    %191 = vector.shape_cast %190 : vector<1x8xf32> to vector<1x8x1xf32>
    %192 = tpu.reciprocal %191 {approx = true} : vector<1x8x1xf32> -> vector<1x8x1xf32>
    %193 = vector.broadcast %192 : vector<1x8x1xf32> to vector<1x8x8xf32>
    %194 = arith.mulf %189, %193 : vector<1x8x8xf32>
    %195 = arith.truncf %194 : vector<1x8x8xf32> to vector<1x8x8xbf16>
    %196 = vector.extract_strided_slice %160 {offsets = [0, 0, 32], sizes = [1, 8, 32], strides = [1, 1, 1]} : vector<1x8x128xbf16> to vector<1x8x32xbf16>
    "tpu.trace_start"() <{level = 10 : i32, message = "bqk,bkd->bqd"}> : () -> ()
    %cst_93 = arith.constant dense<0.000000e+00> : vector<1x8x32xf32>
    %197 = tpu.matmul %195, %196, %cst_93 {dimension_numbers = #tpu.dot_dimension_numbers<[2], [1], [1], [2], [0, 0, 0, 1, 1, 2], [0], [0]>} : vector<1x8x8xbf16>, vector<1x8x32xbf16>, vector<1x8x32xf32> -> vector<1x8x32xf32>
    "tpu.trace_stop"() : () -> ()
    %c0_94 = arith.constant 0 : index
    %c0_95 = arith.constant 0 : index
    %c32_96 = arith.constant 32 : index
    %198 = vector.load %arg30[%c0_94, %c0_95, %c32_96] : memref<1x8x128xf32, #tpu.memory_space<vmem>>, vector<1x8x32xf32>
    tpu.vector_store %arg30[%c0_94, %c0_95, %c32_96], %197 {strides = array<i32>} : memref<1x8x128xf32, #tpu.memory_space<vmem>>, vector<1x8x32xf32>,
    %199 = vector.extract_strided_slice %158 {offsets = [0, 0, 64], sizes = [1, 8, 32], strides = [1, 1, 1]} : vector<1x8x128xbf16> to vector<1x8x32xbf16>
    %200 = vector.extract_strided_slice %159 {offsets = [0, 0, 64], sizes = [1, 8, 32], strides = [1, 1, 1]} : vector<1x8x128xbf16> to vector<1x8x32xbf16>
    "tpu.trace_start"() <{level = 10 : i32, message = "bqd,bkd->bqk"}> : () -> ()
    %cst_97 = arith.constant dense<0.000000e+00> : vector<1x8x8xf32>
    %201 = tpu.matmul %199, %200, %cst_97 {dimension_numbers = #tpu.dot_dimension_numbers<[2], [2], [1], [1], [0, 0, 0, 1, 1, 1], [0], [0]>} : vector<1x8x32xbf16>, vector<1x8x32xbf16>, vector<1x8x8xf32> -> vector<1x8x8xf32>
    "tpu.trace_stop"() : () -> ()
    %cst_98 = arith.constant 0.176776692 : f32
    %202 = vector.broadcast %cst_98 : f32 to vector<1x8x8xf32>
    %203 = arith.mulf %201, %202 : vector<1x8x8xf32>
    %cst_99 = arith.constant dense<0xFF800000> : vector<1x8xf32>
    %204 = vector.multi_reduction <maximumf>, %203, %cst_99 [2] : vector<1x8x8xf32> to vector<1x8xf32>
    %205 = vector.shape_cast %204 : vector<1x8xf32> to vector<1x8x1xf32>
    %206 = vector.broadcast %205 : vector<1x8x1xf32> to vector<1x8x8xf32>
    %207 = arith.subf %203, %206 : vector<1x8x8xf32>
    %208 = math.exp %207 : vector<1x8x8xf32>
    %cst_100 = arith.constant dense<0.000000e+00> : vector<1x8xf32>
    %209 = vector.multi_reduction <add>, %208, %cst_100 [2] : vector<1x8x8xf32> to vector<1x8xf32>
    %210 = vector.shape_cast %209 : vector<1x8xf32> to vector<1x8x1xf32>
    %211 = tpu.reciprocal %210 {approx = true} : vector<1x8x1xf32> -> vector<1x8x1xf32>
    %212 = vector.broadcast %211 : vector<1x8x1xf32> to vector<1x8x8xf32>
    %213 = arith.mulf %208, %212 : vector<1x8x8xf32>
    %214 = arith.truncf %213 : vector<1x8x8xf32> to vector<1x8x8xbf16>
    %215 = vector.extract_strided_slice %160 {offsets = [0, 0, 64], sizes = [1, 8, 32], strides = [1, 1, 1]} : vector<1x8x128xbf16> to vector<1x8x32xbf16>
    "tpu.trace_start"() <{level = 10 : i32, message = "bqk,bkd->bqd"}> : () -> ()
    %cst_101 = arith.constant dense<0.000000e+00> : vector<1x8x32xf32>
    %216 = tpu.matmul %214, %215, %cst_101 {dimension_numbers = #tpu.dot_dimension_numbers<[2], [1], [1], [2], [0, 0, 0, 1, 1, 2], [0], [0]>} : vector<1x8x8xbf16>, vector<1x8x32xbf16>, vector<1x8x32xf32> -> vector<1x8x32xf32>
    "tpu.trace_stop"() : () -> ()
    %c0_102 = arith.constant 0 : index
    %c0_103 = arith.constant 0 : index
    %c64_104 = arith.constant 64 : index
    %217 = vector.load %arg30[%c0_102, %c0_103, %c64_104] : memref<1x8x128xf32, #tpu.memory_space<vmem>>, vector<1x8x32xf32>
    tpu.vector_store %arg30[%c0_102, %c0_103, %c64_104], %216 {strides = array<i32>} : memref<1x8x128xf32, #tpu.memory_space<vmem>>, vector<1x8x32xf32>,
    %218 = vector.extract_strided_slice %158 {offsets = [0, 0, 96], sizes = [1, 8, 32], strides = [1, 1, 1]} : vector<1x8x128xbf16> to vector<1x8x32xbf16>
    %219 = vector.extract_strided_slice %159 {offsets = [0, 0, 96], sizes = [1, 8, 32], strides = [1, 1, 1]} : vector<1x8x128xbf16> to vector<1x8x32xbf16>
    "tpu.trace_start"() <{level = 10 : i32, message = "bqd,bkd->bqk"}> : () -> ()
    %cst_105 = arith.constant dense<0.000000e+00> : vector<1x8x8xf32>
    %220 = tpu.matmul %218, %219, %cst_105 {dimension_numbers = #tpu.dot_dimension_numbers<[2], [2], [1], [1], [0, 0, 0, 1, 1, 1], [0], [0]>} : vector<1x8x32xbf16>, vector<1x8x32xbf16>, vector<1x8x8xf32> -> vector<1x8x8xf32>
    "tpu.trace_stop"() : () -> ()
    %cst_106 = arith.constant 0.176776692 : f32
    %221 = vector.broadcast %cst_106 : f32 to vector<1x8x8xf32>
    %222 = arith.mulf %220, %221 : vector<1x8x8xf32>
    %cst_107 = arith.constant dense<0xFF800000> : vector<1x8xf32>
    %223 = vector.multi_reduction <maximumf>, %222, %cst_107 [2] : vector<1x8x8xf32> to vector<1x8xf32>
    %224 = vector.shape_cast %223 : vector<1x8xf32> to vector<1x8x1xf32>
    %225 = vector.broadcast %224 : vector<1x8x1xf32> to vector<1x8x8xf32>
    %226 = arith.subf %222, %225 : vector<1x8x8xf32>
    %227 = math.exp %226 : vector<1x8x8xf32>
    %cst_108 = arith.constant dense<0.000000e+00> : vector<1x8xf32>
    %228 = vector.multi_reduction <add>, %227, %cst_108 [2] : vector<1x8x8xf32> to vector<1x8xf32>
    %229 = vector.shape_cast %228 : vector<1x8xf32> to vector<1x8x1xf32>
    %230 = tpu.reciprocal %229 {approx = true} : vector<1x8x1xf32> -> vector<1x8x1xf32>
    %231 = vector.broadcast %230 : vector<1x8x1xf32> to vector<1x8x8xf32>
    %232 = arith.mulf %227, %231 : vector<1x8x8xf32>
    %233 = arith.truncf %232 : vector<1x8x8xf32> to vector<1x8x8xbf16>
    %234 = vector.extract_strided_slice %160 {offsets = [0, 0, 96], sizes = [1, 8, 32], strides = [1, 1, 1]} : vector<1x8x128xbf16> to vector<1x8x32xbf16>
    "tpu.trace_start"() <{level = 10 : i32, message = "bqk,bkd->bqd"}> : () -> ()
    %cst_109 = arith.constant dense<0.000000e+00> : vector<1x8x32xf32>
    %235 = tpu.matmul %233, %234, %cst_109 {dimension_numbers = #tpu.dot_dimension_numbers<[2], [1], [1], [2], [0, 0, 0, 1, 1, 2], [0], [0]>} : vector<1x8x8xbf16>, vector<1x8x32xbf16>, vector<1x8x32xf32> -> vector<1x8x32xf32>
    "tpu.trace_stop"() : () -> ()
    %c0_110 = arith.constant 0 : index
    %c0_111 = arith.constant 0 : index
    %c96_112 = arith.constant 96 : index
    %236 = vector.load %arg30[%c0_110, %c0_111, %c96_112] : memref<1x8x128xf32, #tpu.memory_space<vmem>>, vector<1x8x32xf32>
    tpu.vector_store %arg30[%c0_110, %c0_111, %c96_112], %235 {strides = array<i32>} : memref<1x8x128xf32, #tpu.memory_space<vmem>>, vector<1x8x32xf32>,
    %c0_113 = arith.constant 0 : index
    %c0_114 = arith.constant 0 : index
    %c0_115 = arith.constant 0 : index
    %237 = vector.load %arg30[%c0_113, %c0_114, %c0_115] : memref<1x8x128xf32, #tpu.memory_space<vmem>>, vector<1x8x128xf32>
    %238 = vector.shape_cast %237 : vector<1x8x128xf32> to vector<8x128xf32>
    %239 = arith.truncf %238 : vector<8x128xf32> to vector<8x128xbf16>
    %c0_116 = arith.constant 0 : index
    %c0_117 = arith.constant 0 : index
    %c0_118 = arith.constant 0 : index
    %240 = vector.load %arg16[%c0_116, %c0_117, %c0_118] : memref<1x128x128xbf16, #tpu.memory_space<vmem>>, vector<1x128x128xbf16>
    %241 = vector.shape_cast %240 : vector<1x128x128xbf16> to vector<128x128xbf16>
    %cst_119 = arith.constant dense<0.000000e+00> : vector<8x128xf32>
    %242 = tpu.matmul %239, %241, %cst_119 {dimension_numbers = #tpu.dot_dimension_numbers<[1], [0], [0], [1], [0, 0, 1, 1], [], []>} : vector<8x128xbf16>, vector<128x128xbf16>, vector<8x128xf32> -> vector<8x128xf32>
    %c0_120 = arith.constant 0 : index
    %c0_121 = arith.constant 0 : index
    %c0_122 = arith.constant 0 : index
    %243 = vector.load %arg17[%c0_120, %c0_121, %c0_122] : memref<1x1x128xf32, #tpu.memory_space<vmem>>, vector<1x1x128xf32>
    %244 = vector.shape_cast %243 : vector<1x1x128xf32> to vector<1x128xf32>
    %245 = vector.broadcast %244 : vector<1x128xf32> to vector<8x128xf32>
    %246 = arith.addf %242, %245 : vector<8x128xf32>
    %247 = arith.addf %137, %246 : vector<8x128xf32>
    %c0_123 = arith.constant 0 : index
    %c0_124 = arith.constant 0 : index
    %c0_125 = arith.constant 0 : index
    %248 = vector.load %arg18[%c0_123, %c0_124, %c0_125] : memref<1x1x128xf32, #tpu.memory_space<vmem>>, vector<1x1x128xf32>
    %249 = vector.shape_cast %248 : vector<1x1x128xf32> to vector<1x128xf32>
    %c0_126 = arith.constant 0 : index
    %c0_127 = arith.constant 0 : index
    %c0_128 = arith.constant 0 : index
    %250 = vector.load %arg19[%c0_126, %c0_127, %c0_128] : memref<1x1x128xf32, #tpu.memory_space<vmem>>, vector<1x1x128xf32>
    %251 = vector.shape_cast %250 : vector<1x1x128xf32> to vector<1x128xf32>
    %cst_129 = arith.constant dense<0.000000e+00> : vector<8xf32>
    %252 = vector.multi_reduction <add>, %247, %cst_129 [1] : vector<8x128xf32> to vector<8xf32>
    %253 = vector.shape_cast %252 : vector<8xf32> to vector<8x1xf32>
    %cst_130 = arith.constant 1.280000e+02 : f32
    %254 = vector.broadcast %cst_130 : f32 to vector<8x1xf32>
    %255 = arith.divf %253, %254 : vector<8x1xf32>
    %256 = vector.broadcast %255 : vector<8x1xf32> to vector<8x128xf32>
    %257 = arith.subf %247, %256 : vector<8x128xf32>
    %258 = arith.mulf %257, %257 : vector<8x128xf32>
    %cst_131 = arith.constant dense<0.000000e+00> : vector<8xf32>
    %259 = vector.multi_reduction <add>, %258, %cst_131 [1] : vector<8x128xf32> to vector<8xf32>
    %260 = vector.shape_cast %259 : vector<8xf32> to vector<8x1xf32>
    %cst_132 = arith.constant 1.280000e+02 : f32
    %261 = vector.broadcast %cst_132 : f32 to vector<8x1xf32>
    %262 = arith.divf %260, %261 : vector<8x1xf32>
    %cst_133 = arith.constant 9.99999974E-6 : f32
    %263 = vector.broadcast %cst_133 : f32 to vector<8x1xf32>
    %264 = arith.addf %262, %263 : vector<8x1xf32>
    %265 = math.rsqrt %264 : vector<8x1xf32>
    %266 = vector.broadcast %265 : vector<8x1xf32> to vector<8x128xf32>
    %267 = arith.mulf %257, %266 : vector<8x128xf32>
    %268 = vector.broadcast %249 : vector<1x128xf32> to vector<8x128xf32>
    %269 = arith.mulf %267, %268 : vector<8x128xf32>
    %270 = vector.broadcast %251 : vector<1x128xf32> to vector<8x128xf32>
    %271 = arith.addf %269, %270 : vector<8x128xf32>
    %272 = arith.truncf %271 : vector<8x128xf32> to vector<8x128xbf16>
    %c0_134 = arith.constant 0 : index
    %c0_135 = arith.constant 0 : index
    %c0_136 = arith.constant 0 : index
    %273 = vector.load %arg20[%c0_134, %c0_135, %c0_136] : memref<1x128x256xbf16, #tpu.memory_space<vmem>>, vector<1x128x256xbf16>
    %274 = vector.shape_cast %273 : vector<1x128x256xbf16> to vector<128x256xbf16>
    %cst_137 = arith.constant dense<0.000000e+00> : vector<8x256xf32>
    %275 = tpu.matmul %272, %274, %cst_137 {dimension_numbers = #tpu.dot_dimension_numbers<[1], [0], [0], [1], [0, 0, 1, 1], [], []>} : vector<8x128xbf16>, vector<128x256xbf16>, vector<8x256xf32> -> vector<8x256xf32>
    %c0_138 = arith.constant 0 : index
    %c0_139 = arith.constant 0 : index
    %c0_140 = arith.constant 0 : index
    %276 = vector.load %arg21[%c0_138, %c0_139, %c0_140] : memref<1x1x256xf32, #tpu.memory_space<vmem>>, vector<1x1x256xf32>
    %277 = vector.shape_cast %276 : vector<1x1x256xf32> to vector<1x256xf32>
    %278 = vector.broadcast %277 : vector<1x256xf32> to vector<8x256xf32>
    %279 = arith.addf %275, %278 : vector<8x256xf32>
    %cst_141 = arith.constant 0.000000e+00 : f32
    %280 = vector.broadcast %cst_141 : f32 to vector<8x256xf32>
    %281 = arith.maximumf %279, %280 : vector<8x256xf32>
    %282 = arith.truncf %281 : vector<8x256xf32> to vector<8x256xbf16>
    %c0_142 = arith.constant 0 : index
    %c0_143 = arith.constant 0 : index
    %c0_144 = arith.constant 0 : index
    %283 = vector.load %arg22[%c0_142, %c0_143, %c0_144] : memref<1x256x128xbf16, #tpu.memory_space<vmem>>, vector<1x256x128xbf16>
    %284 = vector.shape_cast %283 : vector<1x256x128xbf16> to vector<256x128xbf16>
    %cst_145 = arith.constant dense<0.000000e+00> : vector<8x128xf32>
    %285 = tpu.matmul %282, %284, %cst_145 {dimension_numbers = #tpu.dot_dimension_numbers<[1], [0], [0], [1], [0, 0, 1, 1], [], []>} : vector<8x256xbf16>, vector<256x128xbf16>, vector<8x128xf32> -> vector<8x128xf32>
    %c0_146 = arith.constant 0 : index
    %c0_147 = arith.constant 0 : index
    %c0_148 = arith.constant 0 : index
    %286 = vector.load %arg23[%c0_146, %c0_147, %c0_148] : memref<1x1x128xf32, #tpu.memory_space<vmem>>, vector<1x1x128xf32>
    %287 = vector.shape_cast %286 : vector<1x1x128xf32> to vector<1x128xf32>
    %288 = vector.broadcast %287 : vector<1x128xf32> to vector<8x128xf32>
    %289 = arith.addf %285, %288 : vector<8x128xf32>
    %290 = arith.addf %271, %289 : vector<8x128xf32>
    %c0_149 = arith.constant 0 : index
    %c0_150 = arith.constant 0 : index
    %c0_151 = arith.constant 0 : index
    %291 = vector.load %arg24[%c0_149, %c0_150, %c0_151] : memref<1x1x128xf32, #tpu.memory_space<vmem>>, vector<1x1x128xf32>
    %292 = vector.shape_cast %291 : vector<1x1x128xf32> to vector<1x128xf32>
    %c0_152 = arith.constant 0 : index
    %c0_153 = arith.constant 0 : index
    %c0_154 = arith.constant 0 : index
    %293 = vector.load %arg25[%c0_152, %c0_153, %c0_154] : memref<1x1x128xf32, #tpu.memory_space<vmem>>, vector<1x1x128xf32>
    %294 = vector.shape_cast %293 : vector<1x1x128xf32> to vector<1x128xf32>
    %cst_155 = arith.constant dense<0.000000e+00> : vector<8xf32>
    %295 = vector.multi_reduction <add>, %290, %cst_155 [1] : vector<8x128xf32> to vector<8xf32>
    %296 = vector.shape_cast %295 : vector<8xf32> to vector<8x1xf32>
    %cst_156 = arith.constant 1.280000e+02 : f32
    %297 = vector.broadcast %cst_156 : f32 to vector<8x1xf32>
    %298 = arith.divf %296, %297 : vector<8x1xf32>
    %299 = vector.broadcast %298 : vector<8x1xf32> to vector<8x128xf32>
    %300 = arith.subf %290, %299 : vector<8x128xf32>
    %301 = arith.mulf %300, %300 : vector<8x128xf32>
    %cst_157 = arith.constant dense<0.000000e+00> : vector<8xf32>
    %302 = vector.multi_reduction <add>, %301, %cst_157 [1] : vector<8x128xf32> to vector<8xf32>
    %303 = vector.shape_cast %302 : vector<8xf32> to vector<8x1xf32>
    %cst_158 = arith.constant 1.280000e+02 : f32
    %304 = vector.broadcast %cst_158 : f32 to vector<8x1xf32>
    %305 = arith.divf %303, %304 : vector<8x1xf32>
    %cst_159 = arith.constant 9.99999974E-6 : f32
    %306 = vector.broadcast %cst_159 : f32 to vector<8x1xf32>
    %307 = arith.addf %305, %306 : vector<8x1xf32>
    %308 = math.rsqrt %307 : vector<8x1xf32>
    %309 = vector.broadcast %308 : vector<8x1xf32> to vector<8x128xf32>
    %310 = arith.mulf %300, %309 : vector<8x128xf32>
    %311 = vector.broadcast %292 : vector<1x128xf32> to vector<8x128xf32>
    %312 = arith.mulf %310, %311 : vector<8x128xf32>
    %313 = vector.broadcast %294 : vector<1x128xf32> to vector<8x128xf32>
    %314 = arith.addf %312, %313 : vector<8x128xf32>
    %315 = vector.shape_cast %314 : vector<8x128xf32> to vector<1x8x128xf32>
    %c0_160 = arith.constant 0 : index
    %c0_161 = arith.constant 0 : index
    %c0_162 = arith.constant 0 : index
    %316 = vector.load %arg29[%c0_160, %c0_161, %c0_162] : memref<1x8x128xf32, #tpu.memory_space<vmem>>, vector<1x8x128xf32>
    tpu.vector_store %arg29[%c0_160, %c0_161, %c0_162], %315 {strides = array<i32>} : memref<1x8x128xf32, #tpu.memory_space<vmem>>, vector<1x8x128xf32>,
    %c1_i32 = arith.constant 1 : i32
    %317 = arith.cmpi eq, %arg1, %c1_i32 : i32
    %318 = arith.extui %317 : i1 to i32
    %c0_i32_163 = arith.constant 0 : i32
    %319 = arith.cmpi ne, %318, %c0_i32_163 : i32
    scf.if %319 {
      %c0_164 = arith.constant 0 : index
      %c0_165 = arith.constant 0 : index
      %320 = vector.load %arg26[%c0_164, %c0_165] : memref<1x128xf32, #tpu.memory_space<vmem>>, vector<1x128xf32>
      %c0_166 = arith.constant 0 : index
      %c0_167 = arith.constant 0 : index
      %321 = vector.load %arg27[%c0_166, %c0_167] : memref<1x128xf32, #tpu.memory_space<vmem>>, vector<1x128xf32>
      %cst_168 = arith.constant dense<0.000000e+00> : vector<8xf32>
      %322 = vector.multi_reduction <add>, %314, %cst_168 [1] : vector<8x128xf32> to vector<8xf32>
      %323 = vector.shape_cast %322 : vector<8xf32> to vector<8x1xf32>
      %cst_169 = arith.constant 1.280000e+02 : f32
      %324 = vector.broadcast %cst_169 : f32 to vector<8x1xf32>
      %325 = arith.divf %323, %324 : vector<8x1xf32>
      %326 = vector.broadcast %325 : vector<8x1xf32> to vector<8x128xf32>
      %327 = arith.subf %314, %326 : vector<8x128xf32>
      %328 = arith.mulf %327, %327 : vector<8x128xf32>
      %cst_170 = arith.constant dense<0.000000e+00> : vector<8xf32>
      %329 = vector.multi_reduction <add>, %328, %cst_170 [1] : vector<8x128xf32> to vector<8xf32>
      %330 = vector.shape_cast %329 : vector<8xf32> to vector<8x1xf32>
      %cst_171 = arith.constant 1.280000e+02 : f32
      %331 = vector.broadcast %cst_171 : f32 to vector<8x1xf32>
      %332 = arith.divf %330, %331 : vector<8x1xf32>
      %cst_172 = arith.constant 9.99999974E-6 : f32
      %333 = vector.broadcast %cst_172 : f32 to vector<8x1xf32>
      %334 = arith.addf %332, %333 : vector<8x1xf32>
      %335 = math.rsqrt %334 : vector<8x1xf32>
      %336 = vector.broadcast %335 : vector<8x1xf32> to vector<8x128xf32>
      %337 = arith.mulf %327, %336 : vector<8x128xf32>
      %338 = vector.broadcast %320 : vector<1x128xf32> to vector<8x128xf32>
      %339 = arith.mulf %337, %338 : vector<8x128xf32>
      %340 = vector.broadcast %321 : vector<1x128xf32> to vector<8x128xf32>
      %341 = arith.addf %339, %340 : vector<8x128xf32>
      %342 = arith.truncf %341 : vector<8x128xf32> to vector<8x128xbf16>
      %343 = vector.shape_cast %342 : vector<8x128xbf16> to vector<1x8x128xbf16>
      %c0_173 = arith.constant 0 : index
      %c0_174 = arith.constant 0 : index
      %c0_175 = arith.constant 0 : index
      %344 = vector.load %arg28[%c0_173, %c0_174, %c0_175] : memref<1x8x128xbf16, #tpu.memory_space<vmem>>, vector<1x8x128xbf16>
      tpu.vector_store %arg28[%c0_173, %c0_174, %c0_175], %343 {strides = array<i32>} : memref<1x8x128xbf16, #tpu.memory_space<vmem>>, vector<1x8x128xbf16>,
    } else {
    }
    return
  }
  func.func @transform_0(%arg0: i32, %arg1: i32) -> (i32, i32, i32) {
    %c0_i32 = arith.constant 0 : i32
    %c0_i32_0 = arith.constant 0 : i32
    %c0_i32_1 = arith.constant 0 : i32
    return %arg0, %c0_i32, %c0_i32_0 : i32, i32, i32
  }
  func.func @transform_1(%arg0: i32, %arg1: i32) -> (i32, i32, i32) {
    %c0_i32 = arith.constant 0 : i32
    %c0_i32_0 = arith.constant 0 : i32
    %c0_i32_1 = arith.constant 0 : i32
    return %arg0, %c0_i32, %c0_i32_0 : i32, i32, i32
  }
  func.func @transform_2(%arg0: i32, %arg1: i32) -> (i32, i32) {
    %c0_i32 = arith.constant 0 : i32
    %c0_i32_0 = arith.constant 0 : i32
    %c0_i32_1 = arith.constant 0 : i32
    return %c0_i32, %c0_i32_0 : i32, i32
  }
  func.func @transform_3(%arg0: i32, %arg1: i32) -> (i32, i32, i32) {
    %c0_i32 = arith.constant 0 : i32
    %c0_i32_0 = arith.constant 0 : i32
    %c0_i32_1 = arith.constant 0 : i32
    return %arg0, %c0_i32, %c0_i32_0 : i32, i32, i32
  }
  func.func @transform_4(%arg0: i32, %arg1: i32) -> (i32, i32, i32) {
    %c0_i32 = arith.constant 0 : i32
    %c0_i32_0 = arith.constant 0 : i32
    %c0_i32_1 = arith.constant 0 : i32
    return %arg1, %c0_i32, %c0_i32_0 : i32, i32, i32
  }
  func.func @transform_5(%arg0: i32, %arg1: i32) -> (i32, i32, i32) {
    %c0_i32 = arith.constant 0 : i32
    %c0_i32_0 = arith.constant 0 : i32
    %c0_i32_1 = arith.constant 0 : i32
    return %arg1, %c0_i32, %c0_i32_0 : i32, i32, i32
  }
  func.func @transform_6(%arg0: i32, %arg1: i32) -> (i32, i32, i32) {
    %c0_i32 = arith.constant 0 : i32
    %c0_i32_0 = arith.constant 0 : i32
    %c0_i32_1 = arith.constant 0 : i32
    return %arg1, %c0_i32, %c0_i32_0 : i32, i32, i32
  }
  func.func @transform_7(%arg0: i32, %arg1: i32) -> (i32, i32, i32) {
    %c0_i32 = arith.constant 0 : i32
    %c0_i32_0 = arith.constant 0 : i32
    %c0_i32_1 = arith.constant 0 : i32
    return %arg1, %c0_i32, %c0_i32_0 : i32, i32, i32
  }
  func.func @transform_8(%arg0: i32, %arg1: i32) -> (i32, i32, i32) {
    %c0_i32 = arith.constant 0 : i32
    %c0_i32_0 = arith.constant 0 : i32
    %c0_i32_1 = arith.constant 0 : i32
    return %arg1, %c0_i32, %c0_i32_0 : i32, i32, i32
  }
  func.func @transform_9(%arg0: i32, %arg1: i32) -> (i32, i32, i32) {
    %c0_i32 = arith.constant 0 : i32
    %c0_i32_0 = arith.constant 0 : i32
    %c0_i32_1 = arith.constant 0 : i32
    return %arg1, %c0_i32, %c0_i32_0 : i32, i32, i32
  }
  func.func @transform_10(%arg0: i32, %arg1: i32) -> (i32, i32, i32) {
    %c0_i32 = arith.constant 0 : i32
    %c0_i32_0 = arith.constant 0 : i32
    %c0_i32_1 = arith.constant 0 : i32
    return %arg1, %c0_i32, %c0_i32_0 : i32, i32, i32
  }
  func.func @transform_11(%arg0: i32, %arg1: i32) -> (i32, i32, i32) {
    %c0_i32 = arith.constant 0 : i32
    %c0_i32_0 = arith.constant 0 : i32
    %c0_i32_1 = arith.constant 0 : i32
    return %arg1, %c0_i32, %c0_i32_0 : i32, i32, i32
  }
  func.func @transform_12(%arg0: i32, %arg1: i32) -> (i32, i32, i32) {
    %c0_i32 = arith.constant 0 : i32
    %c0_i32_0 = arith.constant 0 : i32
    %c0_i32_1 = arith.constant 0 : i32
    return %arg1, %c0_i32, %c0_i32_0 : i32, i32, i32
  }
  func.func @transform_13(%arg0: i32, %arg1: i32) -> (i32, i32, i32) {
    %c0_i32 = arith.constant 0 : i32
    %c0_i32_0 = arith.constant 0 : i32
    %c0_i32_1 = arith.constant 0 : i32
    return %arg1, %c0_i32, %c0_i32_0 : i32, i32, i32
  }
  func.func @transform_14(%arg0: i32, %arg1: i32) -> (i32, i32, i32) {
    %c0_i32 = arith.constant 0 : i32
    %c0_i32_0 = arith.constant 0 : i32
    %c0_i32_1 = arith.constant 0 : i32
    return %arg1, %c0_i32, %c0_i32_0 : i32, i32, i32
  }
  func.func @transform_15(%arg0: i32, %arg1: i32) -> (i32, i32, i32) {
    %c0_i32 = arith.constant 0 : i32
    %c0_i32_0 = arith.constant 0 : i32
    %c0_i32_1 = arith.constant 0 : i32
    return %arg1, %c0_i32, %c0_i32_0 : i32, i32, i32
  }
  func.func @transform_16(%arg0: i32, %arg1: i32) -> (i32, i32, i32) {
    %c0_i32 = arith.constant 0 : i32
    %c0_i32_0 = arith.constant 0 : i32
    %c0_i32_1 = arith.constant 0 : i32
    return %arg1, %c0_i32, %c0_i32_0 : i32, i32, i32
  }
  func.func @transform_17(%arg0: i32, %arg1: i32) -> (i32, i32, i32) {
    %c0_i32 = arith.constant 0 : i32
    %c0_i32_0 = arith.constant 0 : i32
    %c0_i32_1 = arith.constant 0 : i32
    return %arg1, %c0_i32, %c0_i32_0 : i32, i32, i32
  }
  func.func @transform_18(%arg0: i32, %arg1: i32) -> (i32, i32, i32) {
    %c0_i32 = arith.constant 0 : i32
    %c0_i32_0 = arith.constant 0 : i32
    %c0_i32_1 = arith.constant 0 : i32
    return %arg1, %c0_i32, %c0_i32_0 : i32, i32, i32
  }
  func.func @transform_19(%arg0: i32, %arg1: i32) -> (i32, i32, i32) {
    %c0_i32 = arith.constant 0 : i32
    %c0_i32_0 = arith.constant 0 : i32
    %c0_i32_1 = arith.constant 0 : i32
    return %arg1, %c0_i32, %c0_i32_0 : i32, i32, i32
  }
  func.func @transform_20(%arg0: i32, %arg1: i32) -> (i32, i32, i32) {
    %c0_i32 = arith.constant 0 : i32
    %c0_i32_0 = arith.constant 0 : i32
    %c0_i32_1 = arith.constant 0 : i32
    return %arg1, %c0_i32, %c0_i32_0 : i32, i32, i32
  }
  func.func @transform_21(%arg0: i32, %arg1: i32) -> (i32, i32, i32) {
    %c0_i32 = arith.constant 0 : i32
    %c0_i32_0 = arith.constant 0 : i32
    %c0_i32_1 = arith.constant 0 : i32
    return %arg1, %c0_i32, %c0_i32_0 : i32, i32, i32
  }
  func.func @transform_22(%arg0: i32, %arg1: i32) -> (i32, i32, i32) {
    %c0_i32 = arith.constant 0 : i32
    %c0_i32_0 = arith.constant 0 : i32
    %c0_i32_1 = arith.constant 0 : i32
    return %arg1, %c0_i32, %c0_i32_0 : i32, i32, i32
  }
  func.func @transform_23(%arg0: i32, %arg1: i32) -> (i32, i32, i32) {
    %c0_i32 = arith.constant 0 : i32
    %c0_i32_0 = arith.constant 0 : i32
    %c0_i32_1 = arith.constant 0 : i32
    return %arg1, %c0_i32, %c0_i32_0 : i32, i32, i32
  }
  func.func @transform_24(%arg0: i32, %arg1: i32) -> (i32, i32) {
    %c0_i32 = arith.constant 0 : i32
    %c0_i32_0 = arith.constant 0 : i32
    %c0_i32_1 = arith.constant 0 : i32
    return %c0_i32, %c0_i32_0 : i32, i32
  }
  func.func @transform_25(%arg0: i32, %arg1: i32) -> (i32, i32) {
    %c0_i32 = arith.constant 0 : i32
    %c0_i32_0 = arith.constant 0 : i32
    %c0_i32_1 = arith.constant 0 : i32
    return %c0_i32, %c0_i32_0 : i32, i32
  }
  func.func @transform_26(%arg0: i32, %arg1: i32) -> (i32, i32, i32) {
    %c0_i32 = arith.constant 0 : i32
    %c0_i32_0 = arith.constant 0 : i32
    %c0_i32_1 = arith.constant 0 : i32
    return %arg0, %c0_i32, %c0_i32_0 : i32, i32, i32
  }
}

</mosaic_0001>

<bundles_post_ra>
// kernel: forward.5
= control target key start
LH: loop header
LB: loop body
LE: loop exit
PB: predicated region body
PF: predicated region fallthrough
CT: control target
= control target key end

     0   :  { %8 = vsyncpa [#allocation3], 0  ;;  %s829_s0 = inlined_call_operand.vmem [shape: bf16[2,8,128], index: 0, kind: input, shape index: {}]   ;;  %s830_s1 = inlined_call_operand.hbm [shape: bf16[128,512], index: 1, kind: input, shape index: {}]   ;;  %s831_s2 = inlined_call_operand.vmem [shape: f32[1,512], index: 2, kind: input, shape index: {}]   ;;  %s832_s3 = inlined_call_operand.vmem [shape: f32[2,8,512], index: 3, kind: output, shape index: {}]  }
   0x1   :  { %10 = vsyncpa [#allocation3 + $0x1], 0  ;;  %s687_s12 = smov 0   ;;  %s689_s13 = smov 0  }
   0x2   :  { %s691_s14 = smov 0   ;;  %s693_s15 = smov 0  }
   0x3 LB: > { %s706_s16 = sadd.s32 4294967295, %s662_s15   ;;  %s709_s17 = sadd.s32 1, %s662_s15   ;;  %s662_s15 = sphi %s693_s15, %s840_s15   ;;  %s658_s14 = sphi %s691_s14, %s839_s14   ;;  %s654_s13 = sphi %s689_s13, %s838_s13   ;;  %s650_s12 = sphi %s687_s12, %s837_s12  }
   0x4   : > { %s41_s18 = ssub.s32 %s662_s15, %s709_s17  ;;  %s44_s19 = sadd.s32 1, %s658_s14 }
   0x5   : > { %p42_p0 = scmp.eq.s32.totalorder %s41_s18, 0  ;;  %p51_p1 = scmp.ne.s32.totalorder %s658_s14, %s654_s13 }
   0x6   : > { %p52_p2 = scmp.eq.s32.totalorder %s662_s15, 0  ;;  %p57_p3 = scmp.ne.s32.totalorder %s654_s13, %s650_s12 }
   0x7   : > { %s719_s20 = scalar_select %p42_p0, %s658_s14, %s44_s19  }
   0x8   : > { %p721_p4 = por %p52_p2, %p51_p1  ;;  %p58_p5 = scmp.eq.s32.totalorder %s706_s16, 0 }
   0x9   : > { %p107_p6 = scmp.eq.s32.totalorder %s706_s16, 1  ;;  %p562_p8 = scmp.lt.s32.totalorder %s662_s15, 2 }
   0xa   : > { %p727_p7 = por %p58_p5, %p57_p3  ;;  %s136_s24 = sand.u32 1, %s658_s14  }
   0xb   : > { %p732_p9 = por %p107_p6, %p51_p1  ;;  %s457_s25 = sshll.u32 %s136_s24, 7 }
   0xc   : > { %s537_s26 = sshll.u32 %s662_s15, 3  ;;  %s140_s30 = scalar_lea.vmem [#allocation2], %s457_s25 }
   0xd   : > { %s145_s29 = scalar_lea.hbm %s830_s1, %s537_s26  ;;  %s148_s4 = sshll.u32 %s140_s30, 4  ;;  %s149_s4 = int_to_ptr.vmem [resolvable:$true] %s148_s4 }
   0xe   : > { %s146_s5 = sshll.u32 %s145_s29, 4  ;;  %p743_p10 = pnand %p562_p8, %p721_p4  ;;  %s147_s5 = int_to_ptr.hbm [resolvable:$true] %s146_s5 }
   0xf   : > { %s137_s7 = scalar_lea.sflag [#allocation3], %s136_s24  ;;  %s598_s8 = sshra.s32 %s147_s5, 4  ;;  %s599_s8 = int_to_ptr.hbm [resolvable:$true] %s598_s8 }
  0x10   : > { %s600_s9 = scalar_lea.hbm %s599_s8, 128  ;;  %p602_p12 = pneg %p743_p10 }
  0x11   : > { %p601_p11 = scmp.ne.s32.totalorder %s599_s8, %s600_s9  ;;  %s605_s12 = scalar_lea.hbm %s830_s1, 256 }
  0x12   : > { %p606_p1 = scmp.lt.s32.totalorder %s599_s8, %s830_s1  ;;  %p607_p2 = scmp.lt.s32.totalorder %s605_s12, %s600_s9 }
  0x13   : > { %p603_p13 = pnand %p602_p12, %p601_p11 }
  0x14   : > { %p608_p3 = por %p607_p2, %p606_p1 }
  0x15   : > { %p604_p0 = pneg %p603_p13 }
  0x17   : > { %p609_p4 = pnand %p608_p3, %p604_p0 }
  0x19   : > { %612 = shalt.err (!%p609_p4)
}
  0x1a   : > { %s664_s21 = smov 256   ;;  %s665_s24 = smov 128  }
  0x1b   : > { %s666_s25 = smov 8   ;;  %p460_p5 = scmp.ge.s32.totalorder %s662_s15, 1 }
  0x1c   : > { %561 = dma.hbm_to_vmem [thread:$0]  (!%p743_p10), %s147_s5, 2048, %s149_s4, %s137_s7, %s664_s21, %s665_s24, %s666_s25  }
  0x1d   : > { %p164_p6 = scmp.lt.s32.totalorder %s662_s15, 3 }
  0x1f   : > { %p165_p8 = pnand %p460_p5, %p164_p6 }
  0x20   : > { %s760_s26 = sand.u32 (!%p165_p8), 1, %s654_s13  }
  0x21   : > { %168 = sbr.rel (%p165_p8) target bundleno = 219 (0xdb), region = 32  ;;  %s461_s27 = sshll.u32 (!%p165_p8), %s760_s26, 7 }
  0x22   : > { %s171_s28 = scalar_lea.sflag (!%p165_p8), [#allocation3], %s760_s26  ;;  %s764_s29 = scalar_lea.vmem (!%p165_p8), [#allocation2], %s461_s27 }
  0x26   : > { %645 = dma.done.wait (%p727_p7), %s171_s28, 2048  }
  0x27   : > { %647 = vsyncadd (%p727_p7), %s171_s28, 4294965248  ;;  %v526_v0 = vld [vmem:[%s764_s29 + $0x70] sm:$0xf]  ;;  %v554_v1 = vld [vmem:[%s764_s29 + $0x74] sm:$0xf0]  ;;  %s463_s30 = sshll.u32 %s706_s16, 1 }
  0x28   : > { %v553_v2 = vld [vmem:[%s764_s29 + $0x74] sm:$0xf]  ;;  %v527_v3 = vor.u32 %v554_v1, %v526_v0  ;;  %v528_v4 = vld [vmem:[%s764_s29 + $0x78] sm:$0xf0]  ;;  %v518_v5 = vld [vmem:[%s764_s29 + $0x60] sm:$0xf] }
  0x29   : > { %v552_v6 = vld [vmem:[%s764_s29 + $0x64] sm:$0xf0]  ;;  %v531_v7 = vor.u32 %v553_v2, %v528_v4  ;;  %v551_v8 = vld [vmem:[%s764_s29 + $0x64] sm:$0xf]  ;;  %v520_v9 = vld [vmem:[%s764_s29 + $0x68] sm:$0xf0] }
  0x2a   : > { %318 = vmatpush.bf16.msra.mxu0 %v527_v3  ;;  %v519_v10 = vor.u32 %v552_v6, %v518_v5  ;;  %v523_v11 = vor.u32 %v551_v8, %v520_v9  ;;  %v510_v12 = vld [vmem:[%s764_s29 + $0x50] sm:$0xf]  ;;  %v550_v13 = vld [vmem:[%s764_s29 + $0x54] sm:$0xf0]  ;;  %v549_v14 = vld [vmem:[%s764_s29 + $0x54] sm:$0xf] }
  0x2b   : > { %332 = vmatpush.bf16.msra.mxu1 %v531_v7  ;;  %v512_v15 = vld [vmem:[%s764_s29 + $0x58] sm:$0xf0]  ;;  %v511_v16 = vor.u32 %v550_v13, %v510_v12  ;;  %v502_v18 = vld [vmem:[%s764_s29 + $0x40] sm:$0xf]  ;;  %v548_v19 = vld [vmem:[%s764_s29 + $0x44] sm:$0xf0] }
  0x2c   : > { %v515_v17 = vor.u32 %v549_v14, %v512_v15  ;;  %v547_v20 = vld [vmem:[%s764_s29 + $0x44] sm:$0xf]  ;;  %v504_v21 = vld [vmem:[%s764_s29 + $0x48] sm:$0xf0]  ;;  %v503_v22 = vor.u32 %v548_v19, %v502_v18  ;;  %v494_v24 = vld [vmem:[%s764_s29 + $0x30] sm:$0xf] }
  0x2d   : > { %v507_v23 = vor.u32 %v547_v20, %v504_v21  ;;  %v546_v25 = vld [vmem:[%s764_s29 + $0x34] sm:$0xf0]  ;;  %v545_v26 = vld [vmem:[%s764_s29 + $0x34] sm:$0xf]  ;;  %v496_v27 = vld [vmem:[%s764_s29 + $0x38] sm:$0xf0] }
  0x2e   : > { %319 = vmatpush.bf16.msra.mxu0 %v519_v10  ;;  %v495_v28 = vor.u32 %v546_v25, %v494_v24  ;;  %v499_v29 = vor.u32 %v545_v26, %v496_v27  ;;  %v486_v30 = vld [vmem:[%s764_s29 + $0x20] sm:$0xf]  ;;  %v544_v31 = vld [vmem:[%s764_s29 + $0x24] sm:$0xf0]  ;;  %v543_v32 = vld [vmem:[%s764_s29 + $0x24] sm:$0xf] }
  0x2f   : > { %333 = vmatpush.bf16.msra.mxu1 %v523_v11  ;;  %v488_v33 = vld [vmem:[%s764_s29 + $0x28] sm:$0xf0]  ;;  %v487_v34 = vor.u32 %v544_v31, %v486_v30  ;;  %v478_v36 = vld [vmem:[%s764_s29 + $0x10] sm:$0xf]  ;;  %v542_v37 = vld [vmem:[%s764_s29 + $0x14] sm:$0xf0] }
  0x30   : > { %v491_v35 = vor.u32 %v543_v32, %v488_v33  ;;  %v541_v38 = vld [vmem:[%s764_s29 + $0x14] sm:$0xf]  ;;  %v480_v39 = vld [vmem:[%s764_s29 + $0x18] sm:$0xf0]  ;;  %v479_v40 = vor.u32 %v542_v37, %v478_v36  ;;  %v470_v42 = vld [vmem:[%s764_s29] sm:$0xf] }
  0x31   : > { %v483_v41 = vor.u32 %v541_v38, %v480_v39  ;;  %v540_v43 = vld [vmem:[%s764_s29 + $0x4] sm:$0xf0]  ;;  %v539_v44 = vld [vmem:[%s764_s29 + $0x4] sm:$0xf]  ;;  %v472_v45 = vld [vmem:[%s764_s29 + $0x8] sm:$0xf0] }
  0x32   : > { %320 = vmatpush.bf16.msra.mxu0 %v511_v16  ;;  %v471_v46 = vor.u32 %v540_v43, %v470_v42  ;;  %v475_v47 = vor.u32 %v539_v44, %v472_v45  ;;  %v538_v48 = vld [vmem:[%s829_s0] sm:$0xff]  ;;  %p203_p7 = scmp.lt.s32.totalorder %s463_s30, 3  ;;  %s462_s7 = sshll.u32 %s760_s26, 5 }
  0x33   : > { %334 = vmatpush.bf16.msra.mxu1 %v515_v17  ;;  %s200_s8 = scalar_lea.vmem [#allocation4], %s462_s7  ;;  %s555_s9 = sshll.u32 (%p732_p9), %s706_s16, 4 }
  0x34   : > { %s842_s30 = smov (!%p203_p7, %s463_s30), 3  ;;  %s359_s12 = scalar_lea.vmem (%p732_p9), %s832_s3, %s555_s9 }
  0x35   : > { %s205_s6 = scalar_lea.vmem %s831_s2, %s842_s30 }
  0x36   : > { %321 = vmatpush.bf16.msra.mxu0 %v503_v22  ;;  %v226_v49 = vld [vmem:[%s205_s6] sm:$0x3] }
  0x37   : > { %335 = vmatpush.bf16.msra.mxu1 %v507_v23  ;;  %v228_v50 = vperm.slane %v226_v49, 0  ;;  %v229_v51 = vperm.slane %v226_v49, 1 }
  0x3a   : > { %322 = vmatpush.bf16.msra.mxu0 %v495_v28 }
  0x3b   : > { %336 = vmatpush.bf16.msra.mxu1 %v499_v29 }
  0x3e   : > { %323 = vmatpush.bf16.msra.mxu0 %v487_v34 }
  0x3f   : > { %337 = vmatpush.bf16.msra.mxu1 %v491_v35 }
  0x42   : > { %324 = vmatpush.bf16.msra.mxu0 %v479_v40 }
  0x43   : > { %338 = vmatpush.bf16.msra.mxu1 %v483_v41 }
  0x46   : > { %325 = vmatpush.bf16.msra.mxu0 %v471_v46 }
  0x47   : > { %339 = vmatpush.bf16.msra.mxu1 %v475_v47 }
  0x49   : > { %326 = vmatmul.bf16.vlgmr.msra.gmra.mxu0 %v538_v48 }
  0x4a   : > { %340 = vmatmul.bf16.vlgmr.msra.gmra.mxu1 %v538_v48 }
  0xc6   : > { %v327_v52 = vpop.f32.mrf.mxu0 }
  0xc7   : > { %v328_v53 = vadd.f32 %v327_v52, %v228_v50  ;;  %v341_v54 = vpop.f32.mrf.mxu1 }
  0xc8   : > { %v342_v55 = vadd.f32 %v341_v54, %v229_v51 }
  0xc9   : > { %346 = vst [vmem:[%s200_s8] sm:$0xff] %v328_v53 }
  0xca   : > { %347 = vst [vmem:[%s200_s8 + $0x8] sm:$0xff] %v342_v55 }
  0xce   : > { %v329_v56 = vpop.f32.mrf.mxu0  ;;  %356 = sbr.rel (!%p732_p9) target bundleno = 219 (0xdb), region = 40 }
  0xcf   : > { %v330_v57 = vadd.f32 %v329_v56, %v228_v50  ;;  %v343_v58 = vpop.f32.mrf.mxu1 }
  0xd0   : > { %v344_v59 = vadd.f32 %v343_v58, %v229_v51  ;;  %v372_v60 = vld [vmem:[%s200_s8] sm:$0xff] (%p732_p9) }
  0xd1   : > { %348 = vst [vmem:[%s200_s8 + $0x10] sm:$0xff] %v330_v57  ;;  %v374_v61 = vld [vmem:[%s200_s8 + $0x8] sm:$0xff] (%p732_p9) }
  0xd2   : > { %349 = vst [vmem:[%s200_s8 + $0x18] sm:$0xff] %v344_v59 }
  0xd3   : > { %373 = vst [vmem:[%s359_s12] sm:$0xff] %v372_v60 }
  0xd4   : > { %375 = vst [vmem:[%s359_s12 + $0x8] sm:$0xff] %v374_v61 }
  0xd8   : > { %v376_v62 = vld [vmem:[%s200_s8 + $0x10] sm:$0xff] }
  0xd9   : > { %v378_v63 = vld [vmem:[%s200_s8 + $0x18] sm:$0xff]  ;;  %377 = vst [vmem:[%s359_s12 + $0x20] sm:$0xff] %v376_v62 }
  0xda   : > { %379 = vst [vmem:[%s359_s12 + $0x28] sm:$0xff] %v378_v63 }
  0xdb PF: > { %p13_p9 = scmp.ge.s32.totalorder %s709_s17, 4   ;;  %s837_s12 = smov %s654_s13 }
  0xdc   : > { %s838_s13 = smov %s658_s14  ;;  %s839_s14 = smov %s719_s20 }
  0xdd   : > { %s840_s15 = smov %s709_s17  ;;  %15 = sbr.rel (!%p13_p9) target bundleno = 3 (0x3), region = 98 }
  0xe2   :  { %395 = vsyncpa [#allocation3], 1 }
  0xe3   :  { %397 = vsyncpa [#allocation3 + $0x1], 1 }

// kernel: forward.3
= control target key start
LH: loop header
LB: loop body
LE: loop exit
PB: predicated region body
PF: predicated region fallthrough
CT: control target
= control target key end

     0   :  { %s3067_s0 = inlined_call_operand.vmem [shape: f32[2,8,128], index: 0, kind: input, shape index: {}]   ;;  %s3068_s1 = inlined_call_operand.vmem [shape: f32[2,1,8], index: 1, kind: input, shape index: {}]   ;;  %s3069_s2 = inlined_call_operand.hbm [shape: bf16[2,128,384], index: 2, kind: input, shape index: {}]   ;;  %s3070_s3 = inlined_call_operand.vmem [shape: f32[2,1,384], index: 3, kind: input, shape index: {}]   ;;  %s3071_s4 = inlined_call_operand.vmem [shape: bf16[2,128,128], index: 4, kind: input, shape index: {}]   ;;  %s3072_s5 = inlined_call_operand.vmem [shape: f32[2,1,128], index: 5, kind: input, shape index: {}]   ;;  %s3073_s6 = inlined_call_operand.vmem [shape: f32[2,1,128], index: 6, kind: input, shape index: {}]   ;;  %s3074_s7 = inlined_call_operand.vmem [shape: f32[2,1,128], index: 7, kind: input, shape index: {}]   ;;  %s3075_s8 = inlined_call_operand.vmem [shape: bf16[2,128,256], index: 8, kind: input, shape index: {}]   ;;  %s3076_s9 = inlined_call_operand.vmem [shape: f32[2,1,256], index: 9, kind: input, shape index: {}]   ;;  %s3077_s10 = inlined_call_operand.hbm [shape: bf16[2,256,128], index: 10, kind: input, shape index: {}]   ;;  %s3078_s11 = inlined_call_operand.vmem [shape: f32[2,1,128], index: 11, kind: input, shape index: {}]   ;;  %s3079_s12 = inlined_call_operand.vmem [shape: f32[2,1,128], index: 12, kind: input, shape index: {}]   ;;  %s3080_s13 = inlined_call_operand.vmem [shape: f32[2,1,128], index: 13, kind: input, shape index: {}]   ;;  %s3081_s14 = inlined_call_operand.vmem [shape: f32[1,128], index: 14, kind: input, shape index: {}]   ;;  %s3082_s15 = inlined_call_operand.vmem [shape: f32[1,128], index: 15, kind: input, shape index: {}]   ;;  %s3083_s16 = inlined_call_operand.vmem [shape: bf16[2,8,128], index: 16, kind: output, shape index: {}]  }
   0x1   :  { %3091 = sst [smem:[#allocation19_spill]] %s3067_s0 }
   0x2   :  { %3092 = sst [smem:[#allocation20_spill]] %s3069_s2 }
   0x3   :  { %3093 = sst [smem:[#allocation21_spill]] %s3070_s3 }
   0x4   :  { %3094 = sst [smem:[#allocation22_spill]] %s3071_s4 }
   0x5   :  { %3095 = sst [smem:[#allocation23_spill]] %s3072_s5 }
   0x6   :  { %3096 = sst [smem:[#allocation24_spill]] %s3073_s6 }
   0x7   :  { %3097 = sst [smem:[#allocation25_spill]] %s3074_s7 }
   0x8   :  { %3098 = sst [smem:[#allocation26_spill]] %s3075_s8 }
   0x9   :  { %3099 = sst [smem:[#allocation27_spill]] %s3076_s9 }
   0xa   :  { %3100 = sst [smem:[#allocation28_spill]] %s3077_s10 }
   0xb   :  { %3101 = sst [smem:[#allocation29_spill]] %s3078_s11 }
   0xc   :  { %3102 = sst [smem:[#allocation30_spill]] %s3079_s12 }
   0xd   :  { %3103 = sst [smem:[#allocation31_spill]] %s3080_s13 }
   0xe   :  { %3104 = sst [smem:[#allocation32_spill]] %s3081_s14 }
   0xf   :  { %3105 = sst [smem:[#allocation33_spill]] %s3082_s15 }
  0x10   :  { %3106 = sst [smem:[#allocation34_spill]] %s3083_s16 }
  0x11   :  { %21 = vsyncpa [#allocation5], 0 }
  0x12   :  { %23 = vsyncpa [#allocation5 + $0x1], 0 }
  0x13   :  { %24 = vsyncpa [#allocation7], 0 }
  0x14   :  { %26 = vsyncpa [#allocation7 + $0x1], 0  ;;  %s2665_s21 = smov 0   ;;  %s2667_s22 = smov 0  }
  0x15   :  { %s2669_s23 = smov 0   ;;  %s2671_s24 = smov 0  }
  0x16   :  { %s2673_s25 = smov 0   ;;  %s2675_s26 = smov 0  }
  0x17   :  { %s2677_s27 = smov 0   ;;  %s2679_s28 = smov 0  }
  0x18 LB: > { %3107 = sst [smem:[#allocation10_spill]] %s2546_s22  ;;  %s1967_s29 = sadd.s32 4294967295, %s2570_s28   ;;  %s2570_s28 = sphi %s2679_s28, %s32_s28   ;;  %s2566_s27 = sphi %s2677_s27, %s3152_s27   ;;  %s2562_s26 = sphi %s2675_s26, %s3151_s26   ;;  %s2558_s25 = sphi %s2673_s25, %s3150_s25   ;;  %s2554_s24 = sphi %s2671_s24, %s3149_s24   ;;  %s2550_s23 = sphi %s2669_s23, %s3148_s23   ;;  %s2546_s22 = sphi %s2667_s22, %s3147_s22   ;;  %s2542_s21 = sphi %s2665_s21, %s3146_s21  }
  0x19   : > { %3108 = sst [smem:[#allocation11_spill]] %s2550_s23  ;;  %s41_s30 = sadd.s32 1, %s2562_s26 }
  0x1a   : > { %3109 = sst [smem:[#allocation12_spill]] %s2562_s26  ;;  %p42_p0 = scmp.ge.s32.totalorder %s41_s30, 2 }
  0x1b   : > { %3110 = sst [smem:[#allocation13_spill]] %s2566_s27  ;;  %s44_s0 = sadd.s32 1, %s2566_s27 }
  0x1c   : > { %3111 = sst [smem:[#allocation14_spill]] %s2570_s28  ;;  %s103_s17 = sadd.s32 1, %s2550_s23 }
  0x1d   : > { %p110_p1 = scmp.ne.s32.totalorder %s2550_s23, %s2546_s22  ;;  %s3154_s30 = smov (%p42_p0, %s41_s30), 0 }
  0x1e   : > { %3112 = sst [smem:[#allocation15_spill]] %s3154_s30  ;;  %s3156_s0 = smov (!%p42_p0, %s44_s0), %s2566_s27 }
  0x1f   : > { %s100_s18 = ssub.s32 %s2562_s26, %s3154_s30  ;;  %p111_p2 = scmp.eq.s32.totalorder %s2570_s28, 0 }
  0x20   : > { %p46_p3 = scmp.ge.s32.totalorder %s3156_s0, 2  ;;  %p101_p4 = scmp.eq.s32.totalorder %s100_s18, 0 }
  0x21   : > { %p112_p5 = por %p111_p2, %p110_p1  ;;  %p116_p6 = scmp.ne.s32.totalorder %s2546_s22, %s2542_s21 }
  0x22   : > { %s3158_s0 = smov (%p46_p3, %s3156_s0), 0  ;;  %p117_p7 = scmp.eq.s32.totalorder %s1967_s29, 0 }
  0x23   : > { %3113 = sst [smem:[#allocation16_spill]] %s3158_s0  ;;  %p2334_p8 = scmp.lt.s32.totalorder %s2570_s28, 4 }
  0x24   : > { %s2719_s19 = scalar_select %p101_p4, %s2550_s23, %s103_s17  }
  0x25   : > { %s2723_s20 = sand.u32 1, %s2550_s23   ;;  %p2725_p9 = por %p117_p7, %p116_p6 }
  0x26   : > { %3114 = sst [smem:[#allocation17_spill]] %s2719_s19  ;;  %s2319_s18 = smul.u32 192, %s2723_s20 }
  0x27   : > { %p2730_p10 = pnand %p2334_p8, %p112_p5  ;;  %s2320_s29 = smul.u32 192, %s2562_s26 }
  0x28   : > { %s3117_s2 = sld [smem:[#allocation20_spill]]  ;;  %s517_s19 = scalar_lea.vmem [#allocation4], %s2319_s18 }
  0x29   : > { %s525_s23 = sshll.u32 %s517_s19, 4  ;;  %s514_s14 = scalar_lea.sflag [#allocation5], %s2723_s20  ;;  %s526_s23 = int_to_ptr.vmem [resolvable:$true] %s525_s23 }
  0x2a   : > { %s2572_s16 = smov 192   ;;  %s2573_s13 = smov 12  }
  0x2b   : > { %p1975_p11 = scmp.ge.s32.totalorder %s2570_s28, 1  ;;  %p621_p12 = scmp.lt.s32.totalorder %s2570_s28, 5 }
  0x2c   : > { %s1972_s12 = sshll.u32 %s2723_s20, 7  ;;  %s2252_s11 = sshll.u32 %s2562_s26, 7 }
  0x2d   : > { %p622_p13 = pnand %p1975_p11, %p621_p12  ;;  %s587_s9 = scalar_lea.vmem [#allocation6], %s1972_s12 }
  0x2e   : > { %s522_s30 = scalar_lea.hbm %s3117_s2, %s2320_s29  ;;  %s595_s0 = sshll.u32 %s587_s9, 4  ;;  %s596_s0 = int_to_ptr.vmem [resolvable:$true] %s595_s0 }
  0x2f   : > { %s523_s15 = sshll.u32 %s522_s30, 4  ;;  %s3118_s10 = sld [smem:[#allocation28_spill]]  ;;  %s524_s15 = int_to_ptr.hbm [resolvable:$true] %s523_s15 }
  0x30   : > { %2330 = dma.hbm_to_vmem [thread:$0]  (!%p2730_p10), %s524_s15, 3072, %s526_s23, %s514_s14, %s2572_s16, %s2572_s16, %s2573_s13  }
  0x31   : > { %s584_s17 = scalar_lea.sflag [#allocation7], %s2723_s20  ;;  %s2574_s2 = smov 64  }
  0x32   : > { %s2575_s8 = smov 4  }
  0x33   : > { %625 = sbr.rel (%p622_p13) target bundleno = 2550 (0x9f6), region = 84 }
  0x35   : > { %s592_s30 = scalar_lea.hbm %s3118_s10, %s2252_s11 }
  0x36   : > { %s593_s19 = sshll.u32 %s592_s30, 4  ;;  %s594_s19 = int_to_ptr.hbm [resolvable:$true] %s593_s19 }
  0x37   : > { %2333 = dma.hbm_to_vmem [thread:$0]  (!%p2730_p10), %s594_s19, 2048, %s596_s0, %s584_s17, %s2574_s2, %s2574_s2, %s2575_s8  }
  0x38   : > { %s627_s13 = sand.u32 1, %s2546_s22  }
  0x39   : > { %s2321_s14 = smul.u32 192, %s627_s13  ;;  %s628_s15 = scalar_lea.sflag [#allocation5], %s627_s13 }
  0x3b   : > { %s2752_s12 = scalar_lea.vmem [#allocation4], %s2321_s14 }
  0x3c   : > { %2533 = dma.done.wait (%p2725_p9), %s628_s15, 3072  }
  0x3d   : > { %2535 = vsyncadd (%p2725_p9), %s628_s15, 4294964224  ;;  %s1976_s9 = sshll.u32 %s627_s13, 7  ;;  %s638_s11 = scalar_lea.sflag [#allocation7], %s627_s13 }
  0x3e   : > { %s2758_s16 = scalar_lea.vmem [#allocation6], %s1976_s9 }
  0x3f   : > { %3119 = sst [smem:[#allocation18_spill]] %s2758_s16 }
  0x40   : > { %2537 = dma.done.wait (%p2725_p9), %s638_s11, 2048  }
  0x41   : > { %2539 = vsyncadd (%p2725_p9), %s638_s11, 4294965248  ;;  %p738_p0 = scmp.lt.s32.totalorder %s2558_s25, 1  ;;  %p745_p1 = scmp.lt.s32.totalorder %s2554_s24, 1 }
  0x42   : > { %s3120_s29 = sld [smem:[#allocation19_spill]]  ;;  %p1984_p2 = scmp.ne.s32.totalorder %s2554_s24, 0 }
  0x43   : > { %s3160_s25 = smov (!%p738_p0, %s2558_s25), 1  ;;  %s3122_s3 = sld [smem:[#allocation21_spill]] }
  0x44   : > { %s2770_s2 = scalar_select %p745_p1, %s2554_s24, 1 }
  0x45   : > { %s1977_s8 = sshll.u32 %s3160_s25, 3  ;;  %s3123_s4 = sld [smem:[#allocation22_spill]] }
  0x46   : > { %s2322_s30 = smul.u32 3, %s2770_s2  ;;  %s2253_s19 = sshll.u32 %s2770_s2, 6 }
  0x47   : > { %s2254_s17 = sshll.u32 %s2770_s2, 7  ;;  %s1982_s13 = sshll.u32 %s2770_s2, 1 }
  0x48   : > { %s741_s18 = scalar_lea.vmem %s3120_s29, %s1977_s8  ;;  %s3126_s15 = sld [smem:[#allocation26_spill]] }
  0x49   : > { %s2789_s11 = scalar_lea.vmem %s3122_s3, %s2322_s30  ;;  %s3127_s10 = sld [smem:[#allocation27_spill]] }
  0x4a   : > { %s3128_s20 = sld [smem:[#allocation29_spill]]  ;;  %s1983_s22 = sshll.u32 %s3160_s25, 2 }
  0x4b   : > { %s2794_s27 = scalar_lea.vmem %s3123_s4, %s2253_s19  ;;  %s3129_s0 = sld [smem:[#allocation30_spill]] }
  0x4c   : > { %s3130_s6 = sld [smem:[#allocation31_spill]] }
  0x4e   : > { %s2809_s30 = scalar_lea.vmem %s3126_s15, %s2254_s17  ;;  %s3131_s15 = sld [smem:[#allocation34_spill]] }
  0x4f   : > { %s2814_s19 = scalar_lea.vmem %s3127_s10, %s1982_s13 }
  0x50   : > { %s774_s21 = scalar_lea.vmem %s3128_s20, %s2770_s2  ;;  %789 = sbr.rel (%p1984_p2) target bundleno = 87 (0x57), region = 96 }
  0x51   : > { %s777_s29 = scalar_lea.vmem %s3129_s0, %s2770_s2 }
  0x52   : > { %s780_s16 = scalar_lea.vmem %s3130_s6, %s2770_s2 }
  0x54   : > { %s2832_s5 = scalar_lea.vmem %s3131_s15, %s1983_s22 }
  0x55   : > { %v790_v0 = vld [vmem:[%s741_s18] sm:$0xff] }
  0x56   : > { %791 = vst [vmem:[#allocation2] sm:$0xff] %v790_v0 }
  0x57 PF: > { %v2071_v1 = vld [vmem:[%s2752_s12 + $0xa8] sm:$0xf]  ;;  %v2277_v2 = vld [vmem:[%s2752_s12 + $0xb0] sm:$0xf0]  ;;  %v2276_v3 = vld [vmem:[%s2752_s12 + $0xac] sm:$0xf]  ;;  %s3132_s28 = scalar_lea.vmem %s3068_s1, %s3160_s25 }
  0x58   : > { %v2072_v4 = vor.u32 %v2277_v2, %v2071_v1  ;;  %v2073_v5 = vld [vmem:[%s2752_s12 + $0xb4] sm:$0xf0]  ;;  %v2059_v6 = vld [vmem:[%s2752_s12 + $0x90] sm:$0xf]  ;;  %v2274_v7 = vld [vmem:[%s2752_s12 + $0x98] sm:$0xf0] }
  0x59   : > { %v2076_v8 = vor.u32 %v2276_v3, %v2073_v5  ;;  %v2273_v9 = vld [vmem:[%s2752_s12 + $0x94] sm:$0xf]  ;;  %v2061_v10 = vld [vmem:[%s2752_s12 + $0x9c] sm:$0xf0]  ;;  %v2060_v11 = vor.u32 %v2274_v7, %v2059_v6  ;;  %v2047_v13 = vld [vmem:[%s2752_s12 + $0x78] sm:$0xf] }
  0x5a   : > { %963 = vmatpush.bf16.msra.mxu0 %v2072_v4  ;;  %v2064_v12 = vor.u32 %v2273_v9, %v2061_v10  ;;  %v2271_v14 = vld [vmem:[%s2752_s12 + $0x80] sm:$0xf0]  ;;  %v2270_v15 = vld [vmem:[%s2752_s12 + $0x7c] sm:$0xf]  ;;  %v2049_v16 = vld [vmem:[%s2752_s12 + $0x84] sm:$0xf0] }
  0x5b   : > { %976 = vmatpush.bf16.msra.mxu1 %v2076_v8  ;;  %v2048_v17 = vor.u32 %v2271_v14, %v2047_v13  ;;  %v2052_v18 = vor.u32 %v2270_v15, %v2049_v16  ;;  %v2035_v19 = vld [vmem:[%s2752_s12 + $0x60] sm:$0xf]  ;;  %v2268_v20 = vld [vmem:[%s2752_s12 + $0x68] sm:$0xf0]  ;;  %v2267_v21 = vld [vmem:[%s2752_s12 + $0x64] sm:$0xf] }
  0x5c   : > { %v2037_v22 = vld [vmem:[%s2752_s12 + $0x6c] sm:$0xf0]  ;;  %v2036_v23 = vor.u32 %v2268_v20, %v2035_v19  ;;  %v2278_v25 = vld [vmem:[%s2752_s12 + $0xb8] sm:$0xf0]  ;;  %v2067_v26 = vld [vmem:[%s2752_s12 + $0x98] sm:$0xf] }
  0x5d   : > { %v2079_v24 = vld [vmem:[%s2752_s12 + $0xb0] sm:$0xf]  ;;  %v2040_v27 = vor.u32 %v2267_v21, %v2037_v22  ;;  %v2023_v28 = vld [vmem:[%s2752_s12 + $0x48] sm:$0xf]  ;;  %v2265_v29 = vld [vmem:[%s2752_s12 + $0x50] sm:$0xf0] }
  0x5e   : > { %964 = vmatpush.bf16.msra.mxu0 %v2060_v11  ;;  %v2080_v30 = vor.u32 %v2278_v25, %v2079_v24  ;;  %v2275_v31 = vld [vmem:[%s2752_s12 + $0xa0] sm:$0xf0]  ;;  %v2264_v32 = vld [vmem:[%s2752_s12 + $0x4c] sm:$0xf]  ;;  %v2025_v33 = vld [vmem:[%s2752_s12 + $0x54] sm:$0xf0]  ;;  %v2024_v35 = vor.u32 %v2265_v29, %v2023_v28 }
  0x5f   : > { %977 = vmatpush.bf16.msra.mxu1 %v2064_v12  ;;  %v2068_v34 = vor.u32 %v2275_v31, %v2067_v26  ;;  %v2011_v36 = vld [vmem:[%s2752_s12 + $0x30] sm:$0xf]  ;;  %v2055_v37 = vld [vmem:[%s2752_s12 + $0x80] sm:$0xf]  ;;  %v2272_v38 = vld [vmem:[%s2752_s12 + $0x88] sm:$0xf0]  ;;  %v2028_v39 = vor.u32 %v2264_v32, %v2025_v33 }
  0x60   : > { %989 = vmatpush.bf16.msra.mxu2 %v2080_v30  ;;  %v2262_v40 = vld [vmem:[%s2752_s12 + $0x38] sm:$0xf0]  ;;  %v2261_v41 = vld [vmem:[%s2752_s12 + $0x34] sm:$0xf]  ;;  %v2013_v42 = vld [vmem:[%s2752_s12 + $0x3c] sm:$0xf0]  ;;  %v2056_v43 = vor.u32 %v2272_v38, %v2055_v37 }
  0x61   : > { %v2012_v44 = vor.u32 %v2262_v40, %v2011_v36  ;;  %v2043_v45 = vld [vmem:[%s2752_s12 + $0x68] sm:$0xf]  ;;  %v2269_v46 = vld [vmem:[%s2752_s12 + $0x70] sm:$0xf0]  ;;  %v2016_v47 = vor.u32 %v2261_v41, %v2013_v42  ;;  %v1999_v48 = vld [vmem:[%s2752_s12 + $0x18] sm:$0xf] }
  0x62   : > { %965 = vmatpush.bf16.msra.mxu0 %v2048_v17  ;;  %v2259_v49 = vld [vmem:[%s2752_s12 + $0x20] sm:$0xf0]  ;;  %v2258_v50 = vld [vmem:[%s2752_s12 + $0x1c] sm:$0xf]  ;;  %v2001_v51 = vld [vmem:[%s2752_s12 + $0x24] sm:$0xf0]  ;;  %v2044_v52 = vor.u32 %v2269_v46, %v2043_v45 }
  0x63   : > { %978 = vmatpush.bf16.msra.mxu1 %v2052_v18  ;;  %v2000_v53 = vor.u32 %v2259_v49, %v1999_v48  ;;  %v2031_v54 = vld [vmem:[%s2752_s12 + $0x50] sm:$0xf]  ;;  %v2266_v55 = vld [vmem:[%s2752_s12 + $0x58] sm:$0xf0]  ;;  %v2004_v56 = vor.u32 %v2258_v50, %v2001_v51  ;;  %v1987_v57 = vld [vmem:[%s2752_s12] sm:$0xf] }
  0x64   : > { %990 = vmatpush.bf16.msra.mxu2 %v2068_v34  ;;  %v2256_v58 = vld [vmem:[%s2752_s12 + $0x8] sm:$0xf0]  ;;  %v2255_v59 = vld [vmem:[%s2752_s12 + $0x4] sm:$0xf]  ;;  %v1989_v60 = vld [vmem:[%s2752_s12 + $0xc] sm:$0xf0]  ;;  %v2032_v61 = vor.u32 %v2266_v55, %v2031_v54 }
  0x65   : > { %v1988_v62 = vor.u32 %v2256_v58, %v1987_v57  ;;  %v2877_v63 = vld [vmem:[#allocation2] sm:$0xff]  ;;  %v2019_v0 = vld [vmem:[%s2752_s12 + $0x38] sm:$0xf]  ;;  %v2263_v1 = vld [vmem:[%s2752_s12 + $0x40] sm:$0xf0]  ;;  %v1992_v2 = vor.u32 %v2255_v59, %v1989_v60  ;;  %vm1006_vm0 = vcmask 261120  }
  0x66   : > { %966 = vmatpush.bf16.msra.mxu0 %v2036_v23  ;;  %v793_v3 = vpack.c.bf16 %v2877_v63, %v2877_v63  ;;  %v2020_v4 = vor.u32 %v2263_v1, %v2019_v0  ;;  %v2007_v5 = vld [vmem:[%s2752_s12 + $0x20] sm:$0xf]  ;;  %v2260_v6 = vld [vmem:[%s2752_s12 + $0x28] sm:$0xf0]  ;;  %v1995_v8 = vld [vmem:[%s2752_s12 + $0x8] sm:$0xf] }
  0x67   : > { %979 = vmatpush.bf16.msra.mxu1 %v2040_v27  ;;  %v2008_v7 = vor.u32 %v2260_v6, %v2007_v5  ;;  %v2257_v9 = vld [vmem:[%s2752_s12 + $0x10] sm:$0xf0]  ;;  %v827_v11 = vld [vmem:[%s2789_s11] sm:$0x7]  ;;  %s2576_s3 = smov 96   ;;  %s2577_s4 = smov 64  }
  0x68   : > { %991 = vmatpush.bf16.msra.mxu2 %v2056_v43  ;;  %v1996_v10 = vor.u32 %v2257_v9, %v1995_v8  ;;  %v829_v12 = vperm.slane %v827_v11, 0  ;;  %v830_v13 = vperm.slane %v827_v11, 1  ;;  %s2578_s6 = smov 32   ;;  %v831_v25 = vperm.slane %v827_v11, 2  ;;  %v2407_v37 = vld [vmem:[%s3132_s28] ss:$0 sm:$0xff] }
  0x69   : > { %vm1047_vm1 = vcmask 1043456   ;;  %vm1031_vm2 = vcmask 64512   ;;  %vm1133_vm3 = vcmask 523520   ;;  %vm1198_vm4 = vcmask 785920   ;;  %s3133_s18 = sld [smem:[#allocation23_spill]]  ;;  %p2249_p3 = scmp.ne.s32.totalorder %s2554_s24, 1 }
  0x6a   : > { %967 = vmatpush.bf16.msra.mxu0 %v2024_v35  ;;  %vm1263_vm5 = vcmask 1048320   ;;  %s3138_s20 = sld [smem:[#allocation25_spill]] }
  0x6b   : > { %980 = vmatpush.bf16.msra.mxu1 %v2028_v39  ;;  %s3144_s26 = sld [smem:[#allocation33_spill]] (!%p2249_p3) }
  0x6c   : > { %992 = vmatpush.bf16.msra.mxu2 %v2044_v52 }
  0x6e   : > { %968 = vmatpush.bf16.msra.mxu0 %v2012_v44 }
  0x6f   : > { %981 = vmatpush.bf16.msra.mxu1 %v2016_v47  ;;  %s3134_s11 = scalar_lea.vmem %s3133_s18, %s2770_s2 }
  0x70   : > { %993 = vmatpush.bf16.msra.mxu2 %v2032_v61  ;;  %s3139_s0 = scalar_lea.vmem %s3138_s20, %s2770_s2 }
  0x72   : > { %969 = vmatpush.bf16.msra.mxu0 %v2000_v53 }
  0x73   : > { %982 = vmatpush.bf16.msra.mxu1 %v2004_v56 }
  0x74   : > { %994 = vmatpush.bf16.msra.mxu2 %v2020_v4 }
  0x76   : > { %970 = vmatpush.bf16.msra.mxu0 %v1988_v62 }
  0x77   : > { %983 = vmatpush.bf16.msra.mxu1 %v1992_v2 }
  0x78   : > { %995 = vmatpush.bf16.msra.mxu2 %v2008_v7 }
  0x79   : > { %971 = vmatmul.bf16.vlgmr.msra.gmra.mxu0 %v793_v3 }
  0x7a   : > { %984 = vmatmul.bf16.vlgmr.msra.gmra.mxu1 %v793_v3 }
  0x7c   : > { %996 = vmatpush.bf16.msra.mxu2 %v1996_v10 }
  0x7f   : > { %997 = vmatmul.bf16.vlgmr.msra.gmra.mxu2 %v793_v3 }
  0xf6   : > { %v972_v14 = vpop.f32.mrf.mxu0 }
  0xf7   : > { %v973_v15 = vadd.f32 %v972_v14, %v829_v12  ;;  %v985_v16 = vpop.f32.mrf.mxu1 }
  0xf8   : > { %v986_v17 = vadd.f32 %v985_v16, %v830_v13 }
  0xfa   : > { %v1002_v18 = vpack.c.bf16 %v986_v17, %v973_v15 }
  0xfc   : > { %1065 = vrot.lane.b32.xlu1 %v1002_v18, %s2576_s3  ;;  %v1005_v19 = vrot.slane %v1002_v18, 4  ;;  %v1068_v20 = vunpack.c.l.b16 %v1002_v18 }
  0xfe   : > { %v974_v21 = vpop.f32.mrf.mxu0  ;;  %v1011_v22 = vsel %vm1006_vm0, %v1005_v19, 0  ;;  %v1069_v23 = vpack.c.b16 %v1068_v20, %v1068_v20 }
  0xff   : > { %v987_v24 = vpop.f32.mrf.mxu1  ;;  %1020 = vmatpush.bf16.xpose.msra.mxu3 %v1011_v22 }
 0x100   : > { %1070 = vrot.lane.b32.xlu2 %v1069_v23, %s2576_s3 }
 0x102   : > { %v998_v26 = vpop.f32.mrf.mxu2 }
 0x103   : > { %v999_v27 = vadd.f32 %v998_v26, %v831_v25 }
 0x104   : > { %1135 = vrot.lane.b32.xlu1 %v1002_v18, %s2577_s4 }
 0x105   : > { %v2895_v28 = vpack.c.bf16 %v999_v27, %v999_v27 }
 0x106   : > { %2081 = vmatmul.msk.bf16.vlgmr.msra.gmra.mxu3 %vm1006_vm0, %v1002_v18 }
 0x107   : > { %v1049_v30 = vsel %vm1047_vm1, %v2895_v28, 0  ;;  %v1106_v12 = vunpack.c.l.b16 %v2895_v28 }
 0x108   : > { %1200 = vrot.lane.b32.xlu2 %v1002_v18, %s2578_s6  ;;  %1058 = vmatpush.bf16.msrb.mxu3 %v1049_v30 }
 0x109   : > { %v1107_v13 = vpack.c.b16 %v1106_v12, %v1106_v12 }
 0x10a   : > { %v1000_v29 = vpop.f32.mrf.mxu2 }
 0x10c   : > { %1203 = vrot.lane.b32.xlu1 %v1069_v23, %s2578_s6 }
 0x15a   : > { %v1071_v48 = vpop.permute.xlu2 %1070 }
 0x162   : > { %v1201_v50 = vpop.permute.xlu2 %1200 }
 0x163   : > { %v1202_v52 = vrot.slane %v1201_v50, 4 }
 0x165   : > { %v1209_v55 = vsel %vm1006_vm0, %v1202_v52, 0 }
 0x16e   : > { %v1066_v31 = vpop.permute.xlu1 %1065 }
 0x16f   : > { %v1067_v32 = vrot.slane %v1066_v31, 4 }
 0x171   : > { %v1076_v33 = vsel %vm1006_vm0, %v1067_v32, 0 }
 0x172   : > { %1085 = vmatpush.bf16.xpose.msra.mxu3 %v1076_v33 }
 0x176   : > { %v1136_v34 = vpop.permute.xlu1 %1135 }
 0x177   : > { %v1137_v35 = vrot.slane %v1136_v34, 4 }
 0x179   : > { %v1144_v36 = vsel %vm1006_vm0, %v1137_v35, 0 }
 0x17a   : > { %1153 = vmatpush.bf16.xpose.msrb.mxu2 %v1144_v36 }
 0x17e   : > { %v1204_v57 = vpop.permute.xlu1 %1203 }
 0x189   : > { %v1022_v38 = vpop.f32.mrf.mxu3 }
 0x18a   : > { %v1026_v39 = vmul.f32 0.17677669, %v1022_v38 }
 0x18c   : > { %v1030_v40 = vadd.f32 %v2407_v37, %v1026_v39 }
 0x18e   : > { %v1032_v41 = vsel %vm1031_vm2, %v1030_v40, -inf }
 0x18f   : > { %1033 = vmax.xlane.f32.xlu0 %v1032_v41 }
 0x191   : > { %v1024_v42 = vpop.f32.mrf.mxu3 }
 0x202   : > { %v1034_v43 = vpop.xlane.xlu0 %1033 }
 0x203   : > { %v1035_v44 = vsub.f32 %v1030_v40, %v1034_v43 }
 0x205   : > { %v1036_v45 = vmul.f32 1.442695, %v1035_v44 }
 0x207   : > { %2414 = vpow2.f32 %v1036_v45 }
 0x20d   : > { %v2415_v46 = vpop.eup %2414 }
 0x20e   : > { %v1038_v47 = vsel %vm1031_vm2, %v2415_v46, 0.0 }
 0x20f   : > { %1039 = vadd.xlane.f32.xlu0 %v1038_v47 }
 0x223   : > { %1138 = vrot.lane.b32.xlu0 %v1069_v23, %s2577_s4 }
 0x282   : > { %v1040_v49 = vpop.xlane.xlu0 %1039 }
 0x283   : > { %2416 = vrcp.f32 %v1040_v49 }
 0x289   : > { %v2417_v51 = vpop.eup %2416 }
 0x28a   : > { %v1042_v53 = vmul.f32 %v2417_v51, %v2415_v46 }
 0x28c   : > { %v1043_v54 = vpack.c.bf16 %v1042_v53, %v1042_v53  ;;  %v2286_v53 = vld [vmem:[%s2794_s27 + $0x38] sm:$0xff] }
 0x28d   : > { %1335 = vmatpush.bf16.msrb.mxu1 %v2286_v53 }
 0x28e   : > { %2082 = vmatmul.msk.bf16.vlgmr.msrb.gmra.mxu3 %vm1031_vm2, %v1043_v54  ;;  %v2285_v54 = vld [vmem:[%s2794_s27 + $0x30] sm:$0xff] }
 0x28f   : > { %1218 = vmatpush.bf16.xpose.msrb.mxu3 %v1209_v55  ;;  %v2284_v55 = vld [vmem:[%s2794_s27 + $0x28] sm:$0xff] }
 0x291   : > { %1336 = vmatpush.bf16.msrb.mxu1 %v2285_v54  ;;  %v2131_v54 = vld [vmem:[%s2809_s30 + $0x10] sm:$0xf] }
 0x295   : > { %v1139_v56 = vpop.permute.xlu0 %1138  ;;  %1337 = vmatpush.bf16.msrb.mxu1 %v2284_v55  ;;  %v2290_v55 = vld [vmem:[%s2809_s30 + $0x14] sm:$0xf0] }
 0x296   : > { %2085 = vmatmul.msk.bf16.vlgmr.msrb.gmra.mxu2 %vm1006_vm0, %v1139_v56  ;;  %v2283_v56 = vld [vmem:[%s2794_s27 + $0x20] sm:$0xff] }
 0x299   : > { %1338 = vmatpush.bf16.msrb.mxu1 %v2283_v56  ;;  %v2289_v56 = vld [vmem:[%s2809_s30 + $0x14] sm:$0xf] }
 0x29e   : > { %2083 = vmatmul.msk.bf16.vlgmr.msra.gmra.mxu3 %vm1006_vm0, %v1071_v48 }
 0x2ae   : > { %2087 = vmatmul.msk.bf16.vlgmr.msrb.gmra.mxu3 %vm1006_vm0, %v1204_v57  ;;  %v2282_v57 = vld [vmem:[%s2794_s27 + $0x18] sm:$0xff] }
 0x2af   : > { %1339 = vmatpush.bf16.msrb.mxu1 %v2282_v57  ;;  %v2132_v57 = vor.u32 %v2290_v55, %v2131_v54 }
 0x311   : > { %v1060_v58 = vpop.f32.mrf.mxu3 }
 0x312   : > { %1064 = vst.msk [vmem:[#allocation3] sm:$0xff] %vm1006_vm0, %v1060_v58  ;;  %v2281_v58 = vld [vmem:[%s2794_s27 + $0x10] sm:$0xff] }
 0x313   : > { %1340 = vmatpush.bf16.msrb.mxu1 %v2281_v58  ;;  %v2133_v58 = vld [vmem:[%s2809_s30 + $0x18] sm:$0xf0] }
 0x319   : > { %v1062_v59 = vpop.f32.mrf.mxu3  ;;  %v1155_v60 = vpop.f32.mrf.mxu2 }
 0x31a   : > { %v1159_v61 = vmul.f32 0.17677669, %v1155_v60 }
 0x31c   : > { %v1160_v62 = vadd.f32 %v2407_v37, %v1159_v61  ;;  %v2280_v61 = vld [vmem:[%s2794_s27 + $0x8] sm:$0xff] }
 0x31d   : > { %1341 = vmatpush.bf16.msrb.mxu1 %v2280_v61  ;;  %v2136_v61 = vor.u32 %v2289_v56, %v2133_v58 }
 0x31e   : > { %v1161_v0 = vsel %vm1031_vm2, %v1160_v62, -inf }
 0x31f   : > { %1162 = vmax.xlane.f32.xlu1 %v1161_v0 }
 0x321   : > { %v1087_v1 = vpop.f32.mrf.mxu3  ;;  %v1157_v2 = vpop.f32.mrf.mxu2 }
 0x322   : > { %v1091_v3 = vmul.f32 0.17677669, %v1087_v1 }
 0x324   : > { %v1092_v4 = vadd.f32 %v2407_v37, %v1091_v3  ;;  %v2408_v3 = vld [vmem:[%s3134_s11] ss:$0 sm:$0xff] }
 0x326   : > { %v1093_v5 = vsel %vm1031_vm2, %v1092_v4, -inf }
 0x327   : > { %1094 = vmax.xlane.f32.xlu2 %v1093_v5 }
 0x329   : > { %v1089_v6 = vpop.f32.mrf.mxu3 }
 0x331   : > { %v1220_v7 = vpop.f32.mrf.mxu3 }
 0x332   : > { %v1224_v8 = vmul.f32 0.17677669, %v1220_v7 }
 0x334   : > { %v1225_v9 = vadd.f32 %v2407_v37, %v1224_v8  ;;  %v2579_v8 = vmov 128.0  }
 0x336   : > { %v1226_v10 = vsel %vm1031_vm2, %v1225_v9, -inf }
 0x337   : > { %1227 = vmax.xlane.f32.xlu0 %v1226_v10  ;;  %v2302_v10 = vld [vmem:[%s2809_s30 + $0x74] sm:$0xf0] }
 0x339   : > { %v1222_v11 = vpop.f32.mrf.mxu3 }
 0x33a   : > { %v2301_v11 = vld [vmem:[%s2809_s30 + $0x74] sm:$0xf] }
 0x34b   : > { %1173 = vrot.lane.b32.xlu0 %v1107_v13, %s2577_s4 }
 0x392   : > { %v1163_v14 = vpop.xlane.xlu1 %1162 }
 0x393   : > { %v1164_v15 = vsub.f32 %v1160_v62, %v1163_v14  ;;  %v2279_v62 = vld [vmem:[%s2794_s27] sm:$0xff]  ;;  %s3135_s27 = sld [smem:[#allocation18_spill]] }
 0x394   : > { %1342 = vmatpush.bf16.msrb.mxu1 %v2279_v62  ;;  %v2287_v62 = vld [vmem:[%s2809_s30 + $0x4] sm:$0xf] }
 0x395   : > { %v1165_v16 = vmul.f32 1.442695, %v1164_v15 }
 0x397   : > { %2418 = vpow2.f32 %v1165_v16 }
 0x39a   : > { %v1095_v17 = vpop.xlane.xlu2 %1094 }
 0x39b   : > { %v1096_v18 = vsub.f32 %v1092_v4, %v1095_v17 }
 0x39d   : > { %v2419_v19 = vpop.eup %2418  ;;  %v1097_v20 = vmul.f32 1.442695, %v1096_v18 }
 0x39e   : > { %v1167_v21 = vsel %vm1031_vm2, %v2419_v19, 0.0 }
 0x39f   : > { %2420 = vpow2.f32 %v1097_v20  ;;  %1168 = vadd.xlane.f32.xlu1 %v1167_v21 }
 0x3a5   : > { %v2421_v22 = vpop.eup %2420 }
 0x3a6   : > { %v1099_v23 = vsel %vm1031_vm2, %v2421_v22, 0.0 }
 0x3a7   : > { %1100 = vadd.xlane.f32.xlu2 %v1099_v23 }
 0x3aa   : > { %v1228_v24 = vpop.xlane.xlu0 %1227 }
 0x3ab   : > { %v1229_v25 = vsub.f32 %v1225_v9, %v1228_v24  ;;  %v2179_v9 = vld [vmem:[%s2809_s30 + $0x70] sm:$0xf]  ;;  %v2171_v24 = vld [vmem:[%s2809_s30 + $0x60] sm:$0xf] }
 0x3ac   : > { %v2180_v12 = vor.u32 %v2302_v10, %v2179_v9  ;;  %v2308_v10 = vld [vmem:[%s3135_s27 + $0x28] sm:$0xff] }
 0x3ad   : > { %v1230_v26 = vmul.f32 1.442695, %v1229_v25  ;;  %v2300_v25 = vld [vmem:[%s2809_s30 + $0x64] sm:$0xf0] }
 0x3af   : > { %2422 = vpow2.f32 %v1230_v26  ;;  %v2299_v26 = vld [vmem:[%s2809_s30 + $0x64] sm:$0xf] }
 0x3b5   : > { %v2423_v27 = vpop.eup %2422 }
 0x3b6   : > { %v1232_v28 = vsel %vm1031_vm2, %v2423_v27, 0.0 }
 0x3b7   : > { %1233 = vadd.xlane.f32.xlu1 %v1232_v28  ;;  %v2173_v28 = vld [vmem:[%s2809_s30 + $0x68] sm:$0xf0] }
 0x3bd   : > { %v1174_v29 = vpop.permute.xlu0 %1173 }
 0x3be   : > { %v1179_v30 = vsel %vm1047_vm1, %v1174_v29, 0  ;;  %v2176_v29 = vor.u32 %v2299_v26, %v2173_v28  ;;  %v2410_v28 = vld [vmem:[%s3139_s0] ss:$0 sm:$0xff] }
 0x3bf   : > { %1108 = vrot.lane.b32.xlu2 %v1107_v13, %s2576_s3  ;;  %1188 = vmatpush.bf16.msra.mxu2 %v1179_v30  ;;  %v2163_v30 = vld [vmem:[%s2809_s30 + $0x50] sm:$0xf] }
 0x3c3   : > { %1489 = vmatpush.bf16.msrb.mxu2 %v2180_v12  ;;  %v2307_v12 = vld [vmem:[%s3135_s27 + $0x20] sm:$0xff] }
 0x3d0   : > { %1238 = vrot.lane.b32.xlu1 %v1107_v13, %s2578_s6  ;;  %v2181_v13 = vld [vmem:[%s2809_s30 + $0x78] sm:$0xf0] }
 0x3d1   : > { %v2184_v14 = vor.u32 %v2301_v11, %v2181_v13  ;;  %v2316_v11 = vld [vmem:[%s3135_s27 + $0x68] sm:$0xff]  ;;  %v2315_v13 = vld [vmem:[%s3135_s27 + $0x60] sm:$0xff] }
 0x3d3   : > { %1502 = vmatpush.bf16.msra.mxu3 %v2184_v14 }
 0x3d7   : > { %1503 = vmatpush.bf16.msra.mxu3 %v2176_v29 }
 0x412   : > { %v1169_v31 = vpop.xlane.xlu1 %1168 }
 0x413   : > { %2424 = vrcp.f32 %v1169_v31  ;;  %v2298_v31 = vld [vmem:[%s2809_s30 + $0x54] sm:$0xf0] }
 0x419   : > { %v2425_v32 = vpop.eup %2424 }
 0x41a   : > { %v1171_v33 = vmul.f32 %v2425_v32, %v2419_v19  ;;  %v1101_v34 = vpop.xlane.xlu2 %1100  ;;  %v2297_v32 = vld [vmem:[%s2809_s30 + $0x54] sm:$0xf] }
 0x41b   : > { %2426 = vrcp.f32 %v1101_v34  ;;  %v2165_v34 = vld [vmem:[%s2809_s30 + $0x58] sm:$0xf0] }
 0x41c   : > { %v1172_v35 = vpack.c.bf16 %v1171_v33, %v1171_v33  ;;  %v2164_v33 = vor.u32 %v2298_v31, %v2163_v30 }
 0x41e   : > { %2086 = vmatmul.msk.bf16.vlgmr.msra.gmra.mxu2 %vm1031_vm2, %v1172_v35  ;;  %v2168_v35 = vor.u32 %v2297_v32, %v2165_v34  ;;  %v2304_v32 = vld [vmem:[%s3135_s27 + $0x8] sm:$0xff]  ;;  %v2303_v34 = vld [vmem:[%s3135_s27] sm:$0xff] }
 0x420   : > { %1504 = vmatpush.bf16.msra.mxu3 %v2168_v35  ;;  %v2311_v35 = vld [vmem:[%s3135_s27 + $0x40] sm:$0xff] }
 0x421   : > { %v2427_v36 = vpop.eup %2426 }
 0x422   : > { %v1103_v37 = vmul.f32 %v2427_v36, %v2421_v22  ;;  %v1109_v38 = vpop.permute.xlu2 %1108  ;;  %v2155_v36 = vld [vmem:[%s2809_s30 + $0x40] sm:$0xf] }
 0x423   : > { %v1114_v39 = vsel %vm1047_vm1, %v1109_v38, 0  ;;  %v2295_v38 = vld [vmem:[%s2809_s30 + $0x44] sm:$0xf] }
 0x424   : > { %1123 = vmatpush.bf16.msrb.mxu0 %v1114_v39  ;;  %v1104_v40 = vpack.c.bf16 %v1103_v37, %v1103_v37  ;;  %v2296_v37 = vld [vmem:[%s2809_s30 + $0x44] sm:$0xf0] }
 0x425   : > { %v2156_v39 = vor.u32 %v2296_v37, %v2155_v36 }
 0x427   : > { %2084 = vmatmul.msk.bf16.vlgmr.msrb.gmra.mxu0 %vm1031_vm2, %v1104_v40  ;;  %v2157_v40 = vld [vmem:[%s2809_s30 + $0x48] sm:$0xf0] }
 0x42a   : > { %v1234_v41 = vpop.xlane.xlu1 %1233 }
 0x42b   : > { %2428 = vrcp.f32 %v1234_v41  ;;  %v2160_v41 = vor.u32 %v2295_v38, %v2157_v40 }
 0x42c   : > { %2430 = vrcp.f32 %v2579_v8  ;;  %v2317_v8 = vld [vmem:[%s3135_s27 + $0x70] sm:$0xff] }
 0x42d   : > { %1505 = vmatpush.bf16.msra.mxu3 %v2160_v41 }
 0x431   : > { %v2429_v42 = vpop.eup %2428 }
 0x432   : > { %v1236_v43 = vmul.f32 %v2429_v42, %v2423_v27  ;;  %v2431_v15 = vpop.eup %2430  ;;  %v2172_v27 = vor.u32 %v2300_v25, %v2171_v24  ;;  %v2147_v42 = vld [vmem:[%s2809_s30 + $0x30] sm:$0xf] }
 0x433   : > { %v1354_v16 = vmul.f32 128.0, %v2431_v15  ;;  %vm1358_vm6 = vweird.f32 %v2431_v15 }
 0x434   : > { %v1237_v46 = vpack.c.bf16 %v1236_v43, %v1236_v43  ;;  %1490 = vmatpush.bf16.msrb.mxu2 %v2172_v27  ;;  %v2294_v43 = vld [vmem:[%s2809_s30 + $0x34] sm:$0xf0] }
 0x435   : > { %v1355_v17 = vsub.f32 1.0, %v1354_v16  ;;  %v2306_v16 = vld [vmem:[%s3135_s27 + $0x18] sm:$0xff] }
 0x438   : > { %1491 = vmatpush.bf16.msrb.mxu2 %v2164_v33  ;;  %v2312_v33 = vld [vmem:[%s3135_s27 + $0x48] sm:$0xff] }
 0x43c   : > { %1492 = vmatpush.bf16.msrb.mxu2 %v2156_v39 }
 0x442   : > { %v1239_v44 = vpop.permute.xlu1 %1238 }
 0x443   : > { %v1244_v45 = vsel %vm1047_vm1, %v1239_v44, 0  ;;  %v2293_v44 = vld [vmem:[%s2809_s30 + $0x34] sm:$0xf] }
 0x444   : > { %1253 = vmatpush.bf16.msra.mxu0 %v1244_v45  ;;  %v2148_v45 = vor.u32 %v2294_v43, %v2147_v42 }
 0x446   : > { %1493 = vmatpush.bf16.msrb.mxu2 %v2148_v45 }
 0x447   : > { %2088 = vmatmul.msk.bf16.vlgmr.msra.gmra.mxu0 %vm1031_vm2, %v1237_v46  ;;  %v2149_v46 = vld [vmem:[%s2809_s30 + $0x38] sm:$0xf0] }
 0x4a1   : > { %v1190_v47 = vpop.f32.mrf.mxu2 }
 0x4a4   : > { %v1125_v48 = vpop.f32.mrf.mxu0 }
 0x4a5   : > { %1130 = vrot.lane.b32.xlu2 %v1125_v48, %s2578_s6  ;;  %v2139_v48 = vld [vmem:[%s2809_s30 + $0x20] sm:$0xf] }
 0x4a9   : > { %v1192_v49 = vpop.f32.mrf.mxu2 }
 0x4aa   : > { %v2292_v49 = vld [vmem:[%s2809_s30 + $0x24] sm:$0xf0] }
 0x4ac   : > { %v1127_v50 = vpop.f32.mrf.mxu0 }
 0x4ad   : > { %1195 = vrot.lane.b32.xlu2 %v1190_v47, %s2577_s4  ;;  %v2152_v47 = vor.u32 %v2293_v44, %v2149_v46  ;;  %v2291_v50 = vld [vmem:[%s2809_s30 + $0x24] sm:$0xf] }
 0x4af   : > { %1506 = vmatpush.bf16.msra.mxu3 %v2152_v47 }
 0x4c4   : > { %v1255_v51 = vpop.f32.mrf.mxu0 }
 0x4c5   : > { %1260 = vrot.lane.b32.xlu0 %v1255_v51, %s2576_s3  ;;  %v2140_v51 = vor.u32 %v2292_v49, %v2139_v48  ;;  %v2411_v48 = vld [vmem:[%s774_s21] ss:$0 sm:$0xff] }
 0x4c7   : > { %1494 = vmatpush.bf16.msrb.mxu2 %v2140_v51 }
 0x4cb   : > { %1495 = vmatpush.bf16.msrb.mxu2 %v2132_v57 }
 0x4cc   : > { %v1257_v52 = vpop.f32.mrf.mxu0 }
 0x4cd   : > { %v2141_v52 = vld [vmem:[%s2809_s30 + $0x28] sm:$0xf0] }
 0x4ce   : > { %v2144_v53 = vor.u32 %v2291_v50, %v2141_v52 }
 0x4d0   : > { %1507 = vmatpush.bf16.msra.mxu3 %v2144_v53 }
 0x4d4   : > { %1508 = vmatpush.bf16.msra.mxu3 %v2136_v61 }
 0x4ff   : > { %v1131_v59 = vpop.permute.xlu2 %1130 }
 0x500   : > { %1134 = vst.msk [vmem:[#allocation3] sm:$0xff] %vm1133_vm3, %v1131_v59  ;;  %v2123_v59 = vld [vmem:[%s2809_s30] sm:$0xf] }
 0x507   : > { %v1196_v60 = vpop.permute.xlu2 %1195 }
 0x508   : > { %1199 = vst.msk [vmem:[#allocation3] sm:$0xff] %vm1198_vm4, %v1196_v60  ;;  %v2288_v60 = vld [vmem:[%s2809_s30 + $0x4] sm:$0xf0] }
 0x537   : > { %v1261_v0 = vpop.permute.xlu0 %1260 }
 0x538   : > { %1264 = vst.msk [vmem:[#allocation3] sm:$0xff] %vm1263_vm5, %v1261_v0  ;;  %v2125_v0 = vld [vmem:[%s2809_s30 + $0x8] sm:$0xf0]  ;;  %s3136_s30 = sld [smem:[#allocation24_spill]] }
 0x53e   : > { %s3137_s9 = scalar_lea.vmem %s3136_s30, %s2770_s2  ;;  %s3143_s2 = sld [smem:[#allocation32_spill]] (!%p2249_p3) }
 0x53f   : > { %v1265_v1 = vld [vmem:[#allocation3] sm:$0xff]  ;;  %v2409_v25 = vld [vmem:[%s3137_s9] ss:$0 sm:$0xff] }
 0x540   : > { %v1266_v2 = vpack.c.bf16 %v1265_v1, %v1265_v1  ;;  %v2124_v1 = vor.u32 %v2288_v60, %v2123_v59 }
 0x542   : > { %1343 = vmatmul.bf16.vlgmr.msrb.gmra.mxu1 %v1266_v2  ;;  %v2128_v2 = vor.u32 %v2287_v62, %v2125_v0  ;;  %1496 = vmatpush.bf16.msrb.mxu2 %v2124_v1 }
 0x544   : > { %1509 = vmatpush.bf16.msra.mxu3 %v2128_v2 }
 0x5bf   : > { %v1344_v4 = vpop.f32.mrf.mxu1 }
 0x5c0   : > { %v1345_v5 = vadd.f32 %v2408_v3, %v1344_v4  ;;  %v2310_v3 = vld [vmem:[%s3135_s27 + $0x38] sm:$0xff] }
 0x5c1   : > { %v2318_v4 = vld [vmem:[%s3135_s27 + $0x78] sm:$0xff]  ;;  %1651 = vmatpush.bf16.msrb.mxu0 %v2310_v3 }
 0x5c2   : > { %v1348_v6 = vadd.f32 %v1345_v5, %v2877_v63  ;;  %v1356_v63 = vmul.f32 %v2431_v15, %v1355_v17  ;;  %1664 = vmatpush.bf16.msra.mxu1 %v2318_v4  ;;  %v2314_v17 = vld [vmem:[%s3135_s27 + $0x58] sm:$0xff] }
 0x5c4   : > { %1351 = vadd.xlane.f32.xlu2 %v1348_v6  ;;  %v1357_v18 = vadd.f32 %v2431_v15, %v1356_v63 }
 0x5c6   : > { %v2952_v19 = vsel %vm1358_vm6, %v2431_v15, %v1357_v18  ;;  %1665 = vmatpush.bf16.msra.mxu1 %v2317_v8  ;;  %v2413_v8 = vld [vmem:[%s780_s16] ss:$0 sm:$0xff] }
 0x5c7   : > { %v1346_v7 = vpop.f32.mrf.mxu1 }
 0x5c8   : > { %v2309_v7 = vld [vmem:[%s3135_s27 + $0x30] sm:$0xff] }
 0x5c9   : > { %1652 = vmatpush.bf16.msrb.mxu0 %v2309_v7 }
 0x5ca   : > { %1666 = vmatpush.bf16.msra.mxu1 %v2316_v11 }
 0x5cd   : > { %1653 = vmatpush.bf16.msrb.mxu0 %v2308_v10 }
 0x5ce   : > { %1667 = vmatpush.bf16.msra.mxu1 %v2315_v13 }
 0x5d1   : > { %1654 = vmatpush.bf16.msrb.mxu0 %v2307_v12 }
 0x5d2   : > { %1668 = vmatpush.bf16.msra.mxu1 %v2314_v17 }
 0x5d5   : > { %1655 = vmatpush.bf16.msrb.mxu0 %v2306_v16 }
 0x637   : > { %v1352_v20 = vpop.xlane.xlu2 %1351 }
 0x638   : > { %v1360_v21 = vmul.f32 %v2952_v19, %v1352_v20  ;;  %v2305_v20 = vld [vmem:[%s3135_s27 + $0x10] sm:$0xff] }
 0x639   : > { %1656 = vmatpush.bf16.msrb.mxu0 %v2305_v20 }
 0x63a   : > { %v2955_v22 = vsub.f32 %v1348_v6, %v1360_v21  ;;  %v2313_v21 = vld [vmem:[%s3135_s27 + $0x50] sm:$0xff] }
 0x63b   : > { %1669 = vmatpush.bf16.msra.mxu1 %v2313_v21 }
 0x63c   : > { %v1362_v23 = vmul.f32 %v2955_v22, %v2955_v22 }
 0x63d   : > { %1657 = vmatpush.bf16.msrb.mxu0 %v2304_v32 }
 0x63e   : > { %1363 = vadd.xlane.f32.xlu0 %v1362_v23 }
 0x63f   : > { %1670 = vmatpush.bf16.msra.mxu1 %v2312_v33 }
 0x641   : > { %1658 = vmatpush.bf16.msrb.mxu0 %v2303_v34 }
 0x643   : > { %1671 = vmatpush.bf16.msra.mxu1 %v2311_v35 }
 0x6b1   : > { %v1364_v5 = vpop.xlane.xlu0 %1363 }
 0x6b2   : > { %v1365_v6 = vmul.f32 %v1364_v5, %v2952_v19 }
 0x6b4   : > { %v1366_v9 = vadd.f32 1e-05, %v1365_v6  ;;  %v2412_v6 = vld [vmem:[%s777_s29] ss:$0 sm:$0xff] }
 0x6b6   : > { %2432 = vrsqrt.f32 %v1366_v9  ;;  %vm1373_vm8 = vweird.f32 %v1366_v9 }
 0x6bc   : > { %v2433_v14 = vpop.eup %2432 }
 0x6bd   : > { %v1368_v15 = vmul.f32 %v2433_v14, %v1366_v9  ;;  %vm1374_vm7 = vweird.f32 %v2433_v14 }
 0x6be   : > { %vm1375_vm9 = vmor %vm1373_vm8, %vm1374_vm7 }
 0x6bf   : > { %v1369_v63 = vmul.f32 %v2433_v14, %v1368_v15 }
 0x6c1   : > { %v1370_v18 = vmul.f32 0.5, %v1369_v63 }
 0x6c3   : > { %v1371_v23 = vsub.f32 1.5, %v1370_v18 }
 0x6c5   : > { %v1372_v24 = vmul.f32 %v2433_v14, %v1371_v23 }
 0x6c7   : > { %v1376_v26 = vsel %vm1375_vm9, %v2433_v14, %v1372_v24 }
 0x6c8   : > { %v1377_v27 = vmul.f32 %v1376_v26, %v2955_v22  ;;  %v1403_v22 = vld [vmem:[%s2814_s19] sm:$0x3] }
 0x6c9   : > { %v1405_v36 = vperm.slane %v1403_v22, 0  ;;  %v1406_v37 = vperm.slane %v1403_v22, 1 }
 0x6ca   : > { %v1381_v29 = vmul.f32 %v2409_v25, %v1377_v27 }
 0x6cc   : > { %v1385_v30 = vadd.f32 %v2410_v28, %v1381_v29 }
 0x6ce   : > { %v1386_v31 = vpack.c.bf16 %v1385_v30, %v1385_v30 }
 0x6d0   : > { %1497 = vmatmul.bf16.vlgmr.msrb.gmra.mxu2 %v1386_v31  ;;  %1510 = vmatmul.bf16.vlgmr.msra.gmra.mxu3 %v1386_v31 }
 0x753   : > { %v1498_v38 = vpop.f32.mrf.mxu2  ;;  %v1511_v39 = vpop.f32.mrf.mxu3 }
 0x754   : > { %v1499_v40 = vadd.f32 %v1498_v38, %v1405_v36  ;;  %v1512_v41 = vadd.f32 %v1511_v39, %v1406_v37 }
 0x756   : > { %v1515_v42 = vmax.f32 %v1499_v40, 0.0  ;;  %v1516_v43 = vmax.f32 %v1512_v41, 0.0 }
 0x758   : > { %v1517_v44 = vpack.c.bf16 %v1515_v42, %v1515_v42  ;;  %v1518_v45 = vpack.c.bf16 %v1516_v43, %v1516_v43 }
 0x75a   : > { %1659 = vmatmul.bf16.vlgmr.msrb.gmra.mxu0 %v1517_v44  ;;  %1672 = vmatmul.bf16.vlgmr.msra.gmra.mxu1 %v1518_v45 }
 0x75b   : > { %v1500_v46 = vpop.f32.mrf.mxu2  ;;  %v1513_v47 = vpop.f32.mrf.mxu3 }
 0x7d7   : > { %v1660_v49 = vpop.f32.mrf.mxu0  ;;  %v1673_v50 = vpop.f32.mrf.mxu1 }
 0x7d8   : > { %v1661_v51 = vadd.f32 %v2411_v48, %v1660_v49 }
 0x7da   : > { %v1674_v52 = vadd.f32 %v1673_v50, %v1661_v51 }
 0x7dc   : > { %v1677_v53 = vadd.f32 %v1674_v52, %v1385_v30 }
 0x7de   : > { %1680 = vadd.xlane.f32.xlu1 %v1677_v53 }
 0x7df   : > { %v1662_v54 = vpop.f32.mrf.mxu0  ;;  %v1675_v55 = vpop.f32.mrf.mxu1 }
 0x851   : > { %v1681_v56 = vpop.xlane.xlu1 %1680 }
 0x852   : > { %v1682_v57 = vmul.f32 %v1681_v56, %v2952_v19 }
 0x854   : > { %v1683_v58 = vsub.f32 %v1677_v53, %v1682_v57 }
 0x856   : > { %v1684_v59 = vmul.f32 %v1683_v58, %v1683_v58 }
 0x858   : > { %1685 = vadd.xlane.f32.xlu2 %v1684_v59 }
 0x8cb   : > { %v1686_v60 = vpop.xlane.xlu2 %1685 }
 0x8cc   : > { %v1687_v61 = vmul.f32 %v1686_v60, %v2952_v19 }
 0x8ce   : > { %v1688_v62 = vadd.f32 1e-05, %v1687_v61 }
 0x8d0   : > { %2434 = vrsqrt.f32 %v1688_v62  ;;  %vm1695_vm11 = vweird.f32 %v1688_v62 }
 0x8d6   : > { %v2435_v0 = vpop.eup %2434 }
 0x8d7   : > { %v1690_v1 = vmul.f32 %v2435_v0, %v1688_v62  ;;  %vm1696_vm10 = vweird.f32 %v2435_v0 }
 0x8d8   : > { %vm1697_vm12 = vmor %vm1695_vm11, %vm1696_vm10 }
 0x8d9   : > { %v1691_v2 = vmul.f32 %v2435_v0, %v1690_v1 }
 0x8db   : > { %v1692_v3 = vmul.f32 0.5, %v1691_v2 }
 0x8dd   : > { %v1693_v4 = vsub.f32 1.5, %v1692_v3 }
 0x8df   : > { %v1694_v5 = vmul.f32 %v2435_v0, %v1693_v4 }
 0x8e1   : > { %v1698_v7 = vsel %vm1697_vm12, %v2435_v0, %v1694_v5 }
 0x8e2   : > { %v1699_v9 = vmul.f32 %v1698_v7, %v1683_v58 }
 0x8e4   : > { %v1703_v10 = vmul.f32 %v2412_v6, %v1699_v9  ;;  %1712 = sbr.rel (%p2249_p3) target bundleno = 2550 (0x9f6), region = 100 }
 0x8e6   : > { %v1707_v11 = vadd.f32 %v2413_v8, %v1703_v10 }
 0x8e8   : > { %1708 = vst [vmem:[#allocation2] sm:$0xff] %v1707_v11 }
 0x8e9   : > { %1715 = vadd.xlane.f32.xlu0 %v1707_v11  ;;  %v2436_v26 = vld [vmem:[%s3143_s2] ss:$0 sm:$0xff] }
 0x95c   : > { %v1716_v12 = vpop.xlane.xlu0 %1715 }
 0x95d   : > { %v1717_v13 = vmul.f32 %v1716_v12, %v2952_v19 }
 0x95f   : > { %v1718_v14 = vsub.f32 %v1707_v11, %v1717_v13 }
 0x961   : > { %v1719_v15 = vmul.f32 %v1718_v14, %v1718_v14 }
 0x963   : > { %1720 = vadd.xlane.f32.xlu0 %v1719_v15 }
 0x9d6   : > { %v1721_v16 = vpop.xlane.xlu0 %1720 }
 0x9d7   : > { %v1722_v17 = vmul.f32 %v1721_v16, %v2952_v19  ;;  %v2437_v19 = vld [vmem:[%s3144_s26] ss:$0 sm:$0xff] }
 0x9d9   : > { %v1723_v63 = vadd.f32 1e-05, %v1722_v17 }
 0x9db   : > { %2438 = vrsqrt.f32 %v1723_v63  ;;  %vm1730_vm14 = vweird.f32 %v1723_v63 }
 0x9e1   : > { %v2439_v18 = vpop.eup %2438 }
 0x9e2   : > { %v1725_v20 = vmul.f32 %v2439_v18, %v1723_v63  ;;  %vm1731_vm13 = vweird.f32 %v2439_v18 }
 0x9e3   : > { %vm1732_vm15 = vmor %vm1730_vm14, %vm1731_vm13 }
 0x9e4   : > { %v1726_v21 = vmul.f32 %v2439_v18, %v1725_v20 }
 0x9e6   : > { %v1727_v23 = vmul.f32 0.5, %v1726_v21 }
 0x9e8   : > { %v1728_v24 = vsub.f32 1.5, %v1727_v23 }
 0x9ea   : > { %v1729_v25 = vmul.f32 %v2439_v18, %v1728_v24 }
 0x9ec   : > { %v1733_v27 = vsel %vm1732_vm15, %v2439_v18, %v1729_v25 }
 0x9ed   : > { %v1734_v28 = vmul.f32 %v1733_v27, %v1718_v14 }
 0x9ef   : > { %v1738_v29 = vmul.f32 %v2436_v26, %v1734_v28 }
 0x9f1   : > { %v1742_v30 = vadd.f32 %v2437_v19, %v1738_v29 }
 0x9f3   : > { %v1743_v31 = vpack.c.bf16 %v1742_v30, %v1742_v30 }
 0x9f5   : > { %1744 = vst [vmem:[%s2832_s5] sm:$0xf] %v1743_v31 }
 0x9f6 PF: > { %s3145_s28 = sld [smem:[#allocation14_spill]] }
 0x9f7   : > { %s3146_s21 = sld [smem:[#allocation10_spill]] }
 0x9f8   : > { %s3147_s22 = sld [smem:[#allocation11_spill]] }
 0x9f9   : > { %s3148_s23 = sld [smem:[#allocation17_spill]] }
 0x9fa   : > { %s3149_s24 = sld [smem:[#allocation12_spill]] }
 0x9fb   : > { %s3150_s25 = sld [smem:[#allocation13_spill]] }
 0x9fc   : > { %s32_s28 = sadd.s32 1, %s3145_s28   ;;  %s3151_s26 = sld [smem:[#allocation15_spill]] }
 0x9fd   : > { %p29_p4 = scmp.ge.s32.totalorder %s32_s28, 6   ;;  %s3152_s27 = sld [smem:[#allocation16_spill]] }
 0x9ff   :  { %31 = sbr.rel (!%p29_p4) target bundleno = 24 (0x18), region = 181 }
 0xa04   :  { %1764 = vsyncpa [#allocation5], 1 }
 0xa05   :  { %1766 = vsyncpa [#allocation5 + $0x1], 1 }
 0xa06   :  { %1767 = vsyncpa [#allocation7], 1 }
 0xa07   :  { %1769 = vsyncpa [#allocation7 + $0x1], 1 }

// kernel: forward.4
= control target key start
LH: loop header
LB: loop body
LE: loop exit
PB: predicated region body
PF: predicated region fallthrough
CT: control target
= control target key end

     0   :  { %s5583_s0 = inlined_call_operand.vmem [shape: f32[2,8,128], index: 0, kind: input, shape index: {}]   ;;  %s5584_s1 = inlined_call_operand.vmem [shape: bf16[2,8,128], index: 1, kind: input, shape index: {}]   ;;  %s5585_s2 = inlined_call_operand.vmem [shape: f32[8,8], index: 2, kind: input, shape index: {}]   ;;  %s5586_s3 = inlined_call_operand.vmem [shape: f32[2,1,8], index: 3, kind: input, shape index: {}]   ;;  %s5587_s4 = inlined_call_operand.hbm [shape: bf16[2,128,384], index: 4, kind: input, shape index: {}]   ;;  %s5588_s5 = inlined_call_operand.vmem [shape: f32[2,1,384], index: 5, kind: input, shape index: {}]   ;;  %s5589_s6 = inlined_call_operand.hbm [shape: bf16[2,128,128], index: 6, kind: input, shape index: {}]   ;;  %s5590_s7 = inlined_call_operand.vmem [shape: f32[2,1,128], index: 7, kind: input, shape index: {}]   ;;  %s5591_s8 = inlined_call_operand.hbm [shape: f32[2,1,128], index: 8, kind: input, shape index: {}]   ;;  %s5592_s9 = inlined_call_operand.hbm [shape: f32[2,1,128], index: 9, kind: input, shape index: {}]   ;;  %s5593_s10 = inlined_call_operand.hbm [shape: bf16[2,128,128], index: 10, kind: input, shape index: {}]   ;;  %s5594_s11 = inlined_call_operand.hbm [shape: f32[2,1,128], index: 11, kind: input, shape index: {}]   ;;  %s5595_s12 = inlined_call_operand.hbm [shape: bf16[2,128,256], index: 12, kind: input, shape index: {}]   ;;  %s5596_s13 = inlined_call_operand.vmem [shape: f32[2,1,256], index: 13, kind: input, shape index: {}]   ;;  %s5597_s14 = inlined_call_operand.hbm [shape: bf16[2,128,128], index: 14, kind: input, shape index: {}]   ;;  %s5598_s15 = inlined_call_operand.hbm [shape: f32[2,1,128], index: 15, kind: input, shape index: {}]   ;;  %s5599_s16 = inlined_call_operand.hbm [shape: f32[2,1,128], index: 16, kind: input, shape index: {}]   ;;  %s5600_s17 = inlined_call_operand.hbm [shape: f32[2,1,128], index: 17, kind: input, shape index: {}]   ;;  %s5601_s18 = inlined_call_operand.hbm [shape: bf16[2,128,256], index: 18, kind: input, shape index: {}]   ;;  %s5602_s19 = inlined_call_operand.vmem [shape: f32[2,1,256], index: 19, kind: input, shape index: {}]   ;;  %s5603_s20 = inlined_call_operand.hbm [shape: bf16[2,256,128], index: 20, kind: input, shape index: {}]   ;;  %s5604_s21 = inlined_call_operand.hbm [shape: f32[2,1,128], index: 21, kind: input, shape index: {}]   ;;  %s5605_s22 = inlined_call_operand.hbm [shape: f32[2,1,128], index: 22, kind: input, shape index: {}]   ;;  %s5606_s23 = inlined_call_operand.hbm [shape: f32[2,1,128], index: 23, kind: input, shape index: {}]   ;;  %s5607_s24 = inlined_call_operand.vmem [shape: f32[1,128], index: 24, kind: input, shape index: {}]   ;;  %s5608_s25 = inlined_call_operand.vmem [shape: f32[1,128], index: 25, kind: input, shape index: {}]   ;;  %s5609_s26 = inlined_call_operand.vmem [shape: bf16[2,8,128], index: 26, kind: output, shape index: {}]  }
   0x1   :  { %5638 = sst [smem:[#allocation52_spill]] %s5583_s0 }
   0x2   :  { %5639 = sst [smem:[#allocation53_spill]] %s5584_s1 }
   0x3   :  { %5640 = sst [smem:[#allocation54_spill]] %s5585_s2 }
   0x4   :  { %5641 = sst [smem:[#allocation55_spill]] %s5586_s3 }
   0x5   :  { %5642 = sst [smem:[#allocation56_spill]] %s5587_s4 }
   0x6   :  { %5643 = sst [smem:[#allocation57_spill]] %s5588_s5 }
   0x7   :  { %5644 = sst [smem:[#allocation58_spill]] %s5589_s6 }
   0x8   :  { %5645 = sst [smem:[#allocation59_spill]] %s5590_s7 }
   0x9   :  { %5646 = sst [smem:[#allocation60_spill]] %s5591_s8 }
   0xa   :  { %5647 = sst [smem:[#allocation61_spill]] %s5592_s9 }
   0xb   :  { %5648 = sst [smem:[#allocation62_spill]] %s5593_s10 }
   0xc   :  { %5649 = sst [smem:[#allocation63_spill]] %s5594_s11 }
   0xd   :  { %5650 = sst [smem:[#allocation64_spill]] %s5595_s12 }
   0xe   :  { %5651 = sst [smem:[#allocation65_spill]] %s5596_s13 }
   0xf   :  { %5652 = sst [smem:[#allocation66_spill]] %s5597_s14 }
  0x10   :  { %5653 = sst [smem:[#allocation67_spill]] %s5598_s15 }
  0x11   :  { %5654 = sst [smem:[#allocation68_spill]] %s5599_s16 }
  0x12   :  { %5655 = sst [smem:[#allocation69_spill]] %s5600_s17 }
  0x13   :  { %5656 = sst [smem:[#allocation70_spill]] %s5601_s18 }
  0x14   :  { %5657 = sst [smem:[#allocation71_spill]] %s5602_s19 }
  0x15   :  { %5658 = sst [smem:[#allocation72_spill]] %s5603_s20 }
  0x16   :  { %5659 = sst [smem:[#allocation73_spill]] %s5604_s21 }
  0x17   :  { %5660 = sst [smem:[#allocation74_spill]] %s5605_s22 }
  0x18   :  { %5661 = sst [smem:[#allocation75_spill]] %s5606_s23 }
  0x19   :  { %5662 = sst [smem:[#allocation76_spill]] %s5607_s24 }
  0x1a   :  { %5663 = sst [smem:[#allocation77_spill]] %s5608_s25 }
  0x1b   :  { %5664 = sst [smem:[#allocation78_spill]] %s5609_s26 }
  0x1c   :  { %31 = vsyncpa [#allocation5], 0 }
  0x1d   :  { %33 = vsyncpa [#allocation5 + $0x1], 0 }
  0x1e   :  { %34 = vsyncpa [#allocation7], 0 }
  0x1f   :  { %36 = vsyncpa [#allocation7 + $0x1], 0 }
  0x20   :  { %37 = vsyncpa [#allocation10], 0 }
  0x21   :  { %39 = vsyncpa [#allocation10 + $0x1], 0 }
  0x22   :  { %40 = vsyncpa [#allocation13], 0 }
  0x23   :  { %42 = vsyncpa [#allocation13 + $0x1], 0 }
  0x24   :  { %43 = vsyncpa [#allocation16], 0 }
  0x25   :  { %45 = vsyncpa [#allocation16 + $0x1], 0 }
  0x26   :  { %46 = vsyncpa [#allocation19], 0 }
  0x27   :  { %48 = vsyncpa [#allocation19 + $0x1], 0 }
  0x28   :  { %49 = vsyncpa [#allocation22], 0 }
  0x29   :  { %51 = vsyncpa [#allocation22 + $0x1], 0 }
  0x2a   :  { %52 = vsyncpa [#allocation25], 0 }
  0x2b   :  { %54 = vsyncpa [#allocation25 + $0x1], 0 }
  0x2c   :  { %55 = vsyncpa [#allocation28], 0 }
  0x2d   :  { %57 = vsyncpa [#allocation28 + $0x1], 0  ;;  %s4861_s27 = smov 0   ;;  %s4863_s3 = smov 0  }
  0x2e   :  { %s4865_s7 = smov 0   ;;  %s4867_s28 = smov 0  }
  0x2f   :  { %s4869_s8 = smov 0   ;;  %s4871_s4 = smov 0  }
  0x30   :  { %s4873_s29 = smov 0   ;;  %s4875_s0 = smov 0  }
  0x31 LB: > { %5665 = sst [smem:[#allocation38_spill]] %s4690_s3  ;;  %s5610_s9 = sadd.s32 4294967295, %s4714_s0   ;;  %s4714_s0 = sphi %s4875_s0, %s63_s0   ;;  %s4710_s29 = sphi %s4873_s29, %s5749_s29   ;;  %s4706_s4 = sphi %s4871_s4, %s5748_s4   ;;  %s4702_s8 = sphi %s4869_s8, %s5747_s8   ;;  %s4698_s28 = sphi %s4867_s28, %s5746_s28   ;;  %s4694_s7 = sphi %s4865_s7, %s5745_s7   ;;  %s4690_s3 = sphi %s4863_s3, %s5744_s3   ;;  %s4686_s27 = sphi %s4861_s27, %s5743_s27  }
  0x32   : > { %5666 = sst [smem:[#allocation39_spill]] %s4694_s7  ;;  %s72_s30 = sadd.s32 1, %s4706_s4 }
  0x33   : > { %5667 = sst [smem:[#allocation40_spill]] %s4698_s28  ;;  %p73_p0 = scmp.ge.s32.totalorder %s72_s30, 2 }
  0x34   : > { %5668 = sst [smem:[#allocation41_spill]] %s4702_s8  ;;  %s75_s2 = sadd.s32 1, %s4710_s29 }
  0x35   : > { %5669 = sst [smem:[#allocation42_spill]] %s4706_s4  ;;  %s181_s5 = sadd.s32 1, %s4694_s7 }
  0x36   : > { %5670 = sst [smem:[#allocation43_spill]] %s4710_s29  ;;  %p188_p1 = scmp.ne.s32.totalorder %s4694_s7, %s4690_s3 }
  0x37   : > { %5671 = sst [smem:[#allocation44_spill]] %s4714_s0  ;;  %s5751_s30 = smov (%p73_p0, %s72_s30), 0 }
  0x38   : > { %5672 = sst [smem:[#allocation45_spill]] %s5751_s30  ;;  %s5753_s2 = smov (!%p73_p0, %s75_s2), %s4710_s29 }
  0x39   : > { %s178_s10 = ssub.s32 %s4706_s4, %s5751_s30  ;;  %p189_p2 = scmp.eq.s32.totalorder %s4714_s0, 0 }
  0x3a   : > { %p77_p3 = scmp.ge.s32.totalorder %s5753_s2, 2  ;;  %p179_p4 = scmp.eq.s32.totalorder %s178_s10, 0 }
  0x3b   : > { %p4911_p5 = por %p189_p2, %p188_p1  ;;  %p194_p6 = scmp.ne.s32.totalorder %s4690_s3, %s4686_s27 }
  0x3c   : > { %s5755_s2 = smov (%p77_p3, %s5753_s2), 0  ;;  %p195_p7 = scmp.eq.s32.totalorder %s5610_s9, 0 }
  0x3d   : > { %5674 = sst [smem:[#allocation46_spill]] %s5755_s2  ;;  %p3465_p9 = scmp.ge.s32.totalorder %s4714_s0, 4 }
  0x3e   : > { %s4919_s1 = scalar_select %p179_p4, %s4694_s7, %s181_s5  }
  0x3f   : > { %p4923_p8 = por %p195_p7, %p194_p6  ;;  %785 = sbr.rel (%p3465_p9) target bundleno = 142 (0x8e), region = 28 }
  0x40   : > { %5675 = sst [smem:[#allocation47_spill]] %s4919_s1  ;;  %s4929_s10 = sand.u32 (!%p3465_p9), 1, %s4694_s7  }
  0x41   : > { %s5676_s25 = scalar_select %p4923_p8, 1, 0 }
  0x42   : > { %s4932_s27 = sand.u32 (!%p3465_p9), 1, %s4714_s0   ;;  %s4935_s5 = sshll.u32 (!%p3465_p9), %s4929_s10, 6 }
  0x43   : > { %5677 = sst [smem:[#allocation48_spill]] %s5676_s25  ;;  %s4938_s9 = sshll.u32 (!%p3465_p9), %s4706_s4, 6 }
  0x44   : > { %s5678_s29 = sld [smem:[#allocation58_spill]]  ;;  %s842_s24 = scalar_lea.vmem [#allocation6], %s4935_s5 }
  0x45   : > { %s850_s7 = sshll.u32 %s842_s24, 4  ;;  %s5629_s19 = scalar_lea.sflag [#allocation7], %s4932_s27  ;;  %s851_s7 = int_to_ptr.vmem [resolvable:$true] %s850_s7 }
  0x46   : > { %s5624_s13 = smov 64   ;;  %s5626_s28 = smov 4  }
  0x47   : > { %s5679_s2 = sld [smem:[#allocation61_spill]]  ;;  %s886_s8 = scalar_lea.vmem [#allocation9], %s4929_s10 }
  0x48   : > { %s893_s25 = sshll.u32 %s886_s8, 4  ;;  %s5621_s3 = scalar_lea.sflag [#allocation10], %s4932_s27  ;;  %s894_s25 = int_to_ptr.vmem [resolvable:$true] %s893_s25 }
  0x49   : > { %s5680_s11 = sld [smem:[#allocation63_spill]]  ;;  %s5622_s8 = scalar_lea.sflag [#allocation13], %s4932_s27 }
  0x4a   : > { %s847_s1 = scalar_lea.hbm %s5678_s29, %s4938_s9  ;;  %s925_s29 = scalar_lea.vmem [#allocation12], %s4929_s10 }
  0x4b   : > { %s848_s26 = sshll.u32 %s847_s1, 4  ;;  %s932_s30 = sshll.u32 %s925_s29, 4  ;;  %s849_s26 = int_to_ptr.hbm [resolvable:$true] %s848_s26  ;;  %s933_s30 = int_to_ptr.vmem [resolvable:$true] %s932_s30 }
  0x4c   : > { %4008 = dma.hbm_to_vmem [thread:$0]  (%p4911_p5), %s849_s26, 1024, %s851_s7, %s5629_s19, %s5624_s13, %s5624_s13, %s5626_s28  }
  0x4d   : > { %s889_s24 = scalar_lea.hbm %s5679_s2, %s4706_s4  ;;  %s5681_s14 = sld [smem:[#allocation66_spill]] }
  0x4e   : > { %s891_s1 = sshll.u32 %s889_s24, 4  ;;  %s972_s26 = scalar_lea.vmem [#allocation15], %s4935_s5  ;;  %s892_s1 = int_to_ptr.hbm [resolvable:$true] %s891_s1 }
  0x4f   : > { %4010 = dma.hbm_to_vmem [thread:$0]  (%p4911_p5), %s892_s1, 16, %s894_s25, %s5621_s3  }
  0x50   : > { %s928_s7 = scalar_lea.hbm %s5680_s11, %s4706_s4  ;;  %s980_s3 = sshll.u32 %s972_s26, 4  ;;  %s981_s3 = int_to_ptr.vmem [resolvable:$true] %s980_s3 }
  0x51   : > { %s930_s2 = sshll.u32 %s928_s7, 4  ;;  %s5623_s7 = scalar_lea.sflag [#allocation16], %s4932_s27  ;;  %s931_s2 = int_to_ptr.hbm [resolvable:$true] %s930_s2 }
  0x52   : > { %4012 = dma.hbm_to_vmem [thread:$0]  (%p4911_p5), %s931_s2, 16, %s933_s30, %s5622_s8  }
  0x53   : > { %s977_s0 = scalar_lea.hbm %s5681_s14, %s4938_s9  ;;  %s5682_s16 = sld [smem:[#allocation68_spill]] }
  0x54   : > { %s978_s1 = sshll.u32 %s977_s0, 4  ;;  %s1010_s24 = scalar_lea.vmem [#allocation18], %s4929_s10  ;;  %s979_s1 = int_to_ptr.hbm [resolvable:$true] %s978_s1 }
  0x55   : > { %4014 = dma.hbm_to_vmem [thread:$0]  (%p4911_p5), %s979_s1, 1024, %s981_s3, %s5623_s7, %s5624_s13, %s5624_s13, %s5626_s28  }
  0x56   : > { %s1017_s25 = sshll.u32 %s1010_s24, 4  ;;  %s4992_s26 = sshll.u32 %s4929_s10, 7  ;;  %s1018_s25 = int_to_ptr.vmem [resolvable:$true] %s1017_s25 }
  0x57   : > { %s5628_s8 = scalar_lea.sflag [#allocation19], %s4932_s27  ;;  %s5000_s3 = sshll.u32 %s4706_s4, 7 }
  0x58   : > { %s5683_s18 = sld [smem:[#allocation70_spill]]  ;;  %s1045_s24 = scalar_lea.vmem [#allocation21], %s4992_s26 }
  0x59   : > { %s1013_s2 = scalar_lea.hbm %s5682_s16, %s4706_s4  ;;  %s1053_s7 = sshll.u32 %s1045_s24, 4  ;;  %s1054_s7 = int_to_ptr.vmem [resolvable:$true] %s1053_s7 }
  0x5a   : > { %s1015_s0 = sshll.u32 %s1013_s2, 4  ;;  %s5630_s13 = scalar_lea.sflag [#allocation22], %s4932_s27  ;;  %s1016_s0 = int_to_ptr.hbm [resolvable:$true] %s1015_s0 }
  0x5b   : > { %4016 = dma.hbm_to_vmem [thread:$0]  (%p4911_p5), %s1016_s0, 16, %s1018_s25, %s5628_s8  }
  0x5c   : > { %s5631_s28 = smov 128   ;;  %s5632_s25 = smov 8  }
  0x5d   : > { %s5684_s21 = sld [smem:[#allocation73_spill]]  ;;  %s5633_s19 = scalar_lea.sflag [#allocation25], %s4932_s27 }
  0x5e   : > { %s1050_s30 = scalar_lea.hbm %s5683_s18, %s5000_s3  ;;  %s4003_s11 = smul.u32 192, %s4929_s10 }
  0x5f   : > { %s1051_s2 = sshll.u32 %s1050_s30, 4  ;;  %s1095_s30 = scalar_lea.vmem [#allocation24], %s4929_s10  ;;  %s1052_s2 = int_to_ptr.hbm [resolvable:$true] %s1051_s2 }
  0x60   : > { %4018 = dma.hbm_to_vmem [thread:$0]  (%p4911_p5), %s1052_s2, 2048, %s1054_s7, %s5630_s13, %s5631_s28, %s5631_s28, %s5632_s25  }
  0x61   : > { %s1102_s24 = sshll.u32 %s1095_s30, 4  ;;  %s4004_s14 = smul.u32 192, %s4706_s4  ;;  %s1103_s24 = int_to_ptr.vmem [resolvable:$true] %s1102_s24 }
  0x62   : > { %s5685_s13 = sld [smem:[#allocation56_spill]]  ;;  %s813_s1 = scalar_lea.vmem [#allocation4], %s4003_s11 }
  0x63   : > { %s1098_s29 = scalar_lea.hbm %s5684_s21, %s4706_s4  ;;  %s821_s30 = sshll.u32 %s813_s1, 4  ;;  %s822_s30 = int_to_ptr.vmem [resolvable:$true] %s821_s30 }
  0x64   : > { %s1100_s8 = sshll.u32 %s1098_s29, 4  ;;  %s5686_s16 = sld [smem:[#allocation60_spill]]  ;;  %s1101_s8 = int_to_ptr.hbm [resolvable:$true] %s1100_s8 }
  0x65   : > { %4020 = dma.hbm_to_vmem [thread:$0]  (%p4911_p5), %s1101_s8, 16, %s1103_s24, %s5633_s19  }
  0x66   : > { %s810_s8 = scalar_lea.sflag [#allocation5], %s4929_s10  ;;  %s4720_s24 = smov 192  }
  0x67   : > { %s4721_s7 = smov 12   ;;  %s5687_s2 = scalar_lea.sflag [#allocation7], %s4932_s27 }
  0x68   : > { %s818_s0 = scalar_lea.hbm %s5685_s13, %s4004_s14  ;;  %s869_s13 = scalar_lea.vmem [#allocation8], %s4929_s10 }
  0x69   : > { %s819_s29 = sshll.u32 %s818_s0, 4  ;;  %s876_s14 = sshll.u32 %s869_s13, 4  ;;  %s820_s29 = int_to_ptr.hbm [resolvable:$true] %s819_s29  ;;  %s877_s14 = int_to_ptr.vmem [resolvable:$true] %s876_s14 }
  0x6a   : > { %s872_s18 = scalar_lea.hbm %s5686_s16, %s4706_s4  ;;  %s5688_s25 = sld [smem:[#allocation62_spill]] }
  0x6b   : > { %4007 = dma.hbm_to_vmem [thread:$0]  (%p4911_p5), %s820_s29, 3072, %s822_s30, %s810_s8, %s4720_s24, %s4720_s24, %s4721_s7  }
  0x6c   : > { %s874_s11 = sshll.u32 %s872_s18, 4  ;;  %s904_s19 = scalar_lea.vmem [#allocation11], %s4935_s5  ;;  %s875_s11 = int_to_ptr.hbm [resolvable:$true] %s874_s11 }
  0x6d   : > { %4009 = dma.hbm_to_vmem [thread:$0]  (%p4911_p5), %s875_s11, 16, %s877_s14, %s5687_s2  }
  0x6e   : > { %s912_s30 = sshll.u32 %s904_s19, 4  ;;  %s5689_s18 = smov 4   ;;  %s913_s30 = int_to_ptr.vmem [resolvable:$true] %s912_s30 }
  0x6f   : > { %s5690_s29 = smov 64   ;;  %s5691_s8 = scalar_lea.sflag [#allocation10], %s4932_s27 }
  0x70   : > { %s909_s0 = scalar_lea.hbm %s5688_s25, %s4938_s9  ;;  %s5692_s12 = sld [smem:[#allocation64_spill]] }
  0x71   : > { %s910_s1 = sshll.u32 %s909_s0, 4  ;;  %s943_s13 = scalar_lea.vmem [#allocation14], %s4992_s26  ;;  %s911_s1 = int_to_ptr.hbm [resolvable:$true] %s910_s1 }
  0x72   : > { %4011 = dma.hbm_to_vmem [thread:$0]  (%p4911_p5), %s911_s1, 1024, %s913_s30, %s5691_s8, %s5690_s29, %s5690_s29, %s5689_s18  }
  0x73   : > { %s951_s5 = sshll.u32 %s943_s13, 4  ;;  %s5693_s19 = smov 8   ;;  %s952_s5 = int_to_ptr.vmem [resolvable:$true] %s951_s5 }
  0x74   : > { %s5694_s14 = smov 128   ;;  %s5695_s2 = scalar_lea.sflag [#allocation13], %s4932_s27 }
  0x75   : > { %s5696_s15 = sld [smem:[#allocation67_spill]]  ;;  %s993_s1 = scalar_lea.vmem [#allocation17], %s4929_s10 }
  0x76   : > { %s948_s11 = scalar_lea.hbm %s5692_s12, %s5000_s3  ;;  %s1000_s30 = sshll.u32 %s993_s1, 4  ;;  %s1001_s30 = int_to_ptr.vmem [resolvable:$true] %s1000_s30 }
  0x77   : > { %s949_s9 = sshll.u32 %s948_s11, 4  ;;  %s5697_s8 = scalar_lea.sflag [#allocation16], %s4932_s27  ;;  %s950_s9 = int_to_ptr.hbm [resolvable:$true] %s949_s9 }
  0x78   : > { %4013 = dma.hbm_to_vmem [thread:$0]  (%p4911_p5), %s950_s9, 2048, %s952_s5, %s5695_s2, %s5694_s14, %s5694_s14, %s5693_s19  }
  0x79   : > { %s5698_s17 = sld [smem:[#allocation69_spill]]  ;;  %s1027_s13 = scalar_lea.vmem [#allocation20], %s4929_s10 }
  0x7a   : > { %s1034_s5 = sshll.u32 %s1027_s13, 4  ;;  %s5699_s19 = scalar_lea.sflag [#allocation19], %s4932_s27  ;;  %s1035_s5 = int_to_ptr.vmem [resolvable:$true] %s1034_s5 }
  0x7b   : > { %s996_s25 = scalar_lea.hbm %s5696_s15, %s4706_s4  ;;  %s5700_s20 = sld [smem:[#allocation72_spill]] }
  0x7c   : > { %s998_s0 = sshll.u32 %s996_s25, 4  ;;  %s1074_s25 = scalar_lea.vmem [#allocation23], %s4992_s26  ;;  %s999_s0 = int_to_ptr.hbm [resolvable:$true] %s998_s0 }
  0x7d   : > { %4015 = dma.hbm_to_vmem [thread:$0]  (%p4911_p5), %s999_s0, 16, %s1001_s30, %s5697_s8  }
  0x7e   : > { %s1082_s0 = sshll.u32 %s1074_s25, 4  ;;  %s5701_s1 = scalar_lea.sflag [#allocation22], %s4932_s27  ;;  %s1083_s0 = int_to_ptr.vmem [resolvable:$true] %s1082_s0 }
  0x7f   : > { %s1030_s11 = scalar_lea.hbm %s5698_s17, %s4706_s4  ;;  %s5702_s22 = sld [smem:[#allocation74_spill]] }
  0x80   : > { %s1032_s9 = sshll.u32 %s1030_s11, 4  ;;  %s1112_s11 = scalar_lea.vmem [#allocation26], %s4929_s10  ;;  %s1033_s9 = int_to_ptr.hbm [resolvable:$true] %s1032_s9 }
  0x81   : > { %4017 = dma.hbm_to_vmem [thread:$0]  (%p4911_p5), %s1033_s9, 16, %s1035_s5, %s5699_s19  }
  0x82   : > { %s1079_s16 = scalar_lea.hbm %s5700_s20, %s5000_s3  ;;  %s1119_s3 = sshll.u32 %s1112_s11, 4  ;;  %s1120_s3 = int_to_ptr.vmem [resolvable:$true] %s1119_s3 }
  0x83   : > { %s1080_s28 = sshll.u32 %s1079_s16, 4  ;;  %s5703_s26 = scalar_lea.sflag [#allocation25], %s4932_s27  ;;  %s1081_s28 = int_to_ptr.hbm [resolvable:$true] %s1080_s28 }
  0x84   : > { %4019 = dma.hbm_to_vmem [thread:$0]  (%p4911_p5), %s1081_s28, 2048, %s1083_s0, %s5701_s1, %s5690_s29, %s5690_s29, %s5689_s18  }
  0x85   : > { %s1115_s24 = scalar_lea.hbm %s5702_s22, %s4706_s4  ;;  %s5704_s23 = sld [smem:[#allocation75_spill]] }
  0x86   : > { %s1117_s7 = sshll.u32 %s1115_s24, 4  ;;  %s1129_s19 = scalar_lea.vmem [#allocation27], %s4929_s10  ;;  %s1118_s7 = int_to_ptr.hbm [resolvable:$true] %s1117_s7 }
  0x87   : > { %4021 = dma.hbm_to_vmem [thread:$0]  (%p4911_p5), %s1118_s7, 16, %s1120_s3, %s5703_s26  }
  0x88   : > { %s1136_s14 = sshll.u32 %s1129_s19, 4  ;;  %s1127_s18 = scalar_lea.sflag [#allocation28], %s4929_s10  ;;  %s1137_s14 = int_to_ptr.vmem [resolvable:$true] %s1136_s14 }
  0x8b   : > { %s1132_s5 = scalar_lea.hbm %s5704_s23, %s4706_s4 }
  0x8c   : > { %s1134_s2 = sshll.u32 %s1132_s5, 4  ;;  %s1135_s2 = int_to_ptr.hbm [resolvable:$true] %s1134_s2 }
  0x8d   : > { %4022 = dma.hbm_to_vmem [thread:$0]  (%p4911_p5), %s1135_s2, 16, %s1137_s14, %s1127_s18  }
  0x8e PF: > { %s5705_s29 = sld [smem:[#allocation44_spill]] }
  0x94   : > { %p3485_p10 = scmp.ge.s32.totalorder %s5705_s29, 1  ;;  %p1141_p11 = scmp.lt.s32.totalorder %s5705_s29, 5 }
  0x96   : > { %p1142_p12 = pnand %p3485_p10, %p1141_p11 }
  0x98   : > { %1145 = sbr.rel (%p1142_p12) target bundleno = 4032 (0xfc0), region = 124 }
  0x9d   : > { %s5706_s27 = sld [smem:[#allocation38_spill]] }
  0xa3   : > { %s5116_s28 = sand.u32 1, %s5706_s27  }
  0xa4   : > { %s4005_s25 = smul.u32 192, %s5116_s28  ;;  %s1148_s0 = scalar_lea.sflag [#allocation5], %s5116_s28 }
  0xa6   : > { %s5120_s1 = scalar_lea.vmem [#allocation4], %s4005_s25 }
  0xa7   : > { %4649 = dma.done.wait (%p4923_p8), %s1148_s0, 3072  }
  0xa8   : > { %4651 = vsyncadd (%p4923_p8), %s1148_s0, 4294964224  ;;  %s5708_s6 = sld [smem:[#allocation44_spill]]  ;;  %s3486_s8 = sshll.u32 %s5116_s28, 6 }
  0xa9   : > { %s5132_s7 = scalar_lea.vmem [#allocation6], %s3486_s8 }
  0xae   : > { %s5709_s10 = sadd.s32 4294967295, %s5708_s6  }
  0xaf   : > { %s5128_s30 = sand.u32 1, %s5709_s10  }
  0xb0   : > { %s1158_s24 = scalar_lea.sflag [#allocation7], %s5128_s30 }
  0xb1   : > { %4653 = dma.done.wait (%p4923_p8), %s1158_s24, 1040  }
  0xb2   : > { %4655 = vsyncadd (%p4923_p8), %s1158_s24, 4294966256  ;;  %s1177_s3 = scalar_lea.sflag [#allocation10], %s5128_s30 }
  0xb3   : > { %4657 = dma.done.wait (%p4923_p8), %s1177_s3, 1040  }
  0xb4   : > { %4659 = vsyncadd (%p4923_p8), %s1177_s3, 4294966256  ;;  %s5145_s9 = scalar_lea.vmem [#allocation11], %s3486_s8  ;;  %s1196_s13 = scalar_lea.sflag [#allocation13], %s5128_s30 }
  0xb5   : > { %4661 = dma.done.wait (%p4923_p8), %s1196_s13, 2064  }
  0xb6   : > { %4663 = vsyncadd (%p4923_p8), %s1196_s13, 4294965232  ;;  %s3488_s19 = sshll.u32 %s5116_s28, 7  ;;  %s1215_s2 = scalar_lea.sflag [#allocation16], %s5128_s30 }
  0xb7   : > { %s5154_s14 = scalar_lea.vmem [#allocation14], %s3488_s19  ;;  %s5157_s18 = scalar_lea.vmem [#allocation15], %s3486_s8 }
  0xb8   : > { %5710 = sst [smem:[#allocation49_spill]] %s5157_s18 }
  0xb9   : > { %4665 = dma.done.wait (%p4923_p8), %s1215_s2, 1040  }
  0xba   : > { %4667 = vsyncadd (%p4923_p8), %s1215_s2, 4294966256  ;;  %s1234_s27 = scalar_lea.sflag [#allocation19], %s5128_s30 }
  0xbb   : > { %4669 = dma.done.wait (%p4923_p8), %s1234_s27, 32  }
  0xbc   : > { %4671 = vsyncadd (%p4923_p8), %s1234_s27, 4294967264  ;;  %s1252_s6 = scalar_lea.sflag [#allocation22], %s5128_s30  ;;  %s5172_s10 = scalar_lea.vmem [#allocation21], %s3488_s19 }
  0xbd   : > { %5711 = sst [smem:[#allocation50_spill]] %s5172_s10 }
  0xbe   : > { %4673 = dma.done.wait (%p4923_p8), %s1252_s6, 4096  }
  0xbf   : > { %4675 = vsyncadd (%p4923_p8), %s1252_s6, 4294963200  ;;  %s5178_s8 = scalar_lea.vmem [#allocation23], %s3488_s19  ;;  %s1272_s24 = scalar_lea.sflag [#allocation25], %s5128_s30 }
  0xc0   : > { %5712 = sst [smem:[#allocation51_spill]] %s5178_s8 }
  0xc1   : > { %4677 = dma.done.wait (%p4923_p8), %s1272_s24, 32  }
  0xc2   : > { %4679 = vsyncadd (%p4923_p8), %s1272_s24, 4294967264  ;;  %s1290_s2 = scalar_lea.sflag [#allocation28], %s5116_s28 }
  0xc3   : > { %4681 = dma.done.wait (%p4923_p8), %s1290_s2, 16  }
  0xc4   : > { %4683 = vsyncadd (%p4923_p8), %s1290_s2, 4294967280  ;;  %s5713_s19 = sld [smem:[#allocation41_spill]] }
  0xc5   : > { %s5714_s30 = sld [smem:[#allocation40_spill]] }
  0xc6   : > { %s5715_s13 = sld [smem:[#allocation52_spill]] }
  0xc7   : > { %s5716_s29 = sld [smem:[#allocation53_spill]] }
  0xc8   : > { %s5718_s22 = sld [smem:[#allocation59_spill]] }
  0xc9   : > { %s5719_s18 = sld [smem:[#allocation57_spill]] }
  0xca   : > { %p1453_p13 = scmp.lt.s32.totalorder %s5713_s19, 1  ;;  %s5720_s25 = sld [smem:[#allocation65_spill]] }
  0xcb   : > { %p1464_p0 = scmp.lt.s32.totalorder %s5714_s30, 1  ;;  %s5721_s11 = sld [smem:[#allocation71_spill]] }
  0xcc   : > { %s5757_s19 = smov (!%p1453_p13, %s5713_s19), 1  ;;  %s5722_s20 = sld [smem:[#allocation78_spill]] }
  0xcd   : > { %s5199_s6 = scalar_select %p1464_p0, %s5714_s30, 1 }
  0xce   : > { %s3492_s24 = sshll.u32 %s5757_s19, 3  ;;  %s3493_s27 = sshll.u32 %s5757_s19, 2 }
  0xcf   : > { %s1456_s3 = scalar_lea.vmem %s5715_s13, %s3492_s24  ;;  %s5209_s5 = scalar_lea.vmem %s5716_s29, %s3493_s27 }
  0xd0   : > { %s4006_s17 = smul.u32 3, %s5199_s6  ;;  %s1470_s23 = scalar_lea.vmem %s5718_s22, %s5199_s6 }
  0xd1   : > { %s3494_s4 = sshll.u32 %s5199_s6, 1  ;;  %p3497_p1 = scmp.ne.s32.totalorder %s5714_s30, 0 }
  0xd2   : > { %s5224_s16 = scalar_lea.vmem %s5719_s18, %s4006_s17  ;;  %s5229_s29 = scalar_lea.vmem %s5720_s25, %s3494_s4 }
  0xd3   : > { %s5234_s12 = scalar_lea.vmem %s5721_s11, %s3494_s4  ;;  %s5239_s21 = scalar_lea.vmem %s5722_s20, %s3493_s27 }
  0xd4   : > { %1487 = sbr.rel (%p3497_p1) target bundleno = 219 (0xdb), region = 192 }
  0xd9   : > { %v1488_v0 = vld [vmem:[%s1456_s3] sm:$0xff] }
  0xda   : > { %1489 = vst [vmem:[#allocation2] sm:$0xff] %v1488_v0 }
  0xdb PF: > { %v3584_v1 = vld [vmem:[%s5120_s1 + $0xa8] sm:$0xf]  ;;  %v3929_v2 = vld [vmem:[%s5120_s1 + $0xb0] sm:$0xf0]  ;;  %v3928_v3 = vld [vmem:[%s5120_s1 + $0xac] sm:$0xf] }
  0xdc   : > { %v3585_v4 = vor.u32 %v3929_v2, %v3584_v1  ;;  %v3586_v5 = vld [vmem:[%s5120_s1 + $0xb4] sm:$0xf0]  ;;  %v3572_v6 = vld [vmem:[%s5120_s1 + $0x90] sm:$0xf]  ;;  %v3926_v7 = vld [vmem:[%s5120_s1 + $0x98] sm:$0xf0] }
  0xdd   : > { %v3589_v8 = vor.u32 %v3928_v3, %v3586_v5  ;;  %v3925_v9 = vld [vmem:[%s5120_s1 + $0x94] sm:$0xf]  ;;  %v3574_v10 = vld [vmem:[%s5120_s1 + $0x9c] sm:$0xf0]  ;;  %v3573_v11 = vor.u32 %v3926_v7, %v3572_v6  ;;  %v3560_v13 = vld [vmem:[%s5120_s1 + $0x78] sm:$0xf] }
  0xde   : > { %1666 = vmatpush.bf16.msra.mxu0 %v3585_v4  ;;  %v3577_v12 = vor.u32 %v3925_v9, %v3574_v10  ;;  %v3923_v14 = vld [vmem:[%s5120_s1 + $0x80] sm:$0xf0]  ;;  %v3922_v15 = vld [vmem:[%s5120_s1 + $0x7c] sm:$0xf]  ;;  %v3562_v16 = vld [vmem:[%s5120_s1 + $0x84] sm:$0xf0] }
  0xdf   : > { %1679 = vmatpush.bf16.msra.mxu1 %v3589_v8  ;;  %v3561_v17 = vor.u32 %v3923_v14, %v3560_v13  ;;  %v3565_v18 = vor.u32 %v3922_v15, %v3562_v16  ;;  %v3548_v19 = vld [vmem:[%s5120_s1 + $0x60] sm:$0xf]  ;;  %v3920_v20 = vld [vmem:[%s5120_s1 + $0x68] sm:$0xf0]  ;;  %v3919_v21 = vld [vmem:[%s5120_s1 + $0x64] sm:$0xf] }
  0xe0   : > { %v3550_v22 = vld [vmem:[%s5120_s1 + $0x6c] sm:$0xf0]  ;;  %v3549_v23 = vor.u32 %v3920_v20, %v3548_v19  ;;  %v3930_v25 = vld [vmem:[%s5120_s1 + $0xb8] sm:$0xf0]  ;;  %v3580_v26 = vld [vmem:[%s5120_s1 + $0x98] sm:$0xf] }
  0xe1   : > { %v3592_v24 = vld [vmem:[%s5120_s1 + $0xb0] sm:$0xf]  ;;  %v3553_v27 = vor.u32 %v3919_v21, %v3550_v22  ;;  %v3536_v28 = vld [vmem:[%s5120_s1 + $0x48] sm:$0xf]  ;;  %v3917_v29 = vld [vmem:[%s5120_s1 + $0x50] sm:$0xf0] }
  0xe2   : > { %1667 = vmatpush.bf16.msra.mxu0 %v3573_v11  ;;  %v3593_v30 = vor.u32 %v3930_v25, %v3592_v24  ;;  %v3927_v31 = vld [vmem:[%s5120_s1 + $0xa0] sm:$0xf0]  ;;  %v3916_v32 = vld [vmem:[%s5120_s1 + $0x4c] sm:$0xf]  ;;  %v3538_v33 = vld [vmem:[%s5120_s1 + $0x54] sm:$0xf0]  ;;  %v3537_v36 = vor.u32 %v3917_v29, %v3536_v28 }
  0xe3   : > { %1680 = vmatpush.bf16.msra.mxu1 %v3577_v12  ;;  %v3524_v34 = vld [vmem:[%s5120_s1 + $0x30] sm:$0xf]  ;;  %v3581_v35 = vor.u32 %v3927_v31, %v3580_v26  ;;  %v3914_v37 = vld [vmem:[%s5120_s1 + $0x38] sm:$0xf0]  ;;  %v3568_v38 = vld [vmem:[%s5120_s1 + $0x80] sm:$0xf]  ;;  %v3541_v40 = vor.u32 %v3916_v32, %v3538_v33 }
  0xe4   : > { %1692 = vmatpush.bf16.msra.mxu2 %v3593_v30  ;;  %v3924_v39 = vld [vmem:[%s5120_s1 + $0x88] sm:$0xf0]  ;;  %v3913_v41 = vld [vmem:[%s5120_s1 + $0x34] sm:$0xf]  ;;  %v3526_v42 = vld [vmem:[%s5120_s1 + $0x3c] sm:$0xf0]  ;;  %v3525_v47 = vor.u32 %v3914_v37, %v3524_v34 }
  0xe5   : > { %v3556_v43 = vld [vmem:[%s5120_s1 + $0x68] sm:$0xf]  ;;  %v3921_v44 = vld [vmem:[%s5120_s1 + $0x70] sm:$0xf0]  ;;  %v3512_v45 = vld [vmem:[%s5120_s1 + $0x18] sm:$0xf]  ;;  %v3569_v46 = vor.u32 %v3924_v39, %v3568_v38  ;;  %v3529_v48 = vor.u32 %v3913_v41, %v3526_v42 }
  0xe6   : > { %1668 = vmatpush.bf16.msra.mxu0 %v3561_v17  ;;  %v3911_v49 = vld [vmem:[%s5120_s1 + $0x20] sm:$0xf0]  ;;  %v3910_v50 = vld [vmem:[%s5120_s1 + $0x1c] sm:$0xf]  ;;  %v3514_v51 = vld [vmem:[%s5120_s1 + $0x24] sm:$0xf0]  ;;  %v3557_v52 = vor.u32 %v3921_v44, %v3556_v43 }
  0xe7   : > { %1681 = vmatpush.bf16.msra.mxu1 %v3565_v18  ;;  %v3513_v53 = vor.u32 %v3911_v49, %v3512_v45  ;;  %v3544_v54 = vld [vmem:[%s5120_s1 + $0x50] sm:$0xf]  ;;  %v3918_v55 = vld [vmem:[%s5120_s1 + $0x58] sm:$0xf0]  ;;  %v3517_v56 = vor.u32 %v3910_v50, %v3514_v51  ;;  %v3500_v57 = vld [vmem:[%s5120_s1] sm:$0xf] }
  0xe8   : > { %1693 = vmatpush.bf16.msra.mxu2 %v3581_v35  ;;  %v3908_v58 = vld [vmem:[%s5120_s1 + $0x8] sm:$0xf0]  ;;  %v3907_v59 = vld [vmem:[%s5120_s1 + $0x4] sm:$0xf]  ;;  %v3502_v60 = vld [vmem:[%s5120_s1 + $0xc] sm:$0xf0]  ;;  %v3545_v61 = vor.u32 %v3918_v55, %v3544_v54 }
  0xe9   : > { %v3501_v62 = vor.u32 %v3908_v58, %v3500_v57  ;;  %v5284_v63 = vld [vmem:[#allocation2] sm:$0xff]  ;;  %v3532_v0 = vld [vmem:[%s5120_s1 + $0x38] sm:$0xf]  ;;  %v3915_v1 = vld [vmem:[%s5120_s1 + $0x40] sm:$0xf0]  ;;  %v3505_v2 = vor.u32 %v3907_v59, %v3502_v60  ;;  %vm1709_vm0 = vcmask 261120  }
  0xea   : > { %1669 = vmatpush.bf16.msra.mxu0 %v3549_v23  ;;  %v1491_v3 = vpack.c.bf16 %v5284_v63, %v5284_v63  ;;  %v3533_v4 = vor.u32 %v3915_v1, %v3532_v0  ;;  %v3520_v5 = vld [vmem:[%s5120_s1 + $0x20] sm:$0xf]  ;;  %v3912_v6 = vld [vmem:[%s5120_s1 + $0x28] sm:$0xf0]  ;;  %v3508_v8 = vld [vmem:[%s5120_s1 + $0x8] sm:$0xf] }
  0xeb   : > { %1682 = vmatpush.bf16.msra.mxu1 %v3553_v27  ;;  %v3521_v7 = vor.u32 %v3912_v6, %v3520_v5  ;;  %v3909_v9 = vld [vmem:[%s5120_s1 + $0x10] sm:$0xf0]  ;;  %v1530_v11 = vld [vmem:[%s5224_s16] sm:$0x7]  ;;  %s4722_s15 = smov 96   ;;  %s4723_s17 = smov 64  }
  0xec   : > { %1694 = vmatpush.bf16.msra.mxu2 %v3569_v46  ;;  %v3509_v10 = vor.u32 %v3909_v9, %v3508_v8  ;;  %v1532_v12 = vperm.slane %v1530_v11, 0  ;;  %v1533_v13 = vperm.slane %v1530_v11, 1  ;;  %s4724_s22 = smov 32   ;;  %v1534_v25 = vperm.slane %v1530_v11, 2  ;;  %s5723_s18 = sld [smem:[#allocation55_spill]] }
  0xed   : > { %vm1747_vm1 = vcmask 1043456   ;;  %s5725_s27 = sld [smem:[#allocation54_spill]]  ;;  %vm1731_vm2 = vcmask 64512   ;;  %vm1833_vm3 = vcmask 523520   ;;  %vm1898_vm4 = vcmask 785920   ;;  %s5732_s6 = scalar_lea.vmem [#allocation17], %s5116_s28 }
  0xee   : > { %1670 = vmatpush.bf16.msra.mxu0 %v3537_v36  ;;  %vm1963_vm5 = vcmask 1048320   ;;  %s5733_s13 = sld [smem:[#allocation51_spill]]  ;;  %s5734_s24 = scalar_lea.vmem [#allocation18], %s5116_s28 }
  0xef   : > { %1683 = vmatpush.bf16.msra.mxu1 %v3541_v40  ;;  %s5735_s25 = scalar_lea.vmem [#allocation20], %s5116_s28  ;;  %s5737_s0 = scalar_lea.vmem [#allocation26], %s5116_s28 }
  0xf0   : > { %1695 = vmatpush.bf16.msra.mxu2 %v3557_v52  ;;  %s5738_s2 = scalar_lea.vmem [#allocation27], %s5116_s28  ;;  %s5739_s11 = sld [smem:[#allocation40_spill]] }
  0xf2   : > { %1671 = vmatpush.bf16.msra.mxu0 %v3525_v47  ;;  %s5724_s10 = scalar_lea.vmem %s5723_s18, %s5757_s19 }
  0xf3   : > { %1684 = vmatpush.bf16.msra.mxu1 %v3529_v48  ;;  %v4113_v37 = vld [vmem:[%s5724_s10] ss:$0 sm:$0xff] }
  0xf4   : > { %1696 = vmatpush.bf16.msra.mxu2 %v3545_v61  ;;  %v1492_v38 = vld [vmem:[%s5725_s27] sm:$0xff] }
  0xf5   : > { %v1497_v39 = vadd.f32 %v4113_v37, %v1492_v38 }
  0xf6   : > { %1672 = vmatpush.bf16.msra.mxu0 %v3513_v53  ;;  %p3898_p2 = scmp.ne.s32.totalorder %s5739_s11, 1 }
  0xf7   : > { %1685 = vmatpush.bf16.msra.mxu1 %v3517_v56  ;;  %s5740_s26 = sld [smem:[#allocation76_spill]] (!%p3898_p2) }
  0xf8   : > { %1697 = vmatpush.bf16.msra.mxu2 %v3533_v4 }
  0xfa   : > { %1673 = vmatpush.bf16.msra.mxu0 %v3501_v62 }
  0xfb   : > { %1686 = vmatpush.bf16.msra.mxu1 %v3505_v2 }
  0xfc   : > { %1698 = vmatpush.bf16.msra.mxu2 %v3521_v7 }
  0xfd   : > { %1674 = vmatmul.bf16.vlgmr.msra.gmra.mxu0 %v1491_v3 }
  0xfe   : > { %1687 = vmatmul.bf16.vlgmr.msra.gmra.mxu1 %v1491_v3 }
 0x100   : > { %1699 = vmatpush.bf16.msra.mxu2 %v3509_v10 }
 0x103   : > { %1700 = vmatmul.bf16.vlgmr.msra.gmra.mxu2 %v1491_v3 }
 0x17a   : > { %v1675_v14 = vpop.f32.mrf.mxu0 }
 0x17b   : > { %v1676_v15 = vadd.f32 %v1675_v14, %v1532_v12  ;;  %v1688_v16 = vpop.f32.mrf.mxu1 }
 0x17c   : > { %v1689_v17 = vadd.f32 %v1688_v16, %v1533_v13 }
 0x17e   : > { %v1705_v18 = vpack.c.bf16 %v1689_v17, %v1676_v15 }
 0x180   : > { %1765 = vrot.lane.b32.xlu1 %v1705_v18, %s4722_s15  ;;  %v1708_v19 = vrot.slane %v1705_v18, 4  ;;  %v1768_v20 = vunpack.c.l.b16 %v1705_v18 }
 0x182   : > { %v1677_v21 = vpop.f32.mrf.mxu0  ;;  %v1714_v22 = vsel %vm1709_vm0, %v1708_v19, 0  ;;  %v1769_v23 = vpack.c.b16 %v1768_v20, %v1768_v20 }
 0x183   : > { %v1690_v24 = vpop.f32.mrf.mxu1  ;;  %1723 = vmatpush.bf16.xpose.msra.mxu3 %v1714_v22 }
 0x184   : > { %1770 = vrot.lane.b32.xlu2 %v1769_v23, %s4722_s15 }
 0x186   : > { %v1701_v26 = vpop.f32.mrf.mxu2 }
 0x187   : > { %v1702_v27 = vadd.f32 %v1701_v26, %v1534_v25 }
 0x188   : > { %1835 = vrot.lane.b32.xlu1 %v1705_v18, %s4723_s17 }
 0x189   : > { %v5302_v28 = vpack.c.bf16 %v1702_v27, %v1702_v27 }
 0x18a   : > { %3594 = vmatmul.msk.bf16.vlgmr.msra.gmra.mxu3 %vm1709_vm0, %v1705_v18 }
 0x18b   : > { %v1749_v30 = vsel %vm1747_vm1, %v5302_v28, 0  ;;  %v1806_v14 = vunpack.c.l.b16 %v5302_v28 }
 0x18c   : > { %1900 = vrot.lane.b32.xlu2 %v1705_v18, %s4724_s22  ;;  %1758 = vmatpush.bf16.msrb.mxu3 %v1749_v30 }
 0x18d   : > { %v1807_v15 = vpack.c.b16 %v1806_v14, %v1806_v14 }
 0x18e   : > { %v1703_v29 = vpop.f32.mrf.mxu2 }
 0x190   : > { %1903 = vrot.lane.b32.xlu1 %v1769_v23, %s4724_s22 }
 0x1de   : > { %v1771_v50 = vpop.permute.xlu2 %1770 }
 0x1e6   : > { %v1901_v52 = vpop.permute.xlu2 %1900 }
 0x1e7   : > { %v1902_v54 = vrot.slane %v1901_v52, 4 }
 0x1e9   : > { %v1909_v57 = vsel %vm1709_vm0, %v1902_v54, 0 }
 0x1f2   : > { %v1766_v31 = vpop.permute.xlu1 %1765 }
 0x1f3   : > { %v1767_v32 = vrot.slane %v1766_v31, 4 }
 0x1f5   : > { %v1776_v33 = vsel %vm1709_vm0, %v1767_v32, 0 }
 0x1f6   : > { %1785 = vmatpush.bf16.xpose.msra.mxu3 %v1776_v33 }
 0x1fa   : > { %v1836_v34 = vpop.permute.xlu1 %1835 }
 0x1fb   : > { %v1837_v35 = vrot.slane %v1836_v34, 4 }
 0x1fd   : > { %v1844_v36 = vsel %vm1709_vm0, %v1837_v35, 0 }
 0x1fe   : > { %1853 = vmatpush.bf16.xpose.msrb.mxu2 %v1844_v36 }
 0x202   : > { %v1904_v59 = vpop.permute.xlu1 %1903 }
 0x20d   : > { %v1725_v40 = vpop.f32.mrf.mxu3 }
 0x20e   : > { %v1729_v41 = vmul.f32 0.17677669, %v1725_v40 }
 0x210   : > { %v1730_v42 = vadd.f32 %v1729_v41, %v1497_v39 }
 0x212   : > { %v1732_v43 = vsel %vm1731_vm2, %v1730_v42, -inf }
 0x213   : > { %1733 = vmax.xlane.f32.xlu0 %v1732_v43 }
 0x215   : > { %v1727_v44 = vpop.f32.mrf.mxu3 }
 0x286   : > { %v1734_v45 = vpop.xlane.xlu0 %1733 }
 0x287   : > { %v1735_v46 = vsub.f32 %v1730_v42, %v1734_v45 }
 0x289   : > { %v1736_v47 = vmul.f32 1.442695, %v1735_v46 }
 0x28b   : > { %4124 = vpow2.f32 %v1736_v47 }
 0x291   : > { %v4125_v48 = vpop.eup %4124 }
 0x292   : > { %v1738_v49 = vsel %vm1731_vm2, %v4125_v48, 0.0 }
 0x293   : > { %1739 = vadd.xlane.f32.xlu0 %v1738_v49 }
 0x2a7   : > { %1838 = vrot.lane.b32.xlu0 %v1769_v23, %s4723_s17 }
 0x306   : > { %v1740_v51 = vpop.xlane.xlu0 %1739 }
 0x307   : > { %4126 = vrcp.f32 %v1740_v51 }
 0x30d   : > { %v4127_v53 = vpop.eup %4126 }
 0x30e   : > { %v1742_v55 = vmul.f32 %v4127_v53, %v4125_v48 }
 0x310   : > { %v1743_v56 = vpack.c.bf16 %v1742_v55, %v1742_v55  ;;  %v3938_v55 = vld [vmem:[%s5132_s7 + $0x38] sm:$0xff] }
 0x311   : > { %2035 = vmatpush.bf16.msrb.mxu1 %v3938_v55  ;;  %v3950_v55 = vld [vmem:[%s5154_s14 + $0x14] sm:$0xf0] }
 0x312   : > { %3595 = vmatmul.msk.bf16.vlgmr.msrb.gmra.mxu3 %vm1731_vm2, %v1743_v56  ;;  %v3937_v56 = vld [vmem:[%s5132_s7 + $0x30] sm:$0xff] }
 0x313   : > { %1918 = vmatpush.bf16.xpose.msrb.mxu3 %v1909_v57  ;;  %v3936_v57 = vld [vmem:[%s5132_s7 + $0x28] sm:$0xff] }
 0x315   : > { %2036 = vmatpush.bf16.msrb.mxu1 %v3937_v56 }
 0x319   : > { %v1839_v58 = vpop.permute.xlu0 %1838  ;;  %2037 = vmatpush.bf16.msrb.mxu1 %v3936_v57  ;;  %v3951_v57 = vld [vmem:[%s5154_s14 + $0x24] sm:$0xf] }
 0x31a   : > { %3598 = vmatmul.msk.bf16.vlgmr.msrb.gmra.mxu2 %vm1709_vm0, %v1839_v58  ;;  %v3935_v58 = vld [vmem:[%s5132_s7 + $0x20] sm:$0xff] }
 0x31d   : > { %2038 = vmatpush.bf16.msrb.mxu1 %v3935_v58  ;;  %v3686_v58 = vld [vmem:[%s5154_s14 + $0x28] sm:$0xf0] }
 0x322   : > { %3596 = vmatmul.msk.bf16.vlgmr.msra.gmra.mxu3 %vm1709_vm0, %v1771_v50 }
 0x332   : > { %3600 = vmatmul.msk.bf16.vlgmr.msrb.gmra.mxu3 %vm1709_vm0, %v1904_v59  ;;  %v3934_v59 = vld [vmem:[%s5132_s7 + $0x18] sm:$0xff] }
 0x333   : > { %2039 = vmatpush.bf16.msrb.mxu1 %v3934_v59  ;;  %v3689_v59 = vor.u32 %v3951_v57, %v3686_v58 }
 0x395   : > { %v1760_v60 = vpop.f32.mrf.mxu3 }
 0x396   : > { %1764 = vst.msk [vmem:[#allocation3] sm:$0xff] %vm1709_vm0, %v1760_v60  ;;  %v3933_v60 = vld [vmem:[%s5132_s7 + $0x10] sm:$0xff] }
 0x397   : > { %2040 = vmatpush.bf16.msrb.mxu1 %v3933_v60  ;;  %v3668_v60 = vld [vmem:[%s5154_s14] sm:$0xf] }
 0x39d   : > { %v1762_v61 = vpop.f32.mrf.mxu3  ;;  %v1855_v62 = vpop.f32.mrf.mxu2 }
 0x39e   : > { %v1859_v0 = vmul.f32 0.17677669, %v1855_v62 }
 0x3a0   : > { %v1860_v1 = vadd.f32 %v1859_v0, %v1497_v39  ;;  %v3932_v0 = vld [vmem:[%s5132_s7 + $0x8] sm:$0xff] }
 0x3a1   : > { %2041 = vmatpush.bf16.msrb.mxu1 %v3932_v0 }
 0x3a2   : > { %v1861_v2 = vsel %vm1731_vm2, %v1860_v1, -inf }
 0x3a3   : > { %1862 = vmax.xlane.f32.xlu1 %v1861_v2 }
 0x3a5   : > { %v1787_v3 = vpop.f32.mrf.mxu3  ;;  %v1857_v4 = vpop.f32.mrf.mxu2 }
 0x3a6   : > { %v1791_v5 = vmul.f32 0.17677669, %v1787_v3 }
 0x3a8   : > { %v1792_v6 = vadd.f32 %v1791_v5, %v1497_v39  ;;  %v4114_v5 = vld [vmem:[%s1470_s23] ss:$0 sm:$0xff]  ;;  %s5727_s23 = scalar_lea.vmem [#allocation8], %s5116_s28 }
 0x3aa   : > { %v1793_v7 = vsel %vm1731_vm2, %v1792_v6, -inf }
 0x3ab   : > { %1794 = vmax.xlane.f32.xlu2 %v1793_v7 }
 0x3ad   : > { %v1789_v8 = vpop.f32.mrf.mxu3 }
 0x3b5   : > { %v1920_v9 = vpop.f32.mrf.mxu3 }
 0x3b6   : > { %v1924_v10 = vmul.f32 0.17677669, %v1920_v9 }
 0x3b8   : > { %v1925_v11 = vadd.f32 %v1924_v10, %v1497_v39  ;;  %v4725_v10 = vmov 128.0  }
 0x3ba   : > { %v1926_v12 = vsel %vm1731_vm2, %v1925_v11, -inf }
 0x3bb   : > { %1927 = vmax.xlane.f32.xlu0 %v1926_v12  ;;  %v3962_v12 = vld [vmem:[%s5154_s14 + $0x74] sm:$0xf0] }
 0x3bd   : > { %v1922_v13 = vpop.f32.mrf.mxu3 }
 0x3be   : > { %v3716_v13 = vld [vmem:[%s5154_s14 + $0x60] sm:$0xf] }
 0x3cf   : > { %1873 = vrot.lane.b32.xlu0 %v1807_v15, %s4723_s17 }
 0x416   : > { %v1863_v16 = vpop.xlane.xlu1 %1862 }
 0x417   : > { %v1864_v17 = vsub.f32 %v1860_v1, %v1863_v16  ;;  %v3931_v1 = vld [vmem:[%s5132_s7] sm:$0xff]  ;;  %v3961_v16 = vld [vmem:[%s5154_s14 + $0x74] sm:$0xf]  ;;  %s5728_s7 = scalar_lea.vmem [#allocation9], %s5116_s28 }
 0x418   : > { %2042 = vmatpush.bf16.msrb.mxu1 %v3931_v1  ;;  %v3949_v1 = vld [vmem:[%s5154_s14 + $0x14] sm:$0xf] }
 0x419   : > { %v1865_v18 = vmul.f32 1.442695, %v1864_v17  ;;  %v3726_v17 = vld [vmem:[%s5154_s14 + $0x78] sm:$0xf0] }
 0x41b   : > { %4128 = vpow2.f32 %v1865_v18  ;;  %v3729_v18 = vor.u32 %v3961_v16, %v3726_v17 }
 0x41e   : > { %v1795_v19 = vpop.xlane.xlu2 %1794 }
 0x41f   : > { %v1796_v20 = vsub.f32 %v1792_v6, %v1795_v19  ;;  %v3959_v19 = vld [vmem:[%s5154_s14 + $0x64] sm:$0xf] }
 0x421   : > { %v4129_v21 = vpop.eup %4128  ;;  %v1797_v22 = vmul.f32 1.442695, %v1796_v20  ;;  %v3718_v20 = vld [vmem:[%s5154_s14 + $0x68] sm:$0xf0] }
 0x422   : > { %v1867_v23 = vsel %vm1731_vm2, %v4129_v21, 0.0 }
 0x423   : > { %4130 = vpow2.f32 %v1797_v22  ;;  %1868 = vadd.xlane.f32.xlu1 %v1867_v23  ;;  %v3708_v22 = vld [vmem:[%s5154_s14 + $0x50] sm:$0xf]  ;;  %v3958_v23 = vld [vmem:[%s5154_s14 + $0x54] sm:$0xf0] }
 0x429   : > { %v4131_v24 = vpop.eup %4130 }
 0x42a   : > { %v1799_v25 = vsel %vm1731_vm2, %v4131_v24, 0.0 }
 0x42b   : > { %1800 = vadd.xlane.f32.xlu2 %v1799_v25  ;;  %v3946_v25 = vld [vmem:[%s5145_s9 + $0x38] sm:$0xff] }
 0x42e   : > { %v1928_v26 = vpop.xlane.xlu0 %1927 }
 0x42f   : > { %v1929_v27 = vsub.f32 %v1925_v11, %v1928_v26  ;;  %v3724_v11 = vld [vmem:[%s5154_s14 + $0x70] sm:$0xf]  ;;  %v3957_v26 = vld [vmem:[%s5154_s14 + $0x54] sm:$0xf] }
 0x430   : > { %v3725_v14 = vor.u32 %v3962_v12, %v3724_v11  ;;  %v3941_v11 = vld [vmem:[%s5145_s9 + $0x10] sm:$0xff]  ;;  %v3940_v12 = vld [vmem:[%s5145_s9 + $0x8] sm:$0xff] }
 0x431   : > { %v1930_v28 = vmul.f32 1.442695, %v1929_v27  ;;  %v3710_v27 = vld [vmem:[%s5154_s14 + $0x58] sm:$0xf0] }
 0x432   : > { %2271 = vmatpush.bf16.msra.mxu3 %v3725_v14 }
 0x433   : > { %4132 = vpow2.f32 %v1930_v28 }
 0x439   : > { %v4133_v29 = vpop.eup %4132 }
 0x43a   : > { %v1932_v30 = vsel %vm1731_vm2, %v4133_v29, 0.0 }
 0x43b   : > { %1933 = vadd.xlane.f32.xlu1 %v1932_v30  ;;  %v3700_v30 = vld [vmem:[%s5154_s14 + $0x40] sm:$0xf] }
 0x441   : > { %v1874_v31 = vpop.permute.xlu0 %1873 }
 0x442   : > { %v1879_v32 = vsel %vm1747_vm1, %v1874_v31, 0  ;;  %v3956_v31 = vld [vmem:[%s5154_s14 + $0x44] sm:$0xf0] }
 0x443   : > { %1808 = vrot.lane.b32.xlu2 %v1807_v15, %s4722_s15  ;;  %1888 = vmatpush.bf16.msra.mxu2 %v1879_v32  ;;  %v3713_v32 = vor.u32 %v3957_v26, %v3710_v27 }
 0x447   : > { %2155 = vmatpush.bf16.msrb.mxu2 %v3946_v25  ;;  %v4116_v25 = vld [vmem:[%s5728_s7] ss:$0 sm:$0xff] }
 0x454   : > { %1938 = vrot.lane.b32.xlu1 %v1807_v15, %s4724_s22  ;;  %v3960_v15 = vld [vmem:[%s5154_s14 + $0x64] sm:$0xf0] }
 0x496   : > { %v1869_v33 = vpop.xlane.xlu1 %1868 }
 0x497   : > { %4134 = vrcp.f32 %v1869_v33 }
 0x49d   : > { %v4135_v34 = vpop.eup %4134 }
 0x49e   : > { %v1871_v35 = vmul.f32 %v4135_v34, %v4129_v21  ;;  %v1801_v36 = vpop.xlane.xlu2 %1800  ;;  %v3701_v34 = vor.u32 %v3956_v31, %v3700_v30 }
 0x49f   : > { %4136 = vrcp.f32 %v1801_v36  ;;  %v3954_v36 = vld [vmem:[%s5154_s14 + $0x34] sm:$0xf0] }
 0x4a0   : > { %v1872_v37 = vpack.c.bf16 %v1871_v35, %v1871_v35  ;;  %v3692_v35 = vld [vmem:[%s5154_s14 + $0x30] sm:$0xf] }
 0x4a2   : > { %3599 = vmatmul.msk.bf16.vlgmr.msra.gmra.mxu2 %vm1731_vm2, %v1872_v37 }
 0x4a5   : > { %v4137_v38 = vpop.eup %4136 }
 0x4a6   : > { %v1803_v39 = vmul.f32 %v4137_v38, %v4131_v24  ;;  %v1809_v40 = vpop.permute.xlu2 %1808  ;;  %v3721_v24 = vor.u32 %v3959_v19, %v3718_v20  ;;  %v3693_v38 = vor.u32 %v3954_v36, %v3692_v35 }
 0x4a7   : > { %v1814_v41 = vsel %vm1747_vm1, %v1809_v40, 0 }
 0x4a8   : > { %1823 = vmatpush.bf16.msrb.mxu0 %v1814_v41  ;;  %v1804_v42 = vpack.c.bf16 %v1803_v39, %v1803_v39 }
 0x4ab   : > { %3597 = vmatmul.msk.bf16.vlgmr.msrb.gmra.mxu0 %vm1731_vm2, %v1804_v42 }
 0x4ae   : > { %v1934_v43 = vpop.xlane.xlu1 %1933 }
 0x4af   : > { %4138 = vrcp.f32 %v1934_v43 }
 0x4b0   : > { %4140 = vrcp.f32 %v4725_v10  ;;  %v3942_v10 = vld [vmem:[%s5145_s9 + $0x18] sm:$0xff] }
 0x4b5   : > { %v4139_v44 = vpop.eup %4138 }
 0x4b6   : > { %v1936_v45 = vmul.f32 %v4139_v44, %v4133_v29  ;;  %v4141_v21 = vpop.eup %4140  ;;  %v3709_v29 = vor.u32 %v3958_v23, %v3708_v22  ;;  %v4115_v22 = vld [vmem:[%s5727_s23] ss:$0 sm:$0xff] }
 0x4b7   : > { %v2054_v28 = vmul.f32 128.0, %v4141_v21  ;;  %vm2058_vm6 = vweird.f32 %v4141_v21 }
 0x4b8   : > { %v1937_v48 = vpack.c.bf16 %v1936_v45, %v1936_v45  ;;  %v3955_v45 = vld [vmem:[%s5154_s14 + $0x44] sm:$0xf] }
 0x4b9   : > { %v2055_v33 = vsub.f32 1.0, %v2054_v28 }
 0x4bb   : > { %v2056_v37 = vmul.f32 %v4141_v21, %v2055_v33 }
 0x4bd   : > { %v2057_v39 = vadd.f32 %v4141_v21, %v2056_v37 }
 0x4bf   : > { %v5378_v40 = vsel %vm2058_vm6, %v4141_v21, %v2057_v39 }
 0x4c6   : > { %v1939_v46 = vpop.permute.xlu1 %1938 }
 0x4c7   : > { %v1944_v47 = vsel %vm1747_vm1, %v1939_v46, 0  ;;  %v3702_v46 = vld [vmem:[%s5154_s14 + $0x48] sm:$0xf0] }
 0x4c8   : > { %1953 = vmatpush.bf16.msra.mxu0 %v1944_v47  ;;  %v3705_v47 = vor.u32 %v3955_v45, %v3702_v46 }
 0x4cb   : > { %3601 = vmatmul.msk.bf16.vlgmr.msra.gmra.mxu0 %vm1731_vm2, %v1937_v48  ;;  %v3684_v48 = vld [vmem:[%s5154_s14 + $0x20] sm:$0xf] }
 0x4cc   : > { %2284 = vmatpush.bf16.msrb.mxu0 %v3729_v18 }
 0x4d0   : > { %2285 = vmatpush.bf16.msrb.mxu0 %v3721_v24 }
 0x4d4   : > { %2286 = vmatpush.bf16.msrb.mxu0 %v3713_v32 }
 0x4d8   : > { %2287 = vmatpush.bf16.msrb.mxu0 %v3705_v47 }
 0x525   : > { %v1890_v49 = vpop.f32.mrf.mxu2 }
 0x528   : > { %v1825_v50 = vpop.f32.mrf.mxu0 }
 0x529   : > { %1830 = vrot.lane.b32.xlu2 %v1825_v50, %s4724_s22 }
 0x52d   : > { %v1892_v51 = vpop.f32.mrf.mxu2 }
 0x52e   : > { %v3953_v51 = vld [vmem:[%s5154_s14 + $0x34] sm:$0xf] }
 0x530   : > { %v1827_v52 = vpop.f32.mrf.mxu0 }
 0x531   : > { %1895 = vrot.lane.b32.xlu2 %v1890_v49, %s4723_s17  ;;  %v3952_v49 = vld [vmem:[%s5154_s14 + $0x24] sm:$0xf0]  ;;  %v3694_v52 = vld [vmem:[%s5154_s14 + $0x38] sm:$0xf0] }
 0x532   : > { %v3685_v50 = vor.u32 %v3952_v49, %v3684_v48 }
 0x548   : > { %v1955_v53 = vpop.f32.mrf.mxu0 }
 0x549   : > { %1960 = vrot.lane.b32.xlu0 %v1955_v53, %s4722_s15  ;;  %v3697_v53 = vor.u32 %v3953_v51, %v3694_v52 }
 0x54b   : > { %2288 = vmatpush.bf16.msrb.mxu0 %v3697_v53 }
 0x54f   : > { %2289 = vmatpush.bf16.msrb.mxu0 %v3689_v59 }
 0x550   : > { %v1957_v54 = vpop.f32.mrf.mxu0 }
 0x551   : > { %v3676_v54 = vld [vmem:[%s5154_s14 + $0x10] sm:$0xf] }
 0x552   : > { %v3677_v56 = vor.u32 %v3950_v55, %v3676_v54 }
 0x583   : > { %v1831_v61 = vpop.permute.xlu2 %1830 }
 0x584   : > { %1834 = vst.msk [vmem:[#allocation3] sm:$0xff] %vm1833_vm3, %v1831_v61  ;;  %v3948_v61 = vld [vmem:[%s5154_s14 + $0x4] sm:$0xf0] }
 0x585   : > { %v3669_v0 = vor.u32 %v3948_v61, %v3668_v60 }
 0x58b   : > { %v1896_v62 = vpop.permute.xlu2 %1895 }
 0x58c   : > { %1899 = vst.msk [vmem:[#allocation3] sm:$0xff] %vm1898_vm4, %v1896_v62  ;;  %v3945_v62 = vld [vmem:[%s5145_s9 + $0x30] sm:$0xff] }
 0x58d   : > { %2156 = vmatpush.bf16.msrb.mxu2 %v3945_v62 }
 0x5bb   : > { %v1961_v2 = vpop.permute.xlu0 %1960 }
 0x5bc   : > { %1964 = vst.msk [vmem:[#allocation3] sm:$0xff] %vm1963_vm5, %v1961_v2  ;;  %v3678_v2 = vld [vmem:[%s5154_s14 + $0x18] sm:$0xf0] }
 0x5c3   : > { %v1965_v3 = vld [vmem:[#allocation3] sm:$0xff] }
 0x5c4   : > { %v1966_v4 = vpack.c.bf16 %v1965_v3, %v1965_v3  ;;  %v3681_v3 = vor.u32 %v3949_v1, %v3678_v2 }
 0x5c6   : > { %2043 = vmatmul.bf16.vlgmr.msrb.gmra.mxu1 %v1966_v4  ;;  %v3944_v4 = vld [vmem:[%s5145_s9 + $0x28] sm:$0xff]  ;;  %2290 = vmatpush.bf16.msrb.mxu0 %v3681_v3 }
 0x5c7   : > { %2157 = vmatpush.bf16.msrb.mxu2 %v3944_v4 }
 0x643   : > { %v2044_v6 = vpop.f32.mrf.mxu1 }
 0x644   : > { %v2045_v7 = vadd.f32 %v4114_v5, %v2044_v6  ;;  %v2168_v5 = vld [vmem:[%s5209_s5] sm:$0xf]  ;;  %v3947_v6 = vld [vmem:[%s5154_s14 + $0x4] sm:$0xf]  ;;  %s5730_s5 = sld [smem:[#allocation49_spill]] }
 0x646   : > { %v2048_v8 = vadd.f32 %v2045_v7, %v5284_v63  ;;  %v3717_v63 = vor.u32 %v3960_v15, %v3716_v13  ;;  %v3670_v7 = vld [vmem:[%s5154_s14 + $0x8] sm:$0xf0]  ;;  %v3939_v13 = vld [vmem:[%s5145_s9] sm:$0xff]  ;;  %s5731_s14 = sld [smem:[#allocation50_spill]] }
 0x648   : > { %2051 = vadd.xlane.f32.xlu2 %v2048_v8  ;;  %2272 = vmatpush.bf16.msra.mxu3 %v3717_v63 }
 0x64b   : > { %v2046_v9 = vpop.f32.mrf.mxu1 }
 0x64c   : > { %2273 = vmatpush.bf16.msra.mxu3 %v3709_v29  ;;  %v3943_v9 = vld [vmem:[%s5145_s9 + $0x20] sm:$0xff]  ;;  %v2185_v29 = vld [vmem:[%s5229_s29] sm:$0x3]  ;;  %s5729_s9 = scalar_lea.vmem [#allocation12], %s5116_s28  ;;  %s5736_s29 = scalar_lea.vmem [#allocation24], %s5116_s28 }
 0x64d   : > { %2158 = vmatpush.bf16.msrb.mxu2 %v3943_v9  ;;  %v2187_v30 = vperm.slane %v2185_v29, 0  ;;  %v2188_v31 = vperm.slane %v2185_v29, 1  ;;  %v4117_v45 = vld [vmem:[%s5729_s9] ss:$0 sm:$0xff] }
 0x650   : > { %2274 = vmatpush.bf16.msra.mxu3 %v3701_v34 }
 0x651   : > { %2159 = vmatpush.bf16.msrb.mxu2 %v3942_v10 }
 0x654   : > { %2275 = vmatpush.bf16.msra.mxu3 %v3693_v38 }
 0x655   : > { %2160 = vmatpush.bf16.msrb.mxu2 %v3941_v11 }
 0x658   : > { %2276 = vmatpush.bf16.msra.mxu3 %v3685_v50 }
 0x659   : > { %2161 = vmatpush.bf16.msrb.mxu2 %v3940_v12 }
 0x65c   : > { %2277 = vmatpush.bf16.msra.mxu3 %v3677_v56 }
 0x65d   : > { %2162 = vmatpush.bf16.msrb.mxu2 %v3939_v13 }
 0x660   : > { %2278 = vmatpush.bf16.msra.mxu3 %v3669_v0 }
 0x663   : > { %2279 = vmatmul.bf16.vlgmr.msra.gmra.mxu3 %v2168_v5 }
 0x6bb   : > { %v2052_v41 = vpop.xlane.xlu2 %2051 }
 0x6bc   : > { %v2060_v42 = vmul.f32 %v5378_v40, %v2052_v41 }
 0x6be   : > { %v5381_v43 = vsub.f32 %v2048_v8, %v2060_v42  ;;  %v3673_v8 = vor.u32 %v3947_v6, %v3670_v7 }
 0x6c0   : > { %v2062_v44 = vmul.f32 %v5381_v43, %v5381_v43  ;;  %2291 = vmatpush.bf16.msrb.mxu0 %v3673_v8 }
 0x6c2   : > { %2063 = vadd.xlane.f32.xlu0 %v2062_v44 }
 0x6c3   : > { %2292 = vmatmul.bf16.vlgmr.msrb.gmra.mxu0 %v2168_v5 }
 0x6e6   : > { %v2280_v32 = vpop.f32.mrf.mxu3 }
 0x6e7   : > { %v2281_v34 = vadd.f32 %v2280_v32, %v2187_v30 }
 0x6ee   : > { %v2282_v41 = vpop.f32.mrf.mxu3 }
 0x735   : > { %v2064_v14 = vpop.xlane.xlu0 %2063 }
 0x736   : > { %v2065_v15 = vmul.f32 %v2064_v14, %v5378_v40 }
 0x738   : > { %v2066_v16 = vadd.f32 1e-05, %v2065_v15 }
 0x73a   : > { %4142 = vrsqrt.f32 %v2066_v16  ;;  %vm2073_vm8 = vweird.f32 %v2066_v16 }
 0x740   : > { %v4143_v17 = vpop.eup %4142  ;;  %v2293_v33 = vpop.f32.mrf.mxu0 }
 0x741   : > { %v2068_v18 = vmul.f32 %v4143_v17, %v2066_v16  ;;  %vm2074_vm7 = vweird.f32 %v4143_v17  ;;  %v2294_v35 = vadd.f32 %v2293_v33, %v2188_v31 }
 0x742   : > { %vm2075_vm9 = vmor %vm2073_vm8, %vm2074_vm7 }
 0x743   : > { %v2069_v19 = vmul.f32 %v4143_v17, %v2068_v18  ;;  %v5420_v36 = vpack.c.bf16 %v2294_v35, %v2281_v34 }
 0x745   : > { %v2070_v63 = vmul.f32 0.5, %v2069_v19  ;;  %v2358_v37 = vunpack.c.l.b16 %v5420_v36  ;;  %v2303_v38 = vsel %vm1709_vm0, %v5420_v36, 0 }
 0x746   : > { %2312 = vmatpush.bf16.xpose.msra.mxu1 %v2303_v38 }
 0x747   : > { %v2071_v20 = vsub.f32 1.5, %v2070_v63  ;;  %v2359_v39 = vpack.c.b16 %v2358_v37, %v2358_v37 }
 0x748   : > { %v2295_v42 = vpop.f32.mrf.mxu0 }
 0x749   : > { %v2072_v21 = vmul.f32 %v4143_v17, %v2071_v20  ;;  %2360 = vrot.lane.b32.xlu1 %v2359_v39, %s4722_s15 }
 0x74b   : > { %v2076_v23 = vsel %vm2075_vm9, %v4143_v17, %v2072_v21 }
 0x74c   : > { %v2077_v24 = vmul.f32 %v2076_v23, %v5381_v43  ;;  %v2332_v43 = vrot.slane %v5420_v36, 4 }
 0x74e   : > { %v2081_v26 = vmul.f32 %v4115_v22, %v2077_v24  ;;  %v2337_v44 = vsel %vm1747_vm1, %v2332_v43, 0 }
 0x74f   : > { %2346 = vmatpush.bf16.msra.mxu2 %v2337_v44 }
 0x750   : > { %v5415_v27 = vadd.f32 %v4116_v25, %v2081_v26 }
 0x751   : > { %2423 = vrot.lane.b32.xlu1 %v2359_v39, %s4723_s17 }
 0x752   : > { %v2086_v28 = vpack.c.bf16 %v5415_v27, %v5415_v27 }
 0x754   : > { %2163 = vmatmul.bf16.vlgmr.msrb.gmra.mxu2 %v2086_v28 }
 0x7bb   : > { %v2361_v52 = vpop.permute.xlu1 %2360 }
 0x7bc   : > { %v2366_v53 = vsel %vm1709_vm0, %v2361_v52, 0 }
 0x7bd   : > { %2375 = vmatpush.bf16.xpose.msrb.mxu3 %v2366_v53 }
 0x7c3   : > { %v2424_v54 = vpop.permute.xlu1 %2423 }
 0x7c4   : > { %v2429_v55 = vsel %vm1709_vm0, %v2424_v54, 0 }
 0x7c5   : > { %2438 = vmatpush.bf16.xpose.msrb.mxu1 %v2429_v55 }
 0x7d7   : > { %v2164_v46 = vpop.f32.mrf.mxu2 }
 0x7d8   : > { %v2165_v47 = vadd.f32 %v4117_v45, %v2164_v46 }
 0x7da   : > { %v2298_v48 = vpack.c.bf16 %v2165_v47, %v2165_v47 }
 0x7dc   : > { %v2354_v49 = vunpack.c.l.b16 %v2298_v48  ;;  %3730 = vmatmul.msk.bf16.vlgmr.msra.gmra.mxu1 %vm1709_vm0, %v2298_v48 }
 0x7de   : > { %v2355_v50 = vpack.c.b16 %v2354_v49, %v2354_v49 }
 0x7df   : > { %v2166_v51 = vpop.f32.mrf.mxu2 }
 0x7e0   : > { %2484 = vrot.lane.b32.xlu2 %v2355_v50, %s4724_s22  ;;  %2356 = vrot.lane.b32.xlu1 %v2355_v50, %s4722_s15 }
 0x7e8   : > { %2486 = vrot.lane.b32.xlu1 %v2359_v39, %s4724_s22 }
 0x7f0   : > { %2421 = vrot.lane.b32.xlu1 %v2355_v50, %s4723_s17 }
 0x83a   : > { %v2485_v0 = vpop.permute.xlu2 %2484 }
 0x852   : > { %v2357_v56 = vpop.permute.xlu1 %2356 }
 0x853   : > { %3732 = vmatmul.msk.bf16.vlgmr.msrb.gmra.mxu3 %vm1709_vm0, %v2357_v56 }
 0x859   : > { %v2314_v57 = vpop.f32.mrf.mxu1 }
 0x85a   : > { %v2318_v58 = vmul.f32 0.17677669, %v2314_v57  ;;  %v2487_v59 = vpop.permute.xlu1 %2486 }
 0x85b   : > { %v2492_v60 = vsel %vm1709_vm0, %v2487_v59, 0 }
 0x85c   : > { %2501 = vmatpush.bf16.xpose.msra.mxu3 %v2492_v60  ;;  %v2319_v61 = vsel %vm1731_vm2, %v2318_v58, -inf }
 0x85d   : > { %2320 = vmax.xlane.f32.xlu1 %v2319_v61 }
 0x861   : > { %v2316_v62 = vpop.f32.mrf.mxu1 }
 0x862   : > { %v2422_v1 = vpop.permute.xlu1 %2421 }
 0x863   : > { %3734 = vmatmul.msk.bf16.vlgmr.msrb.gmra.mxu1 %vm1709_vm0, %v2422_v1  ;;  %3736 = vmatmul.msk.bf16.vlgmr.msra.gmra.mxu3 %vm1709_vm0, %v2485_v0 }
 0x8d0   : > { %v2321_v2 = vpop.xlane.xlu1 %2320 }
 0x8d1   : > { %v2322_v3 = vsub.f32 %v2318_v58, %v2321_v2 }
 0x8d3   : > { %v2323_v4 = vmul.f32 1.442695, %v2322_v3 }
 0x8d5   : > { %4144 = vpow2.f32 %v2323_v4 }
 0x8d6   : > { %v2377_v5 = vpop.f32.mrf.mxu3 }
 0x8d7   : > { %v2381_v13 = vmul.f32 0.17677669, %v2377_v5  ;;  %v3970_v5 = vld [vmem:[%s5730_s5 + $0x38] sm:$0xff] }
 0x8d8   : > { %2617 = vmatpush.bf16.msra.mxu1 %v3970_v5  ;;  %v3772_v5 = vld [vmem:[%s5731_s14] sm:$0xf] }
 0x8d9   : > { %v2382_v15 = vsel %vm1731_vm2, %v2381_v13, -inf }
 0x8db   : > { %v4145_v6 = vpop.eup %4144 }
 0x8dc   : > { %v2325_v7 = vsel %vm1731_vm2, %v4145_v6, 0.0 }
 0x8dd   : > { %2326 = vadd.xlane.f32.xlu2 %v2325_v7  ;;  %v3968_v7 = vld [vmem:[%s5730_s5 + $0x28] sm:$0xff] }
 0x8de   : > { %v2379_v8 = vpop.f32.mrf.mxu3 }
 0x8df   : > { %v3967_v8 = vld [vmem:[%s5730_s5 + $0x20] sm:$0xff] }
 0x8e0   : > { %v2440_v9 = vpop.f32.mrf.mxu1 }
 0x8e1   : > { %v2444_v10 = vmul.f32 0.17677669, %v2440_v9  ;;  %v3966_v9 = vld [vmem:[%s5730_s5 + $0x18] sm:$0xff] }
 0x8e3   : > { %v2445_v11 = vsel %vm1731_vm2, %v2444_v10, -inf }
 0x8e4   : > { %2446 = vmax.xlane.f32.xlu0 %v2445_v11  ;;  %v3964_v11 = vld [vmem:[%s5730_s5 + $0x8] sm:$0xff] }
 0x8e6   : > { %v2503_v12 = vpop.f32.mrf.mxu3 }
 0x8e7   : > { %v2507_v17 = vmul.f32 0.17677669, %v2503_v12  ;;  %v3963_v12 = vld [vmem:[%s5730_s5] sm:$0xff] }
 0x8e8   : > { %v2442_v14 = vpop.f32.mrf.mxu1 }
 0x8e9   : > { %v2508_v18 = vsel %vm1731_vm2, %v2507_v17, -inf }
 0x8ec   : > { %2383 = vmax.xlane.f32.xlu0 %v2382_v15 }
 0x8ee   : > { %v2505_v16 = vpop.f32.mrf.mxu3 }
 0x8f4   : > { %2509 = vmax.xlane.f32.xlu0 %v2508_v18  ;;  %v4118_v18 = vld [vmem:[%s5732_s6] ss:$0 sm:$0xff] }
 0x8f5   : > { %2520 = vrot.lane.b32.xlu2 %v5420_v36, %s4724_s22 }
 0x950   : > { %v2327_v19 = vpop.xlane.xlu2 %2326 }
 0x951   : > { %4146 = vrcp.f32 %v2327_v19 }
 0x957   : > { %v4147_v63 = vpop.eup %4146  ;;  %v2447_v20 = vpop.xlane.xlu0 %2446 }
 0x958   : > { %v2329_v21 = vmul.f32 %v4147_v63, %v4145_v6  ;;  %v2448_v22 = vsub.f32 %v2444_v10, %v2447_v20  ;;  %v2521_v45 = vpop.permute.xlu2 %2520  ;;  %v3969_v6 = vld [vmem:[%s5730_s5 + $0x30] sm:$0xff] }
 0x959   : > { %v2522_v49 = vrot.slane %v2521_v45, 4  ;;  %2618 = vmatpush.bf16.msra.mxu1 %v3969_v6  ;;  %v3965_v10 = vld [vmem:[%s5730_s5 + $0x10] sm:$0xff]  ;;  %v3972_v6 = vld [vmem:[%s5731_s14 + $0x4] sm:$0xf0] }
 0x95a   : > { %v2330_v23 = vpack.c.bf16 %v2329_v21, %v2329_v21  ;;  %v2449_v24 = vmul.f32 1.442695, %v2448_v22  ;;  %v3828_v22 = vld [vmem:[%s5731_s14 + $0x70] sm:$0xf] }
 0x95b   : > { %v2527_v56 = vsel %vm1747_vm1, %v2522_v49, 0  ;;  %v3806_v49 = vld [vmem:[%s5731_s14 + $0x48] sm:$0xf0] }
 0x95c   : > { %4148 = vpow2.f32 %v2449_v24  ;;  %3731 = vmatmul.msk.bf16.vlgmr.msra.gmra.mxu2 %vm1731_vm2, %v2330_v23  ;;  %v3986_v23 = vld [vmem:[%s5731_s14 + $0x74] sm:$0xf0]  ;;  %v3985_v24 = vld [vmem:[%s5731_s14 + $0x74] sm:$0xf] }
 0x95d   : > { %2619 = vmatpush.bf16.msra.mxu1 %v3968_v7 }
 0x95f   : > { %v2384_v25 = vpop.xlane.xlu0 %2383 }
 0x960   : > { %v2385_v26 = vsub.f32 %v2381_v13, %v2384_v25  ;;  %v3829_v25 = vor.u32 %v3986_v23, %v3828_v22 }
 0x961   : > { %2620 = vmatpush.bf16.msra.mxu1 %v3967_v8  ;;  %v3971_v8 = vld [vmem:[%s5731_s14 + $0x4] sm:$0xf] }
 0x962   : > { %v4149_v28 = vpop.eup %4148  ;;  %v2386_v29 = vmul.f32 1.442695, %v2385_v26  ;;  %v3830_v26 = vld [vmem:[%s5731_s14 + $0x78] sm:$0xf0] }
 0x963   : > { %v2451_v30 = vsel %vm1731_vm2, %v4149_v28, 0.0 }
 0x964   : > { %4150 = vpow2.f32 %v2386_v29  ;;  %2452 = vadd.xlane.f32.xlu1 %v2451_v30 }
 0x965   : > { %2621 = vmatpush.bf16.msra.mxu1 %v3966_v9  ;;  %v3774_v9 = vld [vmem:[%s5731_s14 + $0x8] sm:$0xf0] }
 0x967   : > { %v2510_v33 = vpop.xlane.xlu0 %2509 }
 0x968   : > { %v2511_v34 = vsub.f32 %v2507_v17, %v2510_v33  ;;  %v3984_v33 = vld [vmem:[%s5731_s14 + $0x64] sm:$0xf0] }
 0x969   : > { %2622 = vmatpush.bf16.msra.mxu1 %v3965_v10  ;;  %v3773_v10 = vor.u32 %v3972_v6, %v3772_v5 }
 0x96a   : > { %v4151_v31 = vpop.eup %4150  ;;  %v2512_v35 = vmul.f32 1.442695, %v2511_v34  ;;  %v3983_v34 = vld [vmem:[%s5731_s14 + $0x64] sm:$0xf] }
 0x96b   : > { %v2388_v32 = vsel %vm1731_vm2, %v4151_v31, 0.0 }
 0x96c   : > { %2389 = vadd.xlane.f32.xlu0 %v2388_v32  ;;  %4152 = vpow2.f32 %v2512_v35  ;;  %v3820_v32 = vld [vmem:[%s5731_s14 + $0x60] sm:$0xf] }
 0x96d   : > { %2623 = vmatpush.bf16.msra.mxu1 %v3964_v11  ;;  %v3821_v35 = vor.u32 %v3984_v33, %v3820_v32  ;;  %v3777_v11 = vor.u32 %v3971_v8, %v3774_v9  ;;  %v4119_v33 = vld [vmem:[%s5734_s24] ss:$0 sm:$0xff] }
 0x971   : > { %2624 = vmatpush.bf16.msra.mxu1 %v3963_v12  ;;  %v3994_v12 = vld [vmem:[%s5733_s13 + $0x38] sm:$0xff] }
 0x972   : > { %v4153_v37 = vpop.eup %4152 }
 0x973   : > { %v2514_v38 = vsel %vm1731_vm2, %v4153_v37, 0.0 }
 0x97d   : > { %2457 = vrot.lane.b32.xlu1 %v5420_v36, %s4723_s17 }
 0x980   : > { %2394 = vrot.lane.b32.xlu0 %v5420_v36, %s4722_s15 }
 0x9aa   : > { %2515 = vadd.xlane.f32.xlu0 %v2514_v38 }
 0x9d7   : > { %v2453_v41 = vpop.xlane.xlu1 %2452 }
 0x9d8   : > { %4154 = vrcp.f32 %v2453_v41  ;;  %v3982_v41 = vld [vmem:[%s5731_s14 + $0x54] sm:$0xf0] }
 0x9de   : > { %v4155_v44 = vpop.eup %4154 }
 0x9df   : > { %v2348_v39 = vpop.f32.mrf.mxu2  ;;  %v2390_v42 = vpop.xlane.xlu0 %2389  ;;  %v2455_v47 = vmul.f32 %v4155_v44, %v4149_v28  ;;  %v3833_v28 = vor.u32 %v3985_v24, %v3830_v26  ;;  %v3814_v44 = vld [vmem:[%s5731_s14 + $0x58] sm:$0xf0] }
 0x9e0   : > { %2352 = vst.msk [vmem:[#allocation3] sm:$0xff] %vm1709_vm0, %v2348_v39  ;;  %4156 = vrcp.f32 %v2390_v42  ;;  %v3812_v39 = vld [vmem:[%s5731_s14 + $0x50] sm:$0xf]  ;;  %v3981_v42 = vld [vmem:[%s5731_s14 + $0x54] sm:$0xf]  ;;  %v3990_v24 = vld [vmem:[%s5733_s13 + $0x18] sm:$0xff] }
 0x9e1   : > { %v2456_v54 = vpack.c.bf16 %v2455_v47, %v2455_v47  ;;  %2777 = vmatpush.bf16.msrb.mxu3 %v3833_v28  ;;  %v3817_v45 = vor.u32 %v3981_v42, %v3814_v44  ;;  %v3979_v47 = vld [vmem:[%s5731_s14 + $0x44] sm:$0xf]  ;;  %v3988_v42 = vld [vmem:[%s5733_s13 + $0x8] sm:$0xff] }
 0x9e2   : > { %v3987_v44 = vld [vmem:[%s5733_s13] sm:$0xff] }
 0x9e6   : > { %v4157_v36 = vpop.eup %4156 }
 0x9e7   : > { %v2350_v43 = vpop.f32.mrf.mxu2  ;;  %v2392_v52 = vmul.f32 %v4157_v36, %v4151_v31  ;;  %v3980_v36 = vld [vmem:[%s5731_s14 + $0x44] sm:$0xf0] }
 0x9e8   : > { %v3813_v43 = vor.u32 %v3982_v41, %v3812_v39 }
 0x9e9   : > { %v2393_v57 = vpack.c.bf16 %v2392_v52, %v2392_v52  ;;  %v3978_v52 = vld [vmem:[%s5731_s14 + $0x34] sm:$0xf0] }
 0x9ef   : > { %v2458_v46 = vpop.permute.xlu1 %2457 }
 0x9f0   : > { %v2459_v48 = vrot.slane %v2458_v46, 4  ;;  %v3804_v46 = vld [vmem:[%s5731_s14 + $0x40] sm:$0xf] }
 0x9f2   : > { %v2464_v50 = vsel %vm1747_vm1, %v2459_v48, 0  ;;  %v2395_v51 = vpop.permute.xlu0 %2394  ;;  %v3805_v48 = vor.u32 %v3980_v36, %v3804_v46  ;;  %v2678_v46 = vld [vmem:[%s5234_s12] sm:$0x3] }
 0x9f3   : > { %v2396_v53 = vrot.slane %v2395_v51, 4  ;;  %2473 = vmatpush.bf16.msrb.mxu2 %v2464_v50  ;;  %v3809_v50 = vor.u32 %v3979_v47, %v3806_v49  ;;  %v3796_v51 = vld [vmem:[%s5731_s14 + $0x30] sm:$0xf]  ;;  %v2680_v36 = vperm.slane %v2678_v46, 0  ;;  %v2681_v47 = vperm.slane %v2678_v46, 1 }
 0x9f5   : > { %v2401_v55 = vsel %vm1747_vm1, %v2396_v53, 0  ;;  %v3977_v53 = vld [vmem:[%s5731_s14 + $0x34] sm:$0xf] }
 0x9f6   : > { %2410 = vmatpush.bf16.msra.mxu0 %v2401_v55  ;;  %3735 = vmatmul.msk.bf16.vlgmr.msrb.gmra.mxu2 %vm1731_vm2, %v2456_v54  ;;  %v3797_v54 = vor.u32 %v3978_v52, %v3796_v51  ;;  %v3798_v55 = vld [vmem:[%s5731_s14 + $0x38] sm:$0xf0] }
 0x9f7   : > { %2764 = vmatpush.bf16.msra.mxu2 %v3829_v25  ;;  %v3998_v25 = vld [vmem:[%s5733_s13 + $0x58] sm:$0xff] }
 0x9f9   : > { %3733 = vmatmul.msk.bf16.vlgmr.msra.gmra.mxu0 %vm1731_vm2, %v2393_v57  ;;  %v3788_v57 = vld [vmem:[%s5731_s14 + $0x20] sm:$0xf] }
 0x9fa   : > { %2536 = vmatpush.bf16.msrb.mxu0 %v2527_v56  ;;  %v3801_v56 = vor.u32 %v3977_v53, %v3798_v55 }
 0x9fb   : > { %2765 = vmatpush.bf16.msra.mxu2 %v3821_v35 }
 0x9fe   : > { %2926 = vmatpush.bf16.msra.mxu0 %v3994_v12 }
 0x9ff   : > { %2766 = vmatpush.bf16.msra.mxu2 %v3813_v43  ;;  %v3996_v43 = vld [vmem:[%s5733_s13 + $0x48] sm:$0xff] }
 0xa03   : > { %2767 = vmatpush.bf16.msra.mxu2 %v3805_v48 }
 0xa07   : > { %2768 = vmatpush.bf16.msra.mxu2 %v3797_v54 }
 0xa1d   : > { %v2516_v58 = vpop.xlane.xlu0 %2515 }
 0xa1e   : > { %4158 = vrcp.f32 %v2516_v58  ;;  %v3976_v58 = vld [vmem:[%s5731_s14 + $0x24] sm:$0xf0] }
 0xa24   : > { %v4159_v59 = vpop.eup %4158 }
 0xa25   : > { %v2518_v60 = vmul.f32 %v4159_v59, %v4153_v37  ;;  %v3822_v37 = vld [vmem:[%s5731_s14 + $0x68] sm:$0xf0]  ;;  %v3975_v59 = vld [vmem:[%s5731_s14 + $0x24] sm:$0xf] }
 0xa26   : > { %v3825_v38 = vor.u32 %v3983_v34, %v3822_v37  ;;  %v4120_v37 = vld [vmem:[%s5735_s25] ss:$0 sm:$0xff] }
 0xa27   : > { %v2519_v61 = vpack.c.bf16 %v2518_v60, %v2518_v60  ;;  %v3789_v60 = vor.u32 %v3976_v58, %v3788_v57  ;;  %v4121_v57 = vld [vmem:[%s5736_s29] ss:$0 sm:$0xff] }
 0xa28   : > { %2778 = vmatpush.bf16.msrb.mxu3 %v3825_v38 }
 0xa29   : > { %3737 = vmatmul.msk.bf16.vlgmr.msrb.gmra.mxu0 %vm1731_vm2, %v2519_v61  ;;  %v3790_v61 = vld [vmem:[%s5731_s14 + $0x28] sm:$0xf0]  ;;  %2769 = vmatpush.bf16.msra.mxu2 %v3789_v60 }
 0xa2c   : > { %2779 = vmatpush.bf16.msrb.mxu3 %v3817_v45  ;;  %v3995_v45 = vld [vmem:[%s5733_s13 + $0x40] sm:$0xff] }
 0xa30   : > { %2780 = vmatpush.bf16.msrb.mxu3 %v3809_v50 }
 0xa34   : > { %2781 = vmatpush.bf16.msrb.mxu3 %v3801_v56 }
 0xa76   : > { %v2412_v62 = vpop.f32.mrf.mxu0 }
 0xa77   : > { %2417 = vrot.lane.b32.xlu1 %v2412_v62, %s4724_s22  ;;  %v3793_v62 = vor.u32 %v3975_v59, %v3790_v61 }
 0xa79   : > { %v2475_v0 = vpop.f32.mrf.mxu2  ;;  %2782 = vmatpush.bf16.msrb.mxu3 %v3793_v62 }
 0xa7e   : > { %v2414_v1 = vpop.f32.mrf.mxu0 }
 0xa7f   : > { %2480 = vrot.lane.b32.xlu1 %v2475_v0, %s4723_s17  ;;  %v3780_v0 = vld [vmem:[%s5731_s14 + $0x10] sm:$0xf]  ;;  %v3974_v1 = vld [vmem:[%s5731_s14 + $0x14] sm:$0xf0]  ;;  %s5741_s17 = sld [smem:[#allocation77_spill]] (!%p3898_p2) }
 0xa81   : > { %v2477_v2 = vpop.f32.mrf.mxu2 }
 0xa82   : > { %v3973_v2 = vld [vmem:[%s5731_s14 + $0x14] sm:$0xf] }
 0xaa6   : > { %v2538_v3 = vpop.f32.mrf.mxu0 }
 0xaa7   : > { %2543 = vrot.lane.b32.xlu2 %v2538_v3, %s4722_s15  ;;  %v3781_v3 = vor.u32 %v3974_v1, %v3780_v0 }
 0xaa9   : > { %2770 = vmatpush.bf16.msra.mxu2 %v3781_v3 }
 0xaad   : > { %2771 = vmatpush.bf16.msra.mxu2 %v3773_v10 }
 0xaae   : > { %v2540_v4 = vpop.f32.mrf.mxu0 }
 0xaaf   : > { %v3782_v4 = vld [vmem:[%s5731_s14 + $0x18] sm:$0xf0] }
 0xab0   : > { %v3785_v7 = vor.u32 %v3973_v2, %v3782_v4 }
 0xab2   : > { %2783 = vmatpush.bf16.msrb.mxu3 %v3785_v7 }
 0xab6   : > { %2784 = vmatpush.bf16.msrb.mxu3 %v3777_v11 }
 0xae9   : > { %v2418_v13 = vpop.permute.xlu1 %2417 }
 0xaea   : > { %2420 = vst.msk [vmem:[#allocation3] sm:$0xff] %vm1833_vm3, %v2418_v13  ;;  %v4002_v13 = vld [vmem:[%s5733_s13 + $0x78] sm:$0xff] }
 0xaeb   : > { %2939 = vmatpush.bf16.msrb.mxu1 %v4002_v13 }
 0xaf1   : > { %v2481_v14 = vpop.permute.xlu1 %2480 }
 0xaf2   : > { %2483 = vst.msk [vmem:[#allocation3] sm:$0xff] %vm1898_vm4, %v2481_v14 }
 0xb01   : > { %v2544_v15 = vpop.permute.xlu2 %2543 }
 0xb02   : > { %2546 = vst.msk [vmem:[#allocation3] sm:$0xff] %vm1963_vm5, %v2544_v15 }
 0xb09   : > { %v2547_v16 = vld [vmem:[#allocation3] sm:$0xff] }
 0xb0a   : > { %v2548_v17 = vpack.c.bf16 %v2547_v16, %v2547_v16  ;;  %v3993_v16 = vld [vmem:[%s5733_s13 + $0x30] sm:$0xff] }
 0xb0b   : > { %2927 = vmatpush.bf16.msra.mxu0 %v3993_v16 }
 0xb0c   : > { %2625 = vmatmul.bf16.vlgmr.msra.gmra.mxu1 %v2548_v17  ;;  %v4001_v17 = vld [vmem:[%s5733_s13 + $0x70] sm:$0xff] }
 0xb0d   : > { %2940 = vmatpush.bf16.msrb.mxu1 %v4001_v17  ;;  %v4123_v17 = vld [vmem:[%s5738_s2] ss:$0 sm:$0xff] }
 0xb89   : > { %v2626_v19 = vpop.f32.mrf.mxu1 }
 0xb8a   : > { %v2627_v63 = vadd.f32 %v4118_v18, %v2626_v19  ;;  %v3992_v19 = vld [vmem:[%s5733_s13 + $0x28] sm:$0xff] }
 0xb8b   : > { %2928 = vmatpush.bf16.msra.mxu0 %v3992_v19 }
 0xb8c   : > { %v2630_v20 = vadd.f32 %v2627_v63, %v5415_v27  ;;  %v4000_v63 = vld [vmem:[%s5733_s13 + $0x68] sm:$0xff] }
 0xb8d   : > { %2941 = vmatpush.bf16.msrb.mxu1 %v4000_v63 }
 0xb8e   : > { %2633 = vadd.xlane.f32.xlu1 %v2630_v20 }
 0xb91   : > { %v2628_v21 = vpop.f32.mrf.mxu1 }
 0xb92   : > { %v3999_v21 = vld [vmem:[%s5733_s13 + $0x60] sm:$0xff] }
 0xb93   : > { %2942 = vmatpush.bf16.msrb.mxu1 %v3999_v21 }
 0xb97   : > { %2943 = vmatpush.bf16.msrb.mxu1 %v3998_v25 }
 0xc01   : > { %v2634_v29 = vpop.xlane.xlu1 %2633 }
 0xc02   : > { %v2635_v27 = vmul.f32 %v2634_v29, %v5378_v40  ;;  %v3989_v29 = vld [vmem:[%s5733_s13 + $0x10] sm:$0xff] }
 0xc04   : > { %v5486_v30 = vsub.f32 %v2630_v20, %v2635_v27  ;;  %v3991_v20 = vld [vmem:[%s5733_s13 + $0x20] sm:$0xff]  ;;  %v3997_v27 = vld [vmem:[%s5733_s13 + $0x50] sm:$0xff] }
 0xc05   : > { %2929 = vmatpush.bf16.msra.mxu0 %v3991_v20  ;;  %2944 = vmatpush.bf16.msrb.mxu1 %v3997_v27 }
 0xc06   : > { %v2637_v31 = vmul.f32 %v5486_v30, %v5486_v30 }
 0xc08   : > { %2638 = vadd.xlane.f32.xlu0 %v2637_v31 }
 0xc09   : > { %2930 = vmatpush.bf16.msra.mxu0 %v3990_v24  ;;  %2945 = vmatpush.bf16.msrb.mxu1 %v3996_v43 }
 0xc0d   : > { %2931 = vmatpush.bf16.msra.mxu0 %v3989_v29  ;;  %2946 = vmatpush.bf16.msrb.mxu1 %v3995_v45 }
 0xc11   : > { %2932 = vmatpush.bf16.msra.mxu0 %v3988_v42 }
 0xc15   : > { %2933 = vmatpush.bf16.msra.mxu0 %v3987_v44 }
 0xc7b   : > { %v2639_v14 = vpop.xlane.xlu0 %2638 }
 0xc7c   : > { %v2640_v15 = vmul.f32 %v2639_v14, %v5378_v40 }
 0xc7e   : > { %v2641_v18 = vadd.f32 1e-05, %v2640_v15  ;;  %v4122_v15 = vld [vmem:[%s5737_s0] ss:$0 sm:$0xff] }
 0xc80   : > { %4160 = vrsqrt.f32 %v2641_v18  ;;  %vm2648_vm11 = vweird.f32 %v2641_v18 }
 0xc86   : > { %v4161_v22 = vpop.eup %4160 }
 0xc87   : > { %v2643_v23 = vmul.f32 %v4161_v22, %v2641_v18  ;;  %vm2649_vm10 = vweird.f32 %v4161_v22 }
 0xc88   : > { %vm2650_vm12 = vmor %vm2648_vm11, %vm2649_vm10 }
 0xc89   : > { %v2644_v26 = vmul.f32 %v4161_v22, %v2643_v23 }
 0xc8b   : > { %v2645_v28 = vmul.f32 0.5, %v2644_v26 }
 0xc8d   : > { %v2646_v31 = vsub.f32 1.5, %v2645_v28 }
 0xc8f   : > { %v2647_v32 = vmul.f32 %v4161_v22, %v2646_v31 }
 0xc91   : > { %v2651_v34 = vsel %vm2650_vm12, %v4161_v22, %v2647_v32 }
 0xc92   : > { %v2652_v35 = vmul.f32 %v2651_v34, %v5486_v30 }
 0xc94   : > { %v2656_v38 = vmul.f32 %v4119_v33, %v2652_v35 }
 0xc96   : > { %v2660_v39 = vadd.f32 %v4120_v37, %v2656_v38 }
 0xc98   : > { %v2661_v41 = vpack.c.bf16 %v2660_v39, %v2660_v39 }
 0xc9a   : > { %2772 = vmatmul.bf16.vlgmr.msra.gmra.mxu2 %v2661_v41  ;;  %2785 = vmatmul.bf16.vlgmr.msrb.gmra.mxu3 %v2661_v41 }
 0xd1d   : > { %v2773_v30 = vpop.f32.mrf.mxu2  ;;  %v2786_v48 = vpop.f32.mrf.mxu3 }
 0xd1e   : > { %v2774_v49 = vadd.f32 %v2773_v30, %v2680_v36  ;;  %v2787_v50 = vadd.f32 %v2786_v48, %v2681_v47 }
 0xd20   : > { %v2790_v51 = vmax.f32 %v2774_v49, 0.0  ;;  %v2791_v52 = vmax.f32 %v2787_v50, 0.0 }
 0xd22   : > { %v2792_v53 = vpack.c.bf16 %v2790_v51, %v2790_v51  ;;  %v2793_v54 = vpack.c.bf16 %v2791_v52, %v2791_v52 }
 0xd24   : > { %2934 = vmatmul.bf16.vlgmr.msra.gmra.mxu0 %v2792_v53  ;;  %2947 = vmatmul.bf16.vlgmr.msrb.gmra.mxu1 %v2793_v54 }
 0xd25   : > { %v2775_v55 = vpop.f32.mrf.mxu2  ;;  %v2788_v56 = vpop.f32.mrf.mxu3 }
 0xda1   : > { %v2935_v58 = vpop.f32.mrf.mxu0  ;;  %v2948_v59 = vpop.f32.mrf.mxu1 }
 0xda2   : > { %v2936_v60 = vadd.f32 %v4121_v57, %v2935_v58 }
 0xda4   : > { %v2949_v61 = vadd.f32 %v2948_v59, %v2936_v60 }
 0xda6   : > { %v2952_v62 = vadd.f32 %v2949_v61, %v2660_v39 }
 0xda8   : > { %2955 = vadd.xlane.f32.xlu2 %v2952_v62 }
 0xda9   : > { %v2937_v0 = vpop.f32.mrf.mxu0  ;;  %v2950_v1 = vpop.f32.mrf.mxu1 }
 0xe1b   : > { %v2956_v2 = vpop.xlane.xlu2 %2955 }
 0xe1c   : > { %v2957_v3 = vmul.f32 %v2956_v2, %v5378_v40 }
 0xe1e   : > { %v2958_v4 = vsub.f32 %v2952_v62, %v2957_v3 }
 0xe20   : > { %v2959_v5 = vmul.f32 %v2958_v4, %v2958_v4 }
 0xe22   : > { %2960 = vadd.xlane.f32.xlu0 %v2959_v5 }
 0xe95   : > { %v2961_v6 = vpop.xlane.xlu0 %2960 }
 0xe96   : > { %v2962_v7 = vmul.f32 %v2961_v6, %v5378_v40 }
 0xe98   : > { %v2963_v8 = vadd.f32 1e-05, %v2962_v7 }
 0xe9a   : > { %4162 = vrsqrt.f32 %v2963_v8  ;;  %vm2970_vm14 = vweird.f32 %v2963_v8 }
 0xea0   : > { %v4163_v9 = vpop.eup %4162 }
 0xea1   : > { %v2965_v10 = vmul.f32 %v4163_v9, %v2963_v8  ;;  %vm2971_vm13 = vweird.f32 %v4163_v9 }
 0xea2   : > { %vm2972_vm15 = vmor %vm2970_vm14, %vm2971_vm13 }
 0xea3   : > { %v2966_v11 = vmul.f32 %v4163_v9, %v2965_v10 }
 0xea5   : > { %v2967_v12 = vmul.f32 0.5, %v2966_v11 }
 0xea7   : > { %v2968_v13 = vsub.f32 1.5, %v2967_v12 }
 0xea9   : > { %v2969_v14 = vmul.f32 %v4163_v9, %v2968_v13 }
 0xeab   : > { %v2973_v16 = vsel %vm2972_vm15, %v4163_v9, %v2969_v14 }
 0xeac   : > { %v2974_v18 = vmul.f32 %v2973_v16, %v2958_v4 }
 0xeae   : > { %v2978_v19 = vmul.f32 %v4122_v15, %v2974_v18  ;;  %2987 = sbr.rel (%p3898_p2) target bundleno = 4032 (0xfc0), region = 196 }
 0xeb0   : > { %v2982_v63 = vadd.f32 %v4123_v17, %v2978_v19 }
 0xeb2   : > { %2983 = vst [vmem:[#allocation2] sm:$0xff] %v2982_v63 }
 0xeb3   : > { %2990 = vadd.xlane.f32.xlu0 %v2982_v63  ;;  %v4164_v34 = vld [vmem:[%s5740_s26] ss:$0 sm:$0xff] }
 0xf26   : > { %v2991_v20 = vpop.xlane.xlu0 %2990 }
 0xf27   : > { %v2992_v21 = vmul.f32 %v2991_v20, %v5378_v40 }
 0xf29   : > { %v2993_v22 = vsub.f32 %v2982_v63, %v2992_v21 }
 0xf2b   : > { %v2994_v23 = vmul.f32 %v2993_v22, %v2993_v22 }
 0xf2d   : > { %2995 = vadd.xlane.f32.xlu0 %v2994_v23 }
 0xfa0   : > { %v2996_v24 = vpop.xlane.xlu0 %2995 }
 0xfa1   : > { %v2997_v25 = vmul.f32 %v2996_v24, %v5378_v40  ;;  %v4165_v40 = vld [vmem:[%s5741_s17] ss:$0 sm:$0xff] }
 0xfa3   : > { %v2998_v26 = vadd.f32 1e-05, %v2997_v25 }
 0xfa5   : > { %4166 = vrsqrt.f32 %v2998_v26  ;;  %vm3005_vm1 = vweird.f32 %v2998_v26 }
 0xfab   : > { %v4167_v28 = vpop.eup %4166 }
 0xfac   : > { %v3000_v29 = vmul.f32 %v4167_v28, %v2998_v26  ;;  %vm3006_vm0 = vweird.f32 %v4167_v28 }
 0xfad   : > { %vm3007_vm2 = vmor %vm3005_vm1, %vm3006_vm0 }
 0xfae   : > { %v3001_v27 = vmul.f32 %v4167_v28, %v3000_v29 }
 0xfb0   : > { %v3002_v31 = vmul.f32 0.5, %v3001_v27 }
 0xfb2   : > { %v3003_v32 = vsub.f32 1.5, %v3002_v31 }
 0xfb4   : > { %v3004_v33 = vmul.f32 %v4167_v28, %v3003_v32 }
 0xfb6   : > { %v3008_v35 = vsel %vm3007_vm2, %v4167_v28, %v3004_v33 }
 0xfb7   : > { %v3009_v37 = vmul.f32 %v3008_v35, %v2993_v22 }
 0xfb9   : > { %v3013_v38 = vmul.f32 %v4164_v34, %v3009_v37 }
 0xfbb   : > { %v3017_v39 = vadd.f32 %v4165_v40, %v3013_v38 }
 0xfbd   : > { %v3018_v41 = vpack.c.bf16 %v3017_v39, %v3017_v39 }
 0xfbf   : > { %3019 = vst [vmem:[%s5239_s21] sm:$0xf] %v3018_v41 }
 0xfc0 PF: > { %s5742_s22 = sld [smem:[#allocation44_spill]] }
 0xfc1   : > { %s5743_s27 = sld [smem:[#allocation38_spill]] }
 0xfc2   : > { %s5744_s3 = sld [smem:[#allocation39_spill]] }
 0xfc3   : > { %s5745_s7 = sld [smem:[#allocation47_spill]] }
 0xfc4   : > { %s5746_s28 = sld [smem:[#allocation42_spill]] }
 0xfc5   : > { %s5747_s8 = sld [smem:[#allocation43_spill]] }
 0xfc6   : > { %s63_s0 = sadd.s32 1, %s5742_s22   ;;  %s5748_s4 = sld [smem:[#allocation45_spill]] }
 0xfc7   : > { %p60_p3 = scmp.ge.s32.totalorder %s63_s0, 6   ;;  %s5749_s29 = sld [smem:[#allocation46_spill]] }
 0xfc9   :  { %62 = sbr.rel (!%p60_p3) target bundleno = 49 (0x31), region = 374 }
 0xfce   :  { %3039 = vsyncpa [#allocation5], 1 }
 0xfcf   :  { %3041 = vsyncpa [#allocation5 + $0x1], 1 }
 0xfd0   :  { %3042 = vsyncpa [#allocation7], 1 }
 0xfd1   :  { %3044 = vsyncpa [#allocation7 + $0x1], 1 }
 0xfd2   :  { %3045 = vsyncpa [#allocation10], 1 }
 0xfd3   :  { %3047 = vsyncpa [#allocation10 + $0x1], 1 }
 0xfd4   :  { %3048 = vsyncpa [#allocation13], 1 }
 0xfd5   :  { %3050 = vsyncpa [#allocation13 + $0x1], 1 }
 0xfd6   :  { %3051 = vsyncpa [#allocation16], 1 }
 0xfd7   :  { %3053 = vsyncpa [#allocation16 + $0x1], 1 }
 0xfd8   :  { %3054 = vsyncpa [#allocation19], 1 }
 0xfd9   :  { %3056 = vsyncpa [#allocation19 + $0x1], 1 }
 0xfda   :  { %3057 = vsyncpa [#allocation22], 1 }
 0xfdb   :  { %3059 = vsyncpa [#allocation22 + $0x1], 1 }
 0xfdc   :  { %3060 = vsyncpa [#allocation25], 1 }
 0xfdd   :  { %3062 = vsyncpa [#allocation25 + $0x1], 1 }
 0xfde   :  { %3063 = vsyncpa [#allocation28], 1 }
 0xfdf   :  { %3065 = vsyncpa [#allocation28 + $0x1], 1 }

</bundles_post_ra>
